<compile_context>
chip_gen: v5e
topology: v5e:2x2
jax: 0.10.0
libtpu: 0.0.40
codegen_flags: <defaults>
</compile_context>

<pallas_src>
import random

import jax
import jax.numpy as jnp
from jax.experimental import pallas as pl
from jax.experimental.pallas import tpu as pltpu

# ---- small, module-consistent sizes ----
H = 32            # hidden_size == embedding_dim
V = 16            # vocab size (len(word2index))
VPAD = 128        # lane-padded vocab for output projection / log-softmax
B = 2             # batch
MAX_LEN = 10      # max_length (attention span)
T_IN = 6          # input sequence length  (T_IN + 1 <= MAX_LEN)
T_ENC = T_IN + 1  # torch appends one extra eos encoder step
T_TGT = 7         # target sequence length
SOS = 0           # embedder.get_index('<sos>')
EOS = 0           # the torch module also uses '<sos>' as eos_token
NEG = -1e30       # pad-logit bias (never wins argmax, exp underflows to 0)


# ----------------------------------------------------------------------------
# PyTorch nn.GRU cell with a single lane-dense packed pre-activation
#   g = x @ Wx + h @ Wh + b,  columns [r | z | n_i | n_h]  (4H = 128 lanes)
# ----------------------------------------------------------------------------
def _gru_step(x, h, wx, wh, b):
    hsz = h.shape[1]
    g = (jnp.dot(x, wx, preferred_element_type=jnp.float32)
         + jnp.dot(h, wh, preferred_element_type=jnp.float32) + b)
    r = jax.nn.sigmoid(g[:, :hsz])
    z = jax.nn.sigmoid(g[:, hsz:2 * hsz])
    n = jnp.tanh(g[:, 2 * hsz:3 * hsz] + r * g[:, 3 * hsz:])
    return (1.0 - z) * n + z * h


# ----------------------------------------------------------------------------
# Single fused kernel: whole encoder + attention-decoder forward pass
# ----------------------------------------------------------------------------
def seq2seq_kernel(enc_oh_ref, tgt_oh_ref, tf_ref,
                   Ee_ref, ewx_ref, ewh_ref, eb_ref,
                   Ed_ref, awe_ref, awh_ref, ab_ref,
                   cwe_ref, cwc_ref, cb_ref,
                   dwx_ref, dwh_ref, db_ref,
                   ow_ref, ob_ref,
                   logp_ref, nsteps_ref):
    # ---------------- encoder ----------------
    # all (T_ENC*B) embeddings in one matmul, hoisted out of the recurrence
    emb_all = jnp.dot(enc_oh_ref[...], Ee_ref[...],
                      preferred_element_type=jnp.float32)         # (T_ENC*B, H)
    ewx = ewx_ref[...]; ewh = ewh_ref[...]; eb = eb_ref[...]

    h = jnp.zeros((B, H), jnp.float32)
    enc_rows = []
    for t in range(T_ENC):
        x = emb_all[t * B:(t + 1) * B, :]
        h = _gru_step(x, h, ewx, ewh, eb)
        enc_rows.append(h[0:1, :])       # torch: encoder_outputs[t] = output[0, 0]
    enc_rows.append(jnp.zeros((MAX_LEN - T_ENC, H), jnp.float32))
    enc_out = jnp.concatenate(enc_rows, axis=0)                   # (MAX_LEN, H)

    # ---------------- decoder ----------------
    Ed = Ed_ref[...]
    awe = awe_ref[...]; awh = awh_ref[...]; ab = ab_ref[...]
    cwe = cwe_ref[...]; cwc = cwc_ref[...]; cb = cb_ref[...]
    dwx = dwx_ref[...]; dwh = dwh_ref[...]; db = db_ref[...]
    ow = ow_ref[...]; ob = ob_ref[...]
    tgt_oh = tgt_oh_ref[...]                                      # (T_TGT, B, V)
    tf = tf_ref[...]                                              # (1, 1) in {0., 1.}

    iota_v = jax.lax.broadcasted_iota(jnp.int32, (B, V), 1).astype(jnp.float32)
    iota_vp = jax.lax.broadcasted_iota(jnp.int32, (B, VPAD), 1).astype(jnp.float32)

    x_oh = (iota_v == float(SOS)).astype(jnp.float32)             # <sos> start token
    done = jnp.zeros((1, 1), jnp.float32)
    nsteps = jnp.zeros((1, 1), jnp.int32)

    for t in range(T_TGT):
        # TODO(synk): nn.Dropout(p=0.1) on the decoder embedding is stochastic in
        # train mode; treated as identity (eval mode) here.
        emb = jnp.dot(x_oh, Ed, preferred_element_type=jnp.float32)       # (B, H)

        # attention over encoder memory (split form: no lane-axis concat)
        att = (jnp.dot(emb, awe, preferred_element_type=jnp.float32)
               + jnp.dot(h, awh, preferred_element_type=jnp.float32) + ab)  # (B, L)
        att = att - jnp.max(att, axis=1, keepdims=True)
        e = jnp.exp(att)
        attn_w = e * pl.reciprocal(jnp.sum(e, axis=1, keepdims=True), approx=True)
        ctx = jnp.dot(attn_w, enc_out, preferred_element_type=jnp.float32)  # (B, H)

        # attn_combine -> relu -> GRU
        x = jnp.maximum(
            jnp.dot(emb, cwe, preferred_element_type=jnp.float32)
            + jnp.dot(ctx, cwc, preferred_element_type=jnp.float32) + cb, 0.0)
        h = _gru_step(x, h, dwx, dwh, db)

        # output projection (lane-padded to 128) + log_softmax
        logits = jnp.dot(h, ow, preferred_element_type=jnp.float32) + ob    # (B, 128)
        m = jnp.max(logits, axis=1, keepdims=True)
        lse = jnp.log(jnp.sum(jnp.exp(logits - m), axis=1, keepdims=True)) + m
        logp = logits - lse
        logp_ref[t] = logp                                  # resident output block

        # next input token: teacher forcing vs greedy argmax (first-max tie rule)
        row_max = jnp.max(logp, axis=1, keepdims=True)
        idx = jnp.where(logp >= row_max, iota_vp, float(VPAD))
        greedy = jnp.min(idx, axis=1, keepdims=True)                        # (B, 1)
        greedy_oh = (iota_v == greedy).astype(jnp.float32)
        x_oh = tf * tgt_oh[t] + (1.0 - tf) * greedy_oh

        # torch early-EOS break bookkeeping (batch element 0's next input token)
        eos_hit = x_oh[0:1, EOS:EOS + 1]                                    # (1, 1)
        active = done < 0.5
        nsteps = jnp.where(active, jnp.int32(t + 1), nsteps)
        done = jnp.where(active & (eos_hit > 0.5), 1.0, done)

    nsteps_ref[...] = nsteps


# ----------------------------------------------------------------------------
# pallas_call wrapper: one dispatch for the whole forward pass
# ----------------------------------------------------------------------------
def _resident(a):
    # full array as one block, constant index map -> DMA'd once, resident in VMEM
    nd = a.ndim
    return pl.BlockSpec(a.shape, lambda i, _nd=nd: (0,) * _nd)


@jax.jit
def _forward_core(params, input_tokens, target_tokens, tf_flag):
    batch = input_tokens.shape[1]
    # append the extra eos ('<sos>') encoder step, as in the torch forward
    enc_tokens = jnp.concatenate(
        [input_tokens, jnp.full((1, batch), EOS, jnp.int32)], axis=0)       # (T_ENC, B)
    enc_oh = jax.nn.one_hot(enc_tokens.reshape(-1), V, dtype=jnp.float32)   # (T_ENC*B, V)
    tgt_oh = jax.nn.one_hot(target_tokens, V, dtype=jnp.float32)            # (T_TGT, B, V)

    operands = (enc_oh, tgt_oh, tf_flag,
                params["E_enc"], params["enc_wx"], params["enc_wh"], params["enc_b"],
                params["E_dec"], params["attn_we"], params["attn_wh"], params["attn_b"],
                params["comb_we"], params["comb_wc"], params["comb_b"],
                params["dec_wx"], params["dec_wh"], params["dec_b"],
                params["out_w"], params["out_b"])

    logp_pad, nsteps = pl.pallas_call(
        seq2seq_kernel,
        grid=(1,),
        in_specs=[_resident(a) for a in operands],
        out_specs=(
            pl.BlockSpec((T_TGT, batch, VPAD), lambda i: (0, 0, 0)),  # log-probs
            pl.BlockSpec((1, 1), lambda i: (0, 0)),                   # valid step count
        ),
        out_shape=(jax.ShapeDtypeStruct((T_TGT, batch, VPAD), jnp.float32),
                   jax.ShapeDtypeStruct((1, 1), jnp.int32)),
        compiler_params=pltpu.CompilerParams(dimension_semantics=("arbitrary",)),
    )(*operands)
    return logp_pad[:, :, :V], nsteps


# ----------------------------------------------------------------------------
# Deterministic parameter init (torch-layout shapes, then packed for the kernel)
# ----------------------------------------------------------------------------
def init_params(key):
    ks = jax.random.split(key, 16)

    def w(k, shape):
        return jax.random.normal(k, shape, jnp.float32) * 0.1

    def gru_pack(wih, whh, bih, bhh):
        # torch layout: weight_ih/hh (3H, H) with gates (r, z, n); biases (1, 3H)
        wih_t = wih.T                                            # (H, 3H)
        whh_t = whh.T
        zeros = jnp.zeros((H, H), jnp.float32)
        wx = jnp.concatenate([wih_t[:, :2 * H], wih_t[:, 2 * H:], zeros], axis=1)  # (H,4H)
        wh = jnp.concatenate([whh_t[:, :2 * H], zeros, whh_t[:, 2 * H:]], axis=1)  # (H,4H)
        b = jnp.concatenate([bih[:, :2 * H] + bhh[:, :2 * H],
                             bih[:, 2 * H:], bhh[:, 2 * H:]], axis=1)              # (1,4H)
        return wx, wh, b

    p = {}
    p["E_enc"] = w(ks[0], (V, H))          # EncoderRNN's own nn.Embedding
    p["E_dec"] = w(ks[1], (V, H))          # shared embedder used by the decoder
    p["enc_wx"], p["enc_wh"], p["enc_b"] = gru_pack(
        w(ks[2], (3 * H, H)), w(ks[3], (3 * H, H)),
        w(ks[4], (1, 3 * H)), w(ks[5], (1, 3 * H)))
    # attn: Linear(2H -> MAX_LEN), input = cat(embedded, hidden)  -> split form
    attn_w = w(ks[6], (MAX_LEN, 2 * H)).T                        # (2H, L)
    p["attn_we"] = attn_w[:H]
    p["attn_wh"] = attn_w[H:]
    p["attn_b"] = w(ks[7], (1, MAX_LEN))
    # attn_combine: Linear(2H -> H), input = cat(embedded, attn_applied) -> split form
    comb_w = w(ks[8], (H, 2 * H)).T                              # (2H, H)
    p["comb_we"] = comb_w[:H]
    p["comb_wc"] = comb_w[H:]
    p["comb_b"] = w(ks[9], (1, H))
    p["dec_wx"], p["dec_wh"], p["dec_b"] = gru_pack(
        w(ks[10], (3 * H, H)), w(ks[11], (3 * H, H)),
        w(ks[12], (1, 3 * H)), w(ks[13], (1, 3 * H)))
    # out: Linear(H -> V), lane-padded to 128 columns (pad bias NEG never wins)
    out_w = w(ks[14], (V, H)).T                                  # (H, V)
    p["out_w"] = jnp.concatenate(
        [out_w, jnp.zeros((H, VPAD - V), jnp.float32)], axis=1)
    p["out_b"] = jnp.concatenate(
        [w(ks[15], (1, V)), jnp.full((1, VPAD - V), NEG, jnp.float32)], axis=1)
    return p


# ----------------------------------------------------------------------------
# Forward pass: one kernel dispatch, one host sync at the very end
# ----------------------------------------------------------------------------
def attn_autoencoder_forward(params, input_tensor, target_tensor,
                             teacher_forcing_ratio=0.5):
    # teacher-forcing coin flip stays host-side, as in the torch module
    use_tf = random.random() < teacher_forcing_ratio
    tf_flag = jnp.full((1, 1), 1.0 if use_tf else 0.0, jnp.float32)
    logp_full, nsteps = _forward_core(params, input_tensor, target_tensor, tf_flag)
    # single device->host sync: reproduce the torch early-EOS break output length
    n = int(nsteps[0, 0])
    return logp_full[:n], target_tensor


# ----------------------------------------------------------------------------
if __name__ == "__main__":
    random.seed(0)  # deterministic teacher-forcing coin flip
    key = jax.random.PRNGKey(0)
    pkey, ikey, tkey = jax.random.split(key, 3)

    params = init_params(pkey)
    # (seq_len, batch) int32 token ids; keep them away from the sos/eos index 0
    input_tokens = jax.random.randint(ikey, (T_IN, B), 1, V, dtype=jnp.int32)
    target_tokens = jax.random.randint(tkey, (T_TGT, B), 1, V, dtype=jnp.int32)

    dec_out, tgt = attn_autoencoder_forward(params, input_tokens, target_tokens,
                                            teacher_forcing_ratio=0.5)
    jax.block_until_ready(dec_out)
    jax.block_until_ready(tgt)
    assert dec_out.ndim == 3 and dec_out.shape[1:] == (B, V)
    assert 1 <= dec_out.shape[0] <= T_TGT
    assert bool(jnp.all(jnp.isfinite(dec_out)))
    print("KERNEL_OK")
</pallas_src>

<mosaic_0001>
module attributes {stable_mosaic.version = 11 : i64} {
  func.func @seq2seq_kernel(%arg0: i32, %arg1: memref<14x16xf32, #tpu.memory_space<vmem>>, %arg2: memref<7x2x16xf32, #tpu.memory_space<vmem>>, %arg3: memref<1x1xf32, #tpu.memory_space<vmem>>, %arg4: memref<16x32xf32, #tpu.memory_space<vmem>>, %arg5: memref<32x128xf32, #tpu.memory_space<vmem>>, %arg6: memref<32x128xf32, #tpu.memory_space<vmem>>, %arg7: memref<1x128xf32, #tpu.memory_space<vmem>>, %arg8: memref<16x32xf32, #tpu.memory_space<vmem>>, %arg9: memref<32x10xf32, #tpu.memory_space<vmem>>, %arg10: memref<32x10xf32, #tpu.memory_space<vmem>>, %arg11: memref<1x10xf32, #tpu.memory_space<vmem>>, %arg12: memref<32x32xf32, #tpu.memory_space<vmem>>, %arg13: memref<32x32xf32, #tpu.memory_space<vmem>>, %arg14: memref<1x32xf32, #tpu.memory_space<vmem>>, %arg15: memref<32x128xf32, #tpu.memory_space<vmem>>, %arg16: memref<32x128xf32, #tpu.memory_space<vmem>>, %arg17: memref<1x128xf32, #tpu.memory_space<vmem>>, %arg18: memref<32x128xf32, #tpu.memory_space<vmem>>, %arg19: memref<1x128xf32, #tpu.memory_space<vmem>>, %arg20: memref<7x2x128xf32, #tpu.memory_space<vmem>>, %arg21: memref<1x1xi32, #tpu.memory_space<vmem>>) attributes {dimension_semantics = [#tpu.dimension_semantics<arbitrary>], iteration_bounds = array<i64: 1>, scalar_prefetch = 0 : i64, scratch_operands = 0 : i64, tpu.core_type = #tpu.core_type<tc>, window_params = [{pipeline_mode = #tpu.pipeline_mode<synchronous>, transform_indices = @transform_0, window_bounds = array<i64: 14, 16>}, {pipeline_mode = #tpu.pipeline_mode<synchronous>, transform_indices = @transform_1, window_bounds = array<i64: 7, 2, 16>}, {pipeline_mode = #tpu.pipeline_mode<synchronous>, transform_indices = @transform_2, window_bounds = array<i64: 1, 1>}, {pipeline_mode = #tpu.pipeline_mode<synchronous>, transform_indices = @transform_3, window_bounds = array<i64: 16, 32>}, {pipeline_mode = #tpu.pipeline_mode<synchronous>, transform_indices = @transform_4, window_bounds = array<i64: 32, 128>}, {pipeline_mode = #tpu.pipeline_mode<synchronous>, transform_indices = @transform_5, window_bounds = array<i64: 32, 128>}, {pipeline_mode = #tpu.pipeline_mode<synchronous>, transform_indices = @transform_6, window_bounds = array<i64: 1, 128>}, {pipeline_mode = #tpu.pipeline_mode<synchronous>, transform_indices = @transform_7, window_bounds = array<i64: 16, 32>}, {pipeline_mode = #tpu.pipeline_mode<synchronous>, transform_indices = @transform_8, window_bounds = array<i64: 32, 10>}, {pipeline_mode = #tpu.pipeline_mode<synchronous>, transform_indices = @transform_9, window_bounds = array<i64: 32, 10>}, {pipeline_mode = #tpu.pipeline_mode<synchronous>, transform_indices = @transform_10, window_bounds = array<i64: 1, 10>}, {pipeline_mode = #tpu.pipeline_mode<synchronous>, transform_indices = @transform_11, window_bounds = array<i64: 32, 32>}, {pipeline_mode = #tpu.pipeline_mode<synchronous>, transform_indices = @transform_12, window_bounds = array<i64: 32, 32>}, {pipeline_mode = #tpu.pipeline_mode<synchronous>, transform_indices = @transform_13, window_bounds = array<i64: 1, 32>}, {pipeline_mode = #tpu.pipeline_mode<synchronous>, transform_indices = @transform_14, window_bounds = array<i64: 32, 128>}, {pipeline_mode = #tpu.pipeline_mode<synchronous>, transform_indices = @transform_15, window_bounds = array<i64: 32, 128>}, {pipeline_mode = #tpu.pipeline_mode<synchronous>, transform_indices = @transform_16, window_bounds = array<i64: 1, 128>}, {pipeline_mode = #tpu.pipeline_mode<synchronous>, transform_indices = @transform_17, window_bounds = array<i64: 32, 128>}, {pipeline_mode = #tpu.pipeline_mode<synchronous>, transform_indices = @transform_18, window_bounds = array<i64: 1, 128>}, {pipeline_mode = #tpu.pipeline_mode<synchronous>, transform_indices = @transform_19, window_bounds = array<i64: 7, 2, 128>}, {pipeline_mode = #tpu.pipeline_mode<synchronous>, transform_indices = @transform_20, window_bounds = array<i64: 1, 1>}]} {
    %c0 = arith.constant 0 : index
    %c0_0 = arith.constant 0 : index
    %0 = vector.load %arg1[%c0, %c0_0] : memref<14x16xf32, #tpu.memory_space<vmem>>, vector<14x16xf32>
    %c0_1 = arith.constant 0 : index
    %c0_2 = arith.constant 0 : index
    %1 = vector.load %arg4[%c0_1, %c0_2] : memref<16x32xf32, #tpu.memory_space<vmem>>, vector<16x32xf32>
    %cst = arith.constant dense<0.000000e+00> : vector<14x32xf32>
    %2 = tpu.matmul %0, %1, %cst {dimension_numbers = #tpu.dot_dimension_numbers<[1], [0], [0], [1], [0, 0, 1, 1], [], []>} : vector<14x16xf32>, vector<16x32xf32>, vector<14x32xf32> -> vector<14x32xf32>
    %c0_3 = arith.constant 0 : index
    %c0_4 = arith.constant 0 : index
    %3 = vector.load %arg5[%c0_3, %c0_4] : memref<32x128xf32, #tpu.memory_space<vmem>>, vector<32x128xf32>
    %c0_5 = arith.constant 0 : index
    %c0_6 = arith.constant 0 : index
    %4 = vector.load %arg6[%c0_5, %c0_6] : memref<32x128xf32, #tpu.memory_space<vmem>>, vector<32x128xf32>
    %c0_7 = arith.constant 0 : index
    %c0_8 = arith.constant 0 : index
    %5 = vector.load %arg7[%c0_7, %c0_8] : memref<1x128xf32, #tpu.memory_space<vmem>>, vector<1x128xf32>
    %cst_9 = arith.constant 0.000000e+00 : f32
    %6 = vector.broadcast %cst_9 : f32 to vector<2x32xf32>
    %7 = vector.extract_strided_slice %2 {offsets = [0, 0], sizes = [2, 32], strides = [1, 1]} : vector<14x32xf32> to vector<2x32xf32>
    %cst_10 = arith.constant dense<0.000000e+00> : vector<2x128xf32>
    %8 = tpu.matmul %7, %3, %cst_10 {dimension_numbers = #tpu.dot_dimension_numbers<[1], [0], [0], [1], [0, 0, 1, 1], [], []>} : vector<2x32xf32>, vector<32x128xf32>, vector<2x128xf32> -> vector<2x128xf32>
    %cst_11 = arith.constant dense<0.000000e+00> : vector<2x128xf32>
    %9 = tpu.matmul %6, %4, %cst_11 {dimension_numbers = #tpu.dot_dimension_numbers<[1], [0], [0], [1], [0, 0, 1, 1], [], []>} : vector<2x32xf32>, vector<32x128xf32>, vector<2x128xf32> -> vector<2x128xf32>
    %10 = arith.addf %8, %9 : vector<2x128xf32>
    %11 = vector.broadcast %5 : vector<1x128xf32> to vector<2x128xf32>
    %12 = arith.addf %10, %11 : vector<2x128xf32>
    %13 = vector.extract_strided_slice %12 {offsets = [0, 0], sizes = [2, 32], strides = [1, 1]} : vector<2x128xf32> to vector<2x32xf32>
    %14 = arith.negf %13 : vector<2x32xf32>
    %15 = math.exp %14 : vector<2x32xf32>
    %cst_12 = arith.constant 1.000000e+00 : f32
    %16 = vector.broadcast %cst_12 : f32 to vector<2x32xf32>
    %17 = arith.addf %16, %15 : vector<2x32xf32>
    %18 = arith.divf %16, %17 : vector<2x32xf32>
    %19 = vector.extract_strided_slice %12 {offsets = [0, 32], sizes = [2, 32], strides = [1, 1]} : vector<2x128xf32> to vector<2x32xf32>
    %20 = arith.negf %19 : vector<2x32xf32>
    %21 = math.exp %20 : vector<2x32xf32>
    %cst_13 = arith.constant 1.000000e+00 : f32
    %22 = vector.broadcast %cst_13 : f32 to vector<2x32xf32>
    %23 = arith.addf %22, %21 : vector<2x32xf32>
    %24 = arith.divf %22, %23 : vector<2x32xf32>
    %25 = vector.extract_strided_slice %12 {offsets = [0, 64], sizes = [2, 32], strides = [1, 1]} : vector<2x128xf32> to vector<2x32xf32>
    %26 = vector.extract_strided_slice %12 {offsets = [0, 96], sizes = [2, 32], strides = [1, 1]} : vector<2x128xf32> to vector<2x32xf32>
    %27 = arith.mulf %18, %26 : vector<2x32xf32>
    %28 = arith.addf %25, %27 : vector<2x32xf32>
    %29 = math.tanh %28 : vector<2x32xf32>
    %cst_14 = arith.constant 1.000000e+00 : f32
    %30 = vector.broadcast %cst_14 : f32 to vector<2x32xf32>
    %31 = arith.subf %30, %24 : vector<2x32xf32>
    %32 = arith.mulf %31, %29 : vector<2x32xf32>
    %33 = arith.mulf %24, %6 : vector<2x32xf32>
    %34 = arith.addf %32, %33 : vector<2x32xf32>
    %35 = vector.extract_strided_slice %34 {offsets = [0, 0], sizes = [1, 32], strides = [1, 1]} : vector<2x32xf32> to vector<1x32xf32>
    %36 = vector.extract_strided_slice %2 {offsets = [2, 0], sizes = [2, 32], strides = [1, 1]} : vector<14x32xf32> to vector<2x32xf32>
    %cst_15 = arith.constant dense<0.000000e+00> : vector<2x128xf32>
    %37 = tpu.matmul %36, %3, %cst_15 {dimension_numbers = #tpu.dot_dimension_numbers<[1], [0], [0], [1], [0, 0, 1, 1], [], []>} : vector<2x32xf32>, vector<32x128xf32>, vector<2x128xf32> -> vector<2x128xf32>
    %cst_16 = arith.constant dense<0.000000e+00> : vector<2x128xf32>
    %38 = tpu.matmul %34, %4, %cst_16 {dimension_numbers = #tpu.dot_dimension_numbers<[1], [0], [0], [1], [0, 0, 1, 1], [], []>} : vector<2x32xf32>, vector<32x128xf32>, vector<2x128xf32> -> vector<2x128xf32>
    %39 = arith.addf %37, %38 : vector<2x128xf32>
    %40 = vector.broadcast %5 : vector<1x128xf32> to vector<2x128xf32>
    %41 = arith.addf %39, %40 : vector<2x128xf32>
    %42 = vector.extract_strided_slice %41 {offsets = [0, 0], sizes = [2, 32], strides = [1, 1]} : vector<2x128xf32> to vector<2x32xf32>
    %43 = arith.negf %42 : vector<2x32xf32>
    %44 = math.exp %43 : vector<2x32xf32>
    %cst_17 = arith.constant 1.000000e+00 : f32
    %45 = vector.broadcast %cst_17 : f32 to vector<2x32xf32>
    %46 = arith.addf %45, %44 : vector<2x32xf32>
    %47 = arith.divf %45, %46 : vector<2x32xf32>
    %48 = vector.extract_strided_slice %41 {offsets = [0, 32], sizes = [2, 32], strides = [1, 1]} : vector<2x128xf32> to vector<2x32xf32>
    %49 = arith.negf %48 : vector<2x32xf32>
    %50 = math.exp %49 : vector<2x32xf32>
    %cst_18 = arith.constant 1.000000e+00 : f32
    %51 = vector.broadcast %cst_18 : f32 to vector<2x32xf32>
    %52 = arith.addf %51, %50 : vector<2x32xf32>
    %53 = arith.divf %51, %52 : vector<2x32xf32>
    %54 = vector.extract_strided_slice %41 {offsets = [0, 64], sizes = [2, 32], strides = [1, 1]} : vector<2x128xf32> to vector<2x32xf32>
    %55 = vector.extract_strided_slice %41 {offsets = [0, 96], sizes = [2, 32], strides = [1, 1]} : vector<2x128xf32> to vector<2x32xf32>
    %56 = arith.mulf %47, %55 : vector<2x32xf32>
    %57 = arith.addf %54, %56 : vector<2x32xf32>
    %58 = math.tanh %57 : vector<2x32xf32>
    %cst_19 = arith.constant 1.000000e+00 : f32
    %59 = vector.broadcast %cst_19 : f32 to vector<2x32xf32>
    %60 = arith.subf %59, %53 : vector<2x32xf32>
    %61 = arith.mulf %60, %58 : vector<2x32xf32>
    %62 = arith.mulf %53, %34 : vector<2x32xf32>
    %63 = arith.addf %61, %62 : vector<2x32xf32>
    %64 = vector.extract_strided_slice %63 {offsets = [0, 0], sizes = [1, 32], strides = [1, 1]} : vector<2x32xf32> to vector<1x32xf32>
    %65 = vector.extract_strided_slice %2 {offsets = [4, 0], sizes = [2, 32], strides = [1, 1]} : vector<14x32xf32> to vector<2x32xf32>
    %cst_20 = arith.constant dense<0.000000e+00> : vector<2x128xf32>
    %66 = tpu.matmul %65, %3, %cst_20 {dimension_numbers = #tpu.dot_dimension_numbers<[1], [0], [0], [1], [0, 0, 1, 1], [], []>} : vector<2x32xf32>, vector<32x128xf32>, vector<2x128xf32> -> vector<2x128xf32>
    %cst_21 = arith.constant dense<0.000000e+00> : vector<2x128xf32>
    %67 = tpu.matmul %63, %4, %cst_21 {dimension_numbers = #tpu.dot_dimension_numbers<[1], [0], [0], [1], [0, 0, 1, 1], [], []>} : vector<2x32xf32>, vector<32x128xf32>, vector<2x128xf32> -> vector<2x128xf32>
    %68 = arith.addf %66, %67 : vector<2x128xf32>
    %69 = vector.broadcast %5 : vector<1x128xf32> to vector<2x128xf32>
    %70 = arith.addf %68, %69 : vector<2x128xf32>
    %71 = vector.extract_strided_slice %70 {offsets = [0, 0], sizes = [2, 32], strides = [1, 1]} : vector<2x128xf32> to vector<2x32xf32>
    %72 = arith.negf %71 : vector<2x32xf32>
    %73 = math.exp %72 : vector<2x32xf32>
    %cst_22 = arith.constant 1.000000e+00 : f32
    %74 = vector.broadcast %cst_22 : f32 to vector<2x32xf32>
    %75 = arith.addf %74, %73 : vector<2x32xf32>
    %76 = arith.divf %74, %75 : vector<2x32xf32>
    %77 = vector.extract_strided_slice %70 {offsets = [0, 32], sizes = [2, 32], strides = [1, 1]} : vector<2x128xf32> to vector<2x32xf32>
    %78 = arith.negf %77 : vector<2x32xf32>
    %79 = math.exp %78 : vector<2x32xf32>
    %cst_23 = arith.constant 1.000000e+00 : f32
    %80 = vector.broadcast %cst_23 : f32 to vector<2x32xf32>
    %81 = arith.addf %80, %79 : vector<2x32xf32>
    %82 = arith.divf %80, %81 : vector<2x32xf32>
    %83 = vector.extract_strided_slice %70 {offsets = [0, 64], sizes = [2, 32], strides = [1, 1]} : vector<2x128xf32> to vector<2x32xf32>
    %84 = vector.extract_strided_slice %70 {offsets = [0, 96], sizes = [2, 32], strides = [1, 1]} : vector<2x128xf32> to vector<2x32xf32>
    %85 = arith.mulf %76, %84 : vector<2x32xf32>
    %86 = arith.addf %83, %85 : vector<2x32xf32>
    %87 = math.tanh %86 : vector<2x32xf32>
    %cst_24 = arith.constant 1.000000e+00 : f32
    %88 = vector.broadcast %cst_24 : f32 to vector<2x32xf32>
    %89 = arith.subf %88, %82 : vector<2x32xf32>
    %90 = arith.mulf %89, %87 : vector<2x32xf32>
    %91 = arith.mulf %82, %63 : vector<2x32xf32>
    %92 = arith.addf %90, %91 : vector<2x32xf32>
    %93 = vector.extract_strided_slice %92 {offsets = [0, 0], sizes = [1, 32], strides = [1, 1]} : vector<2x32xf32> to vector<1x32xf32>
    %94 = vector.extract_strided_slice %2 {offsets = [6, 0], sizes = [2, 32], strides = [1, 1]} : vector<14x32xf32> to vector<2x32xf32>
    %cst_25 = arith.constant dense<0.000000e+00> : vector<2x128xf32>
    %95 = tpu.matmul %94, %3, %cst_25 {dimension_numbers = #tpu.dot_dimension_numbers<[1], [0], [0], [1], [0, 0, 1, 1], [], []>} : vector<2x32xf32>, vector<32x128xf32>, vector<2x128xf32> -> vector<2x128xf32>
    %cst_26 = arith.constant dense<0.000000e+00> : vector<2x128xf32>
    %96 = tpu.matmul %92, %4, %cst_26 {dimension_numbers = #tpu.dot_dimension_numbers<[1], [0], [0], [1], [0, 0, 1, 1], [], []>} : vector<2x32xf32>, vector<32x128xf32>, vector<2x128xf32> -> vector<2x128xf32>
    %97 = arith.addf %95, %96 : vector<2x128xf32>
    %98 = vector.broadcast %5 : vector<1x128xf32> to vector<2x128xf32>
    %99 = arith.addf %97, %98 : vector<2x128xf32>
    %100 = vector.extract_strided_slice %99 {offsets = [0, 0], sizes = [2, 32], strides = [1, 1]} : vector<2x128xf32> to vector<2x32xf32>
    %101 = arith.negf %100 : vector<2x32xf32>
    %102 = math.exp %101 : vector<2x32xf32>
    %cst_27 = arith.constant 1.000000e+00 : f32
    %103 = vector.broadcast %cst_27 : f32 to vector<2x32xf32>
    %104 = arith.addf %103, %102 : vector<2x32xf32>
    %105 = arith.divf %103, %104 : vector<2x32xf32>
    %106 = vector.extract_strided_slice %99 {offsets = [0, 32], sizes = [2, 32], strides = [1, 1]} : vector<2x128xf32> to vector<2x32xf32>
    %107 = arith.negf %106 : vector<2x32xf32>
    %108 = math.exp %107 : vector<2x32xf32>
    %cst_28 = arith.constant 1.000000e+00 : f32
    %109 = vector.broadcast %cst_28 : f32 to vector<2x32xf32>
    %110 = arith.addf %109, %108 : vector<2x32xf32>
    %111 = arith.divf %109, %110 : vector<2x32xf32>
    %112 = vector.extract_strided_slice %99 {offsets = [0, 64], sizes = [2, 32], strides = [1, 1]} : vector<2x128xf32> to vector<2x32xf32>
    %113 = vector.extract_strided_slice %99 {offsets = [0, 96], sizes = [2, 32], strides = [1, 1]} : vector<2x128xf32> to vector<2x32xf32>
    %114 = arith.mulf %105, %113 : vector<2x32xf32>
    %115 = arith.addf %112, %114 : vector<2x32xf32>
    %116 = math.tanh %115 : vector<2x32xf32>
    %cst_29 = arith.constant 1.000000e+00 : f32
    %117 = vector.broadcast %cst_29 : f32 to vector<2x32xf32>
    %118 = arith.subf %117, %111 : vector<2x32xf32>
    %119 = arith.mulf %118, %116 : vector<2x32xf32>
    %120 = arith.mulf %111, %92 : vector<2x32xf32>
    %121 = arith.addf %119, %120 : vector<2x32xf32>
    %122 = vector.extract_strided_slice %121 {offsets = [0, 0], sizes = [1, 32], strides = [1, 1]} : vector<2x32xf32> to vector<1x32xf32>
    %123 = vector.extract_strided_slice %2 {offsets = [8, 0], sizes = [2, 32], strides = [1, 1]} : vector<14x32xf32> to vector<2x32xf32>
    %cst_30 = arith.constant dense<0.000000e+00> : vector<2x128xf32>
    %124 = tpu.matmul %123, %3, %cst_30 {dimension_numbers = #tpu.dot_dimension_numbers<[1], [0], [0], [1], [0, 0, 1, 1], [], []>} : vector<2x32xf32>, vector<32x128xf32>, vector<2x128xf32> -> vector<2x128xf32>
    %cst_31 = arith.constant dense<0.000000e+00> : vector<2x128xf32>
    %125 = tpu.matmul %121, %4, %cst_31 {dimension_numbers = #tpu.dot_dimension_numbers<[1], [0], [0], [1], [0, 0, 1, 1], [], []>} : vector<2x32xf32>, vector<32x128xf32>, vector<2x128xf32> -> vector<2x128xf32>
    %126 = arith.addf %124, %125 : vector<2x128xf32>
    %127 = vector.broadcast %5 : vector<1x128xf32> to vector<2x128xf32>
    %128 = arith.addf %126, %127 : vector<2x128xf32>
    %129 = vector.extract_strided_slice %128 {offsets = [0, 0], sizes = [2, 32], strides = [1, 1]} : vector<2x128xf32> to vector<2x32xf32>
    %130 = arith.negf %129 : vector<2x32xf32>
    %131 = math.exp %130 : vector<2x32xf32>
    %cst_32 = arith.constant 1.000000e+00 : f32
    %132 = vector.broadcast %cst_32 : f32 to vector<2x32xf32>
    %133 = arith.addf %132, %131 : vector<2x32xf32>
    %134 = arith.divf %132, %133 : vector<2x32xf32>
    %135 = vector.extract_strided_slice %128 {offsets = [0, 32], sizes = [2, 32], strides = [1, 1]} : vector<2x128xf32> to vector<2x32xf32>
    %136 = arith.negf %135 : vector<2x32xf32>
    %137 = math.exp %136 : vector<2x32xf32>
    %cst_33 = arith.constant 1.000000e+00 : f32
    %138 = vector.broadcast %cst_33 : f32 to vector<2x32xf32>
    %139 = arith.addf %138, %137 : vector<2x32xf32>
    %140 = arith.divf %138, %139 : vector<2x32xf32>
    %141 = vector.extract_strided_slice %128 {offsets = [0, 64], sizes = [2, 32], strides = [1, 1]} : vector<2x128xf32> to vector<2x32xf32>
    %142 = vector.extract_strided_slice %128 {offsets = [0, 96], sizes = [2, 32], strides = [1, 1]} : vector<2x128xf32> to vector<2x32xf32>
    %143 = arith.mulf %134, %142 : vector<2x32xf32>
    %144 = arith.addf %141, %143 : vector<2x32xf32>
    %145 = math.tanh %144 : vector<2x32xf32>
    %cst_34 = arith.constant 1.000000e+00 : f32
    %146 = vector.broadcast %cst_34 : f32 to vector<2x32xf32>
    %147 = arith.subf %146, %140 : vector<2x32xf32>
    %148 = arith.mulf %147, %145 : vector<2x32xf32>
    %149 = arith.mulf %140, %121 : vector<2x32xf32>
    %150 = arith.addf %148, %149 : vector<2x32xf32>
    %151 = vector.extract_strided_slice %150 {offsets = [0, 0], sizes = [1, 32], strides = [1, 1]} : vector<2x32xf32> to vector<1x32xf32>
    %152 = vector.extract_strided_slice %2 {offsets = [10, 0], sizes = [2, 32], strides = [1, 1]} : vector<14x32xf32> to vector<2x32xf32>
    %cst_35 = arith.constant dense<0.000000e+00> : vector<2x128xf32>
    %153 = tpu.matmul %152, %3, %cst_35 {dimension_numbers = #tpu.dot_dimension_numbers<[1], [0], [0], [1], [0, 0, 1, 1], [], []>} : vector<2x32xf32>, vector<32x128xf32>, vector<2x128xf32> -> vector<2x128xf32>
    %cst_36 = arith.constant dense<0.000000e+00> : vector<2x128xf32>
    %154 = tpu.matmul %150, %4, %cst_36 {dimension_numbers = #tpu.dot_dimension_numbers<[1], [0], [0], [1], [0, 0, 1, 1], [], []>} : vector<2x32xf32>, vector<32x128xf32>, vector<2x128xf32> -> vector<2x128xf32>
    %155 = arith.addf %153, %154 : vector<2x128xf32>
    %156 = vector.broadcast %5 : vector<1x128xf32> to vector<2x128xf32>
    %157 = arith.addf %155, %156 : vector<2x128xf32>
    %158 = vector.extract_strided_slice %157 {offsets = [0, 0], sizes = [2, 32], strides = [1, 1]} : vector<2x128xf32> to vector<2x32xf32>
    %159 = arith.negf %158 : vector<2x32xf32>
    %160 = math.exp %159 : vector<2x32xf32>
    %cst_37 = arith.constant 1.000000e+00 : f32
    %161 = vector.broadcast %cst_37 : f32 to vector<2x32xf32>
    %162 = arith.addf %161, %160 : vector<2x32xf32>
    %163 = arith.divf %161, %162 : vector<2x32xf32>
    %164 = vector.extract_strided_slice %157 {offsets = [0, 32], sizes = [2, 32], strides = [1, 1]} : vector<2x128xf32> to vector<2x32xf32>
    %165 = arith.negf %164 : vector<2x32xf32>
    %166 = math.exp %165 : vector<2x32xf32>
    %cst_38 = arith.constant 1.000000e+00 : f32
    %167 = vector.broadcast %cst_38 : f32 to vector<2x32xf32>
    %168 = arith.addf %167, %166 : vector<2x32xf32>
    %169 = arith.divf %167, %168 : vector<2x32xf32>
    %170 = vector.extract_strided_slice %157 {offsets = [0, 64], sizes = [2, 32], strides = [1, 1]} : vector<2x128xf32> to vector<2x32xf32>
    %171 = vector.extract_strided_slice %157 {offsets = [0, 96], sizes = [2, 32], strides = [1, 1]} : vector<2x128xf32> to vector<2x32xf32>
    %172 = arith.mulf %163, %171 : vector<2x32xf32>
    %173 = arith.addf %170, %172 : vector<2x32xf32>
    %174 = math.tanh %173 : vector<2x32xf32>
    %cst_39 = arith.constant 1.000000e+00 : f32
    %175 = vector.broadcast %cst_39 : f32 to vector<2x32xf32>
    %176 = arith.subf %175, %169 : vector<2x32xf32>
    %177 = arith.mulf %176, %174 : vector<2x32xf32>
    %178 = arith.mulf %169, %150 : vector<2x32xf32>
    %179 = arith.addf %177, %178 : vector<2x32xf32>
    %180 = vector.extract_strided_slice %179 {offsets = [0, 0], sizes = [1, 32], strides = [1, 1]} : vector<2x32xf32> to vector<1x32xf32>
    %181 = vector.extract_strided_slice %2 {offsets = [12, 0], sizes = [2, 32], strides = [1, 1]} : vector<14x32xf32> to vector<2x32xf32>
    %cst_40 = arith.constant dense<0.000000e+00> : vector<2x128xf32>
    %182 = tpu.matmul %181, %3, %cst_40 {dimension_numbers = #tpu.dot_dimension_numbers<[1], [0], [0], [1], [0, 0, 1, 1], [], []>} : vector<2x32xf32>, vector<32x128xf32>, vector<2x128xf32> -> vector<2x128xf32>
    %cst_41 = arith.constant dense<0.000000e+00> : vector<2x128xf32>
    %183 = tpu.matmul %179, %4, %cst_41 {dimension_numbers = #tpu.dot_dimension_numbers<[1], [0], [0], [1], [0, 0, 1, 1], [], []>} : vector<2x32xf32>, vector<32x128xf32>, vector<2x128xf32> -> vector<2x128xf32>
    %184 = arith.addf %182, %183 : vector<2x128xf32>
    %185 = vector.broadcast %5 : vector<1x128xf32> to vector<2x128xf32>
    %186 = arith.addf %184, %185 : vector<2x128xf32>
    %187 = vector.extract_strided_slice %186 {offsets = [0, 0], sizes = [2, 32], strides = [1, 1]} : vector<2x128xf32> to vector<2x32xf32>
    %188 = arith.negf %187 : vector<2x32xf32>
    %189 = math.exp %188 : vector<2x32xf32>
    %cst_42 = arith.constant 1.000000e+00 : f32
    %190 = vector.broadcast %cst_42 : f32 to vector<2x32xf32>
    %191 = arith.addf %190, %189 : vector<2x32xf32>
    %192 = arith.divf %190, %191 : vector<2x32xf32>
    %193 = vector.extract_strided_slice %186 {offsets = [0, 32], sizes = [2, 32], strides = [1, 1]} : vector<2x128xf32> to vector<2x32xf32>
    %194 = arith.negf %193 : vector<2x32xf32>
    %195 = math.exp %194 : vector<2x32xf32>
    %cst_43 = arith.constant 1.000000e+00 : f32
    %196 = vector.broadcast %cst_43 : f32 to vector<2x32xf32>
    %197 = arith.addf %196, %195 : vector<2x32xf32>
    %198 = arith.divf %196, %197 : vector<2x32xf32>
    %199 = vector.extract_strided_slice %186 {offsets = [0, 64], sizes = [2, 32], strides = [1, 1]} : vector<2x128xf32> to vector<2x32xf32>
    %200 = vector.extract_strided_slice %186 {offsets = [0, 96], sizes = [2, 32], strides = [1, 1]} : vector<2x128xf32> to vector<2x32xf32>
    %201 = arith.mulf %192, %200 : vector<2x32xf32>
    %202 = arith.addf %199, %201 : vector<2x32xf32>
    %203 = math.tanh %202 : vector<2x32xf32>
    %cst_44 = arith.constant 1.000000e+00 : f32
    %204 = vector.broadcast %cst_44 : f32 to vector<2x32xf32>
    %205 = arith.subf %204, %198 : vector<2x32xf32>
    %206 = arith.mulf %205, %203 : vector<2x32xf32>
    %207 = arith.mulf %198, %179 : vector<2x32xf32>
    %208 = arith.addf %206, %207 : vector<2x32xf32>
    %209 = vector.extract_strided_slice %208 {offsets = [0, 0], sizes = [1, 32], strides = [1, 1]} : vector<2x32xf32> to vector<1x32xf32>
    %cst_45 = arith.constant 0.000000e+00 : f32
    %210 = vector.broadcast %cst_45 : f32 to vector<3x32xf32>
    %211 = tpu.concatenate %35, %64, %93, %122, %151, %180, %209, %210 in 0 : vector<1x32xf32>, vector<1x32xf32>, vector<1x32xf32>, vector<1x32xf32>, vector<1x32xf32>, vector<1x32xf32>, vector<1x32xf32>, vector<3x32xf32> -> vector<10x32xf32>
    %c0_46 = arith.constant 0 : index
    %c0_47 = arith.constant 0 : index
    %212 = vector.load %arg8[%c0_46, %c0_47] : memref<16x32xf32, #tpu.memory_space<vmem>>, vector<16x32xf32>
    %c0_48 = arith.constant 0 : index
    %c0_49 = arith.constant 0 : index
    %213 = vector.load %arg9[%c0_48, %c0_49] : memref<32x10xf32, #tpu.memory_space<vmem>>, vector<32x10xf32>
    %c0_50 = arith.constant 0 : index
    %c0_51 = arith.constant 0 : index
    %214 = vector.load %arg10[%c0_50, %c0_51] : memref<32x10xf32, #tpu.memory_space<vmem>>, vector<32x10xf32>
    %c0_52 = arith.constant 0 : index
    %c0_53 = arith.constant 0 : index
    %215 = vector.load %arg11[%c0_52, %c0_53] : memref<1x10xf32, #tpu.memory_space<vmem>>, vector<1x10xf32>
    %c0_54 = arith.constant 0 : index
    %c0_55 = arith.constant 0 : index
    %216 = vector.load %arg12[%c0_54, %c0_55] : memref<32x32xf32, #tpu.memory_space<vmem>>, vector<32x32xf32>
    %c0_56 = arith.constant 0 : index
    %c0_57 = arith.constant 0 : index
    %217 = vector.load %arg13[%c0_56, %c0_57] : memref<32x32xf32, #tpu.memory_space<vmem>>, vector<32x32xf32>
    %c0_58 = arith.constant 0 : index
    %c0_59 = arith.constant 0 : index
    %218 = vector.load %arg14[%c0_58, %c0_59] : memref<1x32xf32, #tpu.memory_space<vmem>>, vector<1x32xf32>
    %c0_60 = arith.constant 0 : index
    %c0_61 = arith.constant 0 : index
    %219 = vector.load %arg15[%c0_60, %c0_61] : memref<32x128xf32, #tpu.memory_space<vmem>>, vector<32x128xf32>
    %c0_62 = arith.constant 0 : index
    %c0_63 = arith.constant 0 : index
    %220 = vector.load %arg16[%c0_62, %c0_63] : memref<32x128xf32, #tpu.memory_space<vmem>>, vector<32x128xf32>
    %c0_64 = arith.constant 0 : index
    %c0_65 = arith.constant 0 : index
    %221 = vector.load %arg17[%c0_64, %c0_65] : memref<1x128xf32, #tpu.memory_space<vmem>>, vector<1x128xf32>
    %c0_66 = arith.constant 0 : index
    %c0_67 = arith.constant 0 : index
    %222 = vector.load %arg18[%c0_66, %c0_67] : memref<32x128xf32, #tpu.memory_space<vmem>>, vector<32x128xf32>
    %c0_68 = arith.constant 0 : index
    %c0_69 = arith.constant 0 : index
    %223 = vector.load %arg19[%c0_68, %c0_69] : memref<1x128xf32, #tpu.memory_space<vmem>>, vector<1x128xf32>
    %c0_70 = arith.constant 0 : index
    %c0_71 = arith.constant 0 : index
    %c0_72 = arith.constant 0 : index
    %224 = vector.load %arg2[%c0_70, %c0_71, %c0_72] : memref<7x2x16xf32, #tpu.memory_space<vmem>>, vector<7x2x16xf32>
    %c0_73 = arith.constant 0 : index
    %c0_74 = arith.constant 0 : index
    %225 = vector.load %arg3[%c0_73, %c0_74] : memref<1x1xf32, #tpu.memory_space<vmem>>, vector<1x1xf32>
    %226 = tpu.iota {dimensions = array<i32: 1>} : vector<2x16xi32>
    %227 = arith.sitofp %226 : vector<2x16xi32> to vector<2x16xf32>
    %228 = tpu.iota {dimensions = array<i32: 1>} : vector<2x128xi32>
    %229 = arith.sitofp %228 : vector<2x128xi32> to vector<2x128xf32>
    %cst_75 = arith.constant 0.000000e+00 : f32
    %230 = vector.broadcast %cst_75 : f32 to vector<2x16xf32>
    %231 = arith.cmpf oeq, %227, %230 : vector<2x16xf32>
    %232 = arith.extui %231 : vector<2x16xi1> to vector<2x16xi32>
    %233 = arith.sitofp %232 : vector<2x16xi32> to vector<2x16xf32>
    %cst_76 = arith.constant 0.000000e+00 : f32
    %234 = vector.broadcast %cst_76 : f32 to vector<1x1xf32>
    %c0_i32 = arith.constant 0 : i32
    %235 = vector.broadcast %c0_i32 : i32 to vector<1x1xi32>
    %cst_77 = arith.constant dense<0.000000e+00> : vector<2x32xf32>
    %236 = tpu.matmul %233, %212, %cst_77 {dimension_numbers = #tpu.dot_dimension_numbers<[1], [0], [0], [1], [0, 0, 1, 1], [], []>} : vector<2x16xf32>, vector<16x32xf32>, vector<2x32xf32> -> vector<2x32xf32>
    %cst_78 = arith.constant dense<0.000000e+00> : vector<2x10xf32>
    %237 = tpu.matmul %236, %213, %cst_78 {dimension_numbers = #tpu.dot_dimension_numbers<[1], [0], [0], [1], [0, 0, 1, 1], [], []>} : vector<2x32xf32>, vector<32x10xf32>, vector<2x10xf32> -> vector<2x10xf32>
    %cst_79 = arith.constant dense<0.000000e+00> : vector<2x10xf32>
    %238 = tpu.matmul %208, %214, %cst_79 {dimension_numbers = #tpu.dot_dimension_numbers<[1], [0], [0], [1], [0, 0, 1, 1], [], []>} : vector<2x32xf32>, vector<32x10xf32>, vector<2x10xf32> -> vector<2x10xf32>
    %239 = arith.addf %237, %238 : vector<2x10xf32>
    %240 = vector.broadcast %215 : vector<1x10xf32> to vector<2x10xf32>
    %241 = arith.addf %239, %240 : vector<2x10xf32>
    %cst_80 = arith.constant dense<0xFF800000> : vector<2xf32>
    %242 = vector.multi_reduction <maximumf>, %241, %cst_80 [1] : vector<2x10xf32> to vector<2xf32>
    %243 = vector.shape_cast %242 : vector<2xf32> to vector<2x1xf32>
    %244 = vector.broadcast %243 : vector<2x1xf32> to vector<2x10xf32>
    %245 = arith.subf %241, %244 : vector<2x10xf32>
    %246 = math.exp %245 : vector<2x10xf32>
    %cst_81 = arith.constant dense<0.000000e+00> : vector<2xf32>
    %247 = vector.multi_reduction <add>, %246, %cst_81 [1] : vector<2x10xf32> to vector<2xf32>
    %248 = vector.shape_cast %247 : vector<2xf32> to vector<2x1xf32>
    %249 = tpu.reciprocal %248 {approx = true} : vector<2x1xf32> -> vector<2x1xf32>
    %250 = vector.broadcast %249 : vector<2x1xf32> to vector<2x10xf32>
    %251 = arith.mulf %246, %250 : vector<2x10xf32>
    %cst_82 = arith.constant dense<0.000000e+00> : vector<2x32xf32>
    %252 = tpu.matmul %251, %211, %cst_82 {dimension_numbers = #tpu.dot_dimension_numbers<[1], [0], [0], [1], [0, 0, 1, 1], [], []>} : vector<2x10xf32>, vector<10x32xf32>, vector<2x32xf32> -> vector<2x32xf32>
    %cst_83 = arith.constant dense<0.000000e+00> : vector<2x32xf32>
    %253 = tpu.matmul %236, %216, %cst_83 {dimension_numbers = #tpu.dot_dimension_numbers<[1], [0], [0], [1], [0, 0, 1, 1], [], []>} : vector<2x32xf32>, vector<32x32xf32>, vector<2x32xf32> -> vector<2x32xf32>
    %cst_84 = arith.constant dense<0.000000e+00> : vector<2x32xf32>
    %254 = tpu.matmul %252, %217, %cst_84 {dimension_numbers = #tpu.dot_dimension_numbers<[1], [0], [0], [1], [0, 0, 1, 1], [], []>} : vector<2x32xf32>, vector<32x32xf32>, vector<2x32xf32> -> vector<2x32xf32>
    %255 = arith.addf %253, %254 : vector<2x32xf32>
    %256 = vector.broadcast %218 : vector<1x32xf32> to vector<2x32xf32>
    %257 = arith.addf %255, %256 : vector<2x32xf32>
    %cst_85 = arith.constant 0.000000e+00 : f32
    %258 = vector.broadcast %cst_85 : f32 to vector<2x32xf32>
    %259 = arith.maximumf %257, %258 : vector<2x32xf32>
    %cst_86 = arith.constant dense<0.000000e+00> : vector<2x128xf32>
    %260 = tpu.matmul %259, %219, %cst_86 {dimension_numbers = #tpu.dot_dimension_numbers<[1], [0], [0], [1], [0, 0, 1, 1], [], []>} : vector<2x32xf32>, vector<32x128xf32>, vector<2x128xf32> -> vector<2x128xf32>
    %cst_87 = arith.constant dense<0.000000e+00> : vector<2x128xf32>
    %261 = tpu.matmul %208, %220, %cst_87 {dimension_numbers = #tpu.dot_dimension_numbers<[1], [0], [0], [1], [0, 0, 1, 1], [], []>} : vector<2x32xf32>, vector<32x128xf32>, vector<2x128xf32> -> vector<2x128xf32>
    %262 = arith.addf %260, %261 : vector<2x128xf32>
    %263 = vector.broadcast %221 : vector<1x128xf32> to vector<2x128xf32>
    %264 = arith.addf %262, %263 : vector<2x128xf32>
    %265 = vector.extract_strided_slice %264 {offsets = [0, 0], sizes = [2, 32], strides = [1, 1]} : vector<2x128xf32> to vector<2x32xf32>
    %266 = arith.negf %265 : vector<2x32xf32>
    %267 = math.exp %266 : vector<2x32xf32>
    %cst_88 = arith.constant 1.000000e+00 : f32
    %268 = vector.broadcast %cst_88 : f32 to vector<2x32xf32>
    %269 = arith.addf %268, %267 : vector<2x32xf32>
    %270 = arith.divf %268, %269 : vector<2x32xf32>
    %271 = vector.extract_strided_slice %264 {offsets = [0, 32], sizes = [2, 32], strides = [1, 1]} : vector<2x128xf32> to vector<2x32xf32>
    %272 = arith.negf %271 : vector<2x32xf32>
    %273 = math.exp %272 : vector<2x32xf32>
    %cst_89 = arith.constant 1.000000e+00 : f32
    %274 = vector.broadcast %cst_89 : f32 to vector<2x32xf32>
    %275 = arith.addf %274, %273 : vector<2x32xf32>
    %276 = arith.divf %274, %275 : vector<2x32xf32>
    %277 = vector.extract_strided_slice %264 {offsets = [0, 64], sizes = [2, 32], strides = [1, 1]} : vector<2x128xf32> to vector<2x32xf32>
    %278 = vector.extract_strided_slice %264 {offsets = [0, 96], sizes = [2, 32], strides = [1, 1]} : vector<2x128xf32> to vector<2x32xf32>
    %279 = arith.mulf %270, %278 : vector<2x32xf32>
    %280 = arith.addf %277, %279 : vector<2x32xf32>
    %281 = math.tanh %280 : vector<2x32xf32>
    %cst_90 = arith.constant 1.000000e+00 : f32
    %282 = vector.broadcast %cst_90 : f32 to vector<2x32xf32>
    %283 = arith.subf %282, %276 : vector<2x32xf32>
    %284 = arith.mulf %283, %281 : vector<2x32xf32>
    %285 = arith.mulf %276, %208 : vector<2x32xf32>
    %286 = arith.addf %284, %285 : vector<2x32xf32>
    %cst_91 = arith.constant dense<0.000000e+00> : vector<2x128xf32>
    %287 = tpu.matmul %286, %222, %cst_91 {dimension_numbers = #tpu.dot_dimension_numbers<[1], [0], [0], [1], [0, 0, 1, 1], [], []>} : vector<2x32xf32>, vector<32x128xf32>, vector<2x128xf32> -> vector<2x128xf32>
    %288 = vector.broadcast %223 : vector<1x128xf32> to vector<2x128xf32>
    %289 = arith.addf %287, %288 : vector<2x128xf32>
    %cst_92 = arith.constant dense<0xFF800000> : vector<2xf32>
    %290 = vector.multi_reduction <maximumf>, %289, %cst_92 [1] : vector<2x128xf32> to vector<2xf32>
    %291 = vector.shape_cast %290 : vector<2xf32> to vector<2x1xf32>
    %292 = vector.broadcast %291 : vector<2x1xf32> to vector<2x128xf32>
    %293 = arith.subf %289, %292 : vector<2x128xf32>
    %294 = math.exp %293 : vector<2x128xf32>
    %cst_93 = arith.constant dense<0.000000e+00> : vector<2xf32>
    %295 = vector.multi_reduction <add>, %294, %cst_93 [1] : vector<2x128xf32> to vector<2xf32>
    %296 = vector.shape_cast %295 : vector<2xf32> to vector<2x1xf32>
    %297 = math.log %296 : vector<2x1xf32>
    %298 = arith.addf %297, %291 : vector<2x1xf32>
    %299 = vector.broadcast %298 : vector<2x1xf32> to vector<2x128xf32>
    %300 = arith.subf %289, %299 : vector<2x128xf32>
    %c0_94 = arith.constant 0 : index
    %c0_95 = arith.constant 0 : index
    %c0_96 = arith.constant 0 : index
    %301 = vector.load %arg20[%c0_94, %c0_95, %c0_96] : memref<7x2x128xf32, #tpu.memory_space<vmem>>, vector<1x2x128xf32>
    %302 = vector.shape_cast %301 : vector<1x2x128xf32> to vector<2x128xf32>
    %303 = vector.shape_cast %300 : vector<2x128xf32> to vector<1x2x128xf32>
    tpu.vector_store %arg20[%c0_94, %c0_95, %c0_96], %303 {strides = array<i32>} : memref<7x2x128xf32, #tpu.memory_space<vmem>>, vector<1x2x128xf32>,
    %cst_97 = arith.constant dense<0xFF800000> : vector<2xf32>
    %304 = vector.multi_reduction <maximumf>, %300, %cst_97 [1] : vector<2x128xf32> to vector<2xf32>
    %305 = vector.shape_cast %304 : vector<2xf32> to vector<2x1xf32>
    %306 = vector.broadcast %305 : vector<2x1xf32> to vector<2x128xf32>
    %307 = arith.cmpf oge, %300, %306 : vector<2x128xf32>
    %cst_98 = arith.constant 1.280000e+02 : f32
    %308 = vector.broadcast %cst_98 : f32 to vector<2x128xf32>
    %309 = arith.select %307, %229, %308 : vector<2x128xi1>, vector<2x128xf32>
    %cst_99 = arith.constant dense<0x7F800000> : vector<2xf32>
    %310 = vector.multi_reduction <minimumf>, %309, %cst_99 [1] : vector<2x128xf32> to vector<2xf32>
    %311 = vector.shape_cast %310 : vector<2xf32> to vector<2x1xf32>
    %312 = vector.broadcast %311 : vector<2x1xf32> to vector<2x16xf32>
    %313 = arith.cmpf oeq, %227, %312 : vector<2x16xf32>
    %314 = arith.extui %313 : vector<2x16xi1> to vector<2x16xi32>
    %315 = arith.sitofp %314 : vector<2x16xi32> to vector<2x16xf32>
    %316 = vector.extract_strided_slice %224 {offsets = [0, 0, 0], sizes = [1, 2, 16], strides = [1, 1, 1]} : vector<7x2x16xf32> to vector<1x2x16xf32>
    %317 = vector.shape_cast %316 : vector<1x2x16xf32> to vector<2x16xf32>
    %318 = vector.broadcast %225 : vector<1x1xf32> to vector<2x16xf32>
    %319 = arith.mulf %318, %317 : vector<2x16xf32>
    %cst_100 = arith.constant 1.000000e+00 : f32
    %320 = vector.broadcast %cst_100 : f32 to vector<1x1xf32>
    %321 = arith.subf %320, %225 : vector<1x1xf32>
    %322 = vector.broadcast %321 : vector<1x1xf32> to vector<2x16xf32>
    %323 = arith.mulf %322, %315 : vector<2x16xf32>
    %324 = arith.addf %319, %323 : vector<2x16xf32>
    %325 = vector.extract_strided_slice %324 {offsets = [0, 0], sizes = [1, 1], strides = [1, 1]} : vector<2x16xf32> to vector<1x1xf32>
    %cst_101 = arith.constant 5.000000e-01 : f32
    %326 = vector.broadcast %cst_101 : f32 to vector<1x1xf32>
    %327 = arith.cmpf olt, %234, %326 : vector<1x1xf32>
    %c1_i32 = arith.constant 1 : i32
    %328 = vector.broadcast %c1_i32 : i32 to vector<1x1xi32>
    %329 = arith.select %327, %328, %235 : vector<1x1xi1>, vector<1x1xi32>
    %cst_102 = arith.constant 5.000000e-01 : f32
    %330 = vector.broadcast %cst_102 : f32 to vector<1x1xf32>
    %331 = arith.cmpf ogt, %325, %330 : vector<1x1xf32>
    %332 = arith.andi %327, %331 : vector<1x1xi1>
    %cst_103 = arith.constant 1.000000e+00 : f32
    %333 = vector.broadcast %cst_103 : f32 to vector<1x1xf32>
    %334 = arith.select %332, %333, %234 : vector<1x1xi1>, vector<1x1xf32>
    %cst_104 = arith.constant dense<0.000000e+00> : vector<2x32xf32>
    %335 = tpu.matmul %324, %212, %cst_104 {dimension_numbers = #tpu.dot_dimension_numbers<[1], [0], [0], [1], [0, 0, 1, 1], [], []>} : vector<2x16xf32>, vector<16x32xf32>, vector<2x32xf32> -> vector<2x32xf32>
    %cst_105 = arith.constant dense<0.000000e+00> : vector<2x10xf32>
    %336 = tpu.matmul %335, %213, %cst_105 {dimension_numbers = #tpu.dot_dimension_numbers<[1], [0], [0], [1], [0, 0, 1, 1], [], []>} : vector<2x32xf32>, vector<32x10xf32>, vector<2x10xf32> -> vector<2x10xf32>
    %cst_106 = arith.constant dense<0.000000e+00> : vector<2x10xf32>
    %337 = tpu.matmul %286, %214, %cst_106 {dimension_numbers = #tpu.dot_dimension_numbers<[1], [0], [0], [1], [0, 0, 1, 1], [], []>} : vector<2x32xf32>, vector<32x10xf32>, vector<2x10xf32> -> vector<2x10xf32>
    %338 = arith.addf %336, %337 : vector<2x10xf32>
    %339 = vector.broadcast %215 : vector<1x10xf32> to vector<2x10xf32>
    %340 = arith.addf %338, %339 : vector<2x10xf32>
    %cst_107 = arith.constant dense<0xFF800000> : vector<2xf32>
    %341 = vector.multi_reduction <maximumf>, %340, %cst_107 [1] : vector<2x10xf32> to vector<2xf32>
    %342 = vector.shape_cast %341 : vector<2xf32> to vector<2x1xf32>
    %343 = vector.broadcast %342 : vector<2x1xf32> to vector<2x10xf32>
    %344 = arith.subf %340, %343 : vector<2x10xf32>
    %345 = math.exp %344 : vector<2x10xf32>
    %cst_108 = arith.constant dense<0.000000e+00> : vector<2xf32>
    %346 = vector.multi_reduction <add>, %345, %cst_108 [1] : vector<2x10xf32> to vector<2xf32>
    %347 = vector.shape_cast %346 : vector<2xf32> to vector<2x1xf32>
    %348 = tpu.reciprocal %347 {approx = true} : vector<2x1xf32> -> vector<2x1xf32>
    %349 = vector.broadcast %348 : vector<2x1xf32> to vector<2x10xf32>
    %350 = arith.mulf %345, %349 : vector<2x10xf32>
    %cst_109 = arith.constant dense<0.000000e+00> : vector<2x32xf32>
    %351 = tpu.matmul %350, %211, %cst_109 {dimension_numbers = #tpu.dot_dimension_numbers<[1], [0], [0], [1], [0, 0, 1, 1], [], []>} : vector<2x10xf32>, vector<10x32xf32>, vector<2x32xf32> -> vector<2x32xf32>
    %cst_110 = arith.constant dense<0.000000e+00> : vector<2x32xf32>
    %352 = tpu.matmul %335, %216, %cst_110 {dimension_numbers = #tpu.dot_dimension_numbers<[1], [0], [0], [1], [0, 0, 1, 1], [], []>} : vector<2x32xf32>, vector<32x32xf32>, vector<2x32xf32> -> vector<2x32xf32>
    %cst_111 = arith.constant dense<0.000000e+00> : vector<2x32xf32>
    %353 = tpu.matmul %351, %217, %cst_111 {dimension_numbers = #tpu.dot_dimension_numbers<[1], [0], [0], [1], [0, 0, 1, 1], [], []>} : vector<2x32xf32>, vector<32x32xf32>, vector<2x32xf32> -> vector<2x32xf32>
    %354 = arith.addf %352, %353 : vector<2x32xf32>
    %355 = vector.broadcast %218 : vector<1x32xf32> to vector<2x32xf32>
    %356 = arith.addf %354, %355 : vector<2x32xf32>
    %cst_112 = arith.constant 0.000000e+00 : f32
    %357 = vector.broadcast %cst_112 : f32 to vector<2x32xf32>
    %358 = arith.maximumf %356, %357 : vector<2x32xf32>
    %cst_113 = arith.constant dense<0.000000e+00> : vector<2x128xf32>
    %359 = tpu.matmul %358, %219, %cst_113 {dimension_numbers = #tpu.dot_dimension_numbers<[1], [0], [0], [1], [0, 0, 1, 1], [], []>} : vector<2x32xf32>, vector<32x128xf32>, vector<2x128xf32> -> vector<2x128xf32>
    %cst_114 = arith.constant dense<0.000000e+00> : vector<2x128xf32>
    %360 = tpu.matmul %286, %220, %cst_114 {dimension_numbers = #tpu.dot_dimension_numbers<[1], [0], [0], [1], [0, 0, 1, 1], [], []>} : vector<2x32xf32>, vector<32x128xf32>, vector<2x128xf32> -> vector<2x128xf32>
    %361 = arith.addf %359, %360 : vector<2x128xf32>
    %362 = vector.broadcast %221 : vector<1x128xf32> to vector<2x128xf32>
    %363 = arith.addf %361, %362 : vector<2x128xf32>
    %364 = vector.extract_strided_slice %363 {offsets = [0, 0], sizes = [2, 32], strides = [1, 1]} : vector<2x128xf32> to vector<2x32xf32>
    %365 = arith.negf %364 : vector<2x32xf32>
    %366 = math.exp %365 : vector<2x32xf32>
    %cst_115 = arith.constant 1.000000e+00 : f32
    %367 = vector.broadcast %cst_115 : f32 to vector<2x32xf32>
    %368 = arith.addf %367, %366 : vector<2x32xf32>
    %369 = arith.divf %367, %368 : vector<2x32xf32>
    %370 = vector.extract_strided_slice %363 {offsets = [0, 32], sizes = [2, 32], strides = [1, 1]} : vector<2x128xf32> to vector<2x32xf32>
    %371 = arith.negf %370 : vector<2x32xf32>
    %372 = math.exp %371 : vector<2x32xf32>
    %cst_116 = arith.constant 1.000000e+00 : f32
    %373 = vector.broadcast %cst_116 : f32 to vector<2x32xf32>
    %374 = arith.addf %373, %372 : vector<2x32xf32>
    %375 = arith.divf %373, %374 : vector<2x32xf32>
    %376 = vector.extract_strided_slice %363 {offsets = [0, 64], sizes = [2, 32], strides = [1, 1]} : vector<2x128xf32> to vector<2x32xf32>
    %377 = vector.extract_strided_slice %363 {offsets = [0, 96], sizes = [2, 32], strides = [1, 1]} : vector<2x128xf32> to vector<2x32xf32>
    %378 = arith.mulf %369, %377 : vector<2x32xf32>
    %379 = arith.addf %376, %378 : vector<2x32xf32>
    %380 = math.tanh %379 : vector<2x32xf32>
    %cst_117 = arith.constant 1.000000e+00 : f32
    %381 = vector.broadcast %cst_117 : f32 to vector<2x32xf32>
    %382 = arith.subf %381, %375 : vector<2x32xf32>
    %383 = arith.mulf %382, %380 : vector<2x32xf32>
    %384 = arith.mulf %375, %286 : vector<2x32xf32>
    %385 = arith.addf %383, %384 : vector<2x32xf32>
    %cst_118 = arith.constant dense<0.000000e+00> : vector<2x128xf32>
    %386 = tpu.matmul %385, %222, %cst_118 {dimension_numbers = #tpu.dot_dimension_numbers<[1], [0], [0], [1], [0, 0, 1, 1], [], []>} : vector<2x32xf32>, vector<32x128xf32>, vector<2x128xf32> -> vector<2x128xf32>
    %387 = vector.broadcast %223 : vector<1x128xf32> to vector<2x128xf32>
    %388 = arith.addf %386, %387 : vector<2x128xf32>
    %cst_119 = arith.constant dense<0xFF800000> : vector<2xf32>
    %389 = vector.multi_reduction <maximumf>, %388, %cst_119 [1] : vector<2x128xf32> to vector<2xf32>
    %390 = vector.shape_cast %389 : vector<2xf32> to vector<2x1xf32>
    %391 = vector.broadcast %390 : vector<2x1xf32> to vector<2x128xf32>
    %392 = arith.subf %388, %391 : vector<2x128xf32>
    %393 = math.exp %392 : vector<2x128xf32>
    %cst_120 = arith.constant dense<0.000000e+00> : vector<2xf32>
    %394 = vector.multi_reduction <add>, %393, %cst_120 [1] : vector<2x128xf32> to vector<2xf32>
    %395 = vector.shape_cast %394 : vector<2xf32> to vector<2x1xf32>
    %396 = math.log %395 : vector<2x1xf32>
    %397 = arith.addf %396, %390 : vector<2x1xf32>
    %398 = vector.broadcast %397 : vector<2x1xf32> to vector<2x128xf32>
    %399 = arith.subf %388, %398 : vector<2x128xf32>
    %c1 = arith.constant 1 : index
    %c0_121 = arith.constant 0 : index
    %c0_122 = arith.constant 0 : index
    %400 = vector.load %arg20[%c1, %c0_121, %c0_122] : memref<7x2x128xf32, #tpu.memory_space<vmem>>, vector<1x2x128xf32>
    %401 = vector.shape_cast %400 : vector<1x2x128xf32> to vector<2x128xf32>
    %402 = vector.shape_cast %399 : vector<2x128xf32> to vector<1x2x128xf32>
    tpu.vector_store %arg20[%c1, %c0_121, %c0_122], %402 {strides = array<i32>} : memref<7x2x128xf32, #tpu.memory_space<vmem>>, vector<1x2x128xf32>,
    %cst_123 = arith.constant dense<0xFF800000> : vector<2xf32>
    %403 = vector.multi_reduction <maximumf>, %399, %cst_123 [1] : vector<2x128xf32> to vector<2xf32>
    %404 = vector.shape_cast %403 : vector<2xf32> to vector<2x1xf32>
    %405 = vector.broadcast %404 : vector<2x1xf32> to vector<2x128xf32>
    %406 = arith.cmpf oge, %399, %405 : vector<2x128xf32>
    %cst_124 = arith.constant 1.280000e+02 : f32
    %407 = vector.broadcast %cst_124 : f32 to vector<2x128xf32>
    %408 = arith.select %406, %229, %407 : vector<2x128xi1>, vector<2x128xf32>
    %cst_125 = arith.constant dense<0x7F800000> : vector<2xf32>
    %409 = vector.multi_reduction <minimumf>, %408, %cst_125 [1] : vector<2x128xf32> to vector<2xf32>
    %410 = vector.shape_cast %409 : vector<2xf32> to vector<2x1xf32>
    %411 = vector.broadcast %410 : vector<2x1xf32> to vector<2x16xf32>
    %412 = arith.cmpf oeq, %227, %411 : vector<2x16xf32>
    %413 = arith.extui %412 : vector<2x16xi1> to vector<2x16xi32>
    %414 = arith.sitofp %413 : vector<2x16xi32> to vector<2x16xf32>
    %415 = vector.extract_strided_slice %224 {offsets = [1, 0, 0], sizes = [1, 2, 16], strides = [1, 1, 1]} : vector<7x2x16xf32> to vector<1x2x16xf32>
    %416 = vector.shape_cast %415 : vector<1x2x16xf32> to vector<2x16xf32>
    %417 = vector.broadcast %225 : vector<1x1xf32> to vector<2x16xf32>
    %418 = arith.mulf %417, %416 : vector<2x16xf32>
    %cst_126 = arith.constant 1.000000e+00 : f32
    %419 = vector.broadcast %cst_126 : f32 to vector<1x1xf32>
    %420 = arith.subf %419, %225 : vector<1x1xf32>
    %421 = vector.broadcast %420 : vector<1x1xf32> to vector<2x16xf32>
    %422 = arith.mulf %421, %414 : vector<2x16xf32>
    %423 = arith.addf %418, %422 : vector<2x16xf32>
    %424 = vector.extract_strided_slice %423 {offsets = [0, 0], sizes = [1, 1], strides = [1, 1]} : vector<2x16xf32> to vector<1x1xf32>
    %cst_127 = arith.constant 5.000000e-01 : f32
    %425 = vector.broadcast %cst_127 : f32 to vector<1x1xf32>
    %426 = arith.cmpf olt, %334, %425 : vector<1x1xf32>
    %c2_i32 = arith.constant 2 : i32
    %427 = vector.broadcast %c2_i32 : i32 to vector<1x1xi32>
    %428 = arith.select %426, %427, %329 : vector<1x1xi1>, vector<1x1xi32>
    %cst_128 = arith.constant 5.000000e-01 : f32
    %429 = vector.broadcast %cst_128 : f32 to vector<1x1xf32>
    %430 = arith.cmpf ogt, %424, %429 : vector<1x1xf32>
    %431 = arith.andi %426, %430 : vector<1x1xi1>
    %cst_129 = arith.constant 1.000000e+00 : f32
    %432 = vector.broadcast %cst_129 : f32 to vector<1x1xf32>
    %433 = arith.select %431, %432, %334 : vector<1x1xi1>, vector<1x1xf32>
    %cst_130 = arith.constant dense<0.000000e+00> : vector<2x32xf32>
    %434 = tpu.matmul %423, %212, %cst_130 {dimension_numbers = #tpu.dot_dimension_numbers<[1], [0], [0], [1], [0, 0, 1, 1], [], []>} : vector<2x16xf32>, vector<16x32xf32>, vector<2x32xf32> -> vector<2x32xf32>
    %cst_131 = arith.constant dense<0.000000e+00> : vector<2x10xf32>
    %435 = tpu.matmul %434, %213, %cst_131 {dimension_numbers = #tpu.dot_dimension_numbers<[1], [0], [0], [1], [0, 0, 1, 1], [], []>} : vector<2x32xf32>, vector<32x10xf32>, vector<2x10xf32> -> vector<2x10xf32>
    %cst_132 = arith.constant dense<0.000000e+00> : vector<2x10xf32>
    %436 = tpu.matmul %385, %214, %cst_132 {dimension_numbers = #tpu.dot_dimension_numbers<[1], [0], [0], [1], [0, 0, 1, 1], [], []>} : vector<2x32xf32>, vector<32x10xf32>, vector<2x10xf32> -> vector<2x10xf32>
    %437 = arith.addf %435, %436 : vector<2x10xf32>
    %438 = vector.broadcast %215 : vector<1x10xf32> to vector<2x10xf32>
    %439 = arith.addf %437, %438 : vector<2x10xf32>
    %cst_133 = arith.constant dense<0xFF800000> : vector<2xf32>
    %440 = vector.multi_reduction <maximumf>, %439, %cst_133 [1] : vector<2x10xf32> to vector<2xf32>
    %441 = vector.shape_cast %440 : vector<2xf32> to vector<2x1xf32>
    %442 = vector.broadcast %441 : vector<2x1xf32> to vector<2x10xf32>
    %443 = arith.subf %439, %442 : vector<2x10xf32>
    %444 = math.exp %443 : vector<2x10xf32>
    %cst_134 = arith.constant dense<0.000000e+00> : vector<2xf32>
    %445 = vector.multi_reduction <add>, %444, %cst_134 [1] : vector<2x10xf32> to vector<2xf32>
    %446 = vector.shape_cast %445 : vector<2xf32> to vector<2x1xf32>
    %447 = tpu.reciprocal %446 {approx = true} : vector<2x1xf32> -> vector<2x1xf32>
    %448 = vector.broadcast %447 : vector<2x1xf32> to vector<2x10xf32>
    %449 = arith.mulf %444, %448 : vector<2x10xf32>
    %cst_135 = arith.constant dense<0.000000e+00> : vector<2x32xf32>
    %450 = tpu.matmul %449, %211, %cst_135 {dimension_numbers = #tpu.dot_dimension_numbers<[1], [0], [0], [1], [0, 0, 1, 1], [], []>} : vector<2x10xf32>, vector<10x32xf32>, vector<2x32xf32> -> vector<2x32xf32>
    %cst_136 = arith.constant dense<0.000000e+00> : vector<2x32xf32>
    %451 = tpu.matmul %434, %216, %cst_136 {dimension_numbers = #tpu.dot_dimension_numbers<[1], [0], [0], [1], [0, 0, 1, 1], [], []>} : vector<2x32xf32>, vector<32x32xf32>, vector<2x32xf32> -> vector<2x32xf32>
    %cst_137 = arith.constant dense<0.000000e+00> : vector<2x32xf32>
    %452 = tpu.matmul %450, %217, %cst_137 {dimension_numbers = #tpu.dot_dimension_numbers<[1], [0], [0], [1], [0, 0, 1, 1], [], []>} : vector<2x32xf32>, vector<32x32xf32>, vector<2x32xf32> -> vector<2x32xf32>
    %453 = arith.addf %451, %452 : vector<2x32xf32>
    %454 = vector.broadcast %218 : vector<1x32xf32> to vector<2x32xf32>
    %455 = arith.addf %453, %454 : vector<2x32xf32>
    %cst_138 = arith.constant 0.000000e+00 : f32
    %456 = vector.broadcast %cst_138 : f32 to vector<2x32xf32>
    %457 = arith.maximumf %455, %456 : vector<2x32xf32>
    %cst_139 = arith.constant dense<0.000000e+00> : vector<2x128xf32>
    %458 = tpu.matmul %457, %219, %cst_139 {dimension_numbers = #tpu.dot_dimension_numbers<[1], [0], [0], [1], [0, 0, 1, 1], [], []>} : vector<2x32xf32>, vector<32x128xf32>, vector<2x128xf32> -> vector<2x128xf32>
    %cst_140 = arith.constant dense<0.000000e+00> : vector<2x128xf32>
    %459 = tpu.matmul %385, %220, %cst_140 {dimension_numbers = #tpu.dot_dimension_numbers<[1], [0], [0], [1], [0, 0, 1, 1], [], []>} : vector<2x32xf32>, vector<32x128xf32>, vector<2x128xf32> -> vector<2x128xf32>
    %460 = arith.addf %458, %459 : vector<2x128xf32>
    %461 = vector.broadcast %221 : vector<1x128xf32> to vector<2x128xf32>
    %462 = arith.addf %460, %461 : vector<2x128xf32>
    %463 = vector.extract_strided_slice %462 {offsets = [0, 0], sizes = [2, 32], strides = [1, 1]} : vector<2x128xf32> to vector<2x32xf32>
    %464 = arith.negf %463 : vector<2x32xf32>
    %465 = math.exp %464 : vector<2x32xf32>
    %cst_141 = arith.constant 1.000000e+00 : f32
    %466 = vector.broadcast %cst_141 : f32 to vector<2x32xf32>
    %467 = arith.addf %466, %465 : vector<2x32xf32>
    %468 = arith.divf %466, %467 : vector<2x32xf32>
    %469 = vector.extract_strided_slice %462 {offsets = [0, 32], sizes = [2, 32], strides = [1, 1]} : vector<2x128xf32> to vector<2x32xf32>
    %470 = arith.negf %469 : vector<2x32xf32>
    %471 = math.exp %470 : vector<2x32xf32>
    %cst_142 = arith.constant 1.000000e+00 : f32
    %472 = vector.broadcast %cst_142 : f32 to vector<2x32xf32>
    %473 = arith.addf %472, %471 : vector<2x32xf32>
    %474 = arith.divf %472, %473 : vector<2x32xf32>
    %475 = vector.extract_strided_slice %462 {offsets = [0, 64], sizes = [2, 32], strides = [1, 1]} : vector<2x128xf32> to vector<2x32xf32>
    %476 = vector.extract_strided_slice %462 {offsets = [0, 96], sizes = [2, 32], strides = [1, 1]} : vector<2x128xf32> to vector<2x32xf32>
    %477 = arith.mulf %468, %476 : vector<2x32xf32>
    %478 = arith.addf %475, %477 : vector<2x32xf32>
    %479 = math.tanh %478 : vector<2x32xf32>
    %cst_143 = arith.constant 1.000000e+00 : f32
    %480 = vector.broadcast %cst_143 : f32 to vector<2x32xf32>
    %481 = arith.subf %480, %474 : vector<2x32xf32>
    %482 = arith.mulf %481, %479 : vector<2x32xf32>
    %483 = arith.mulf %474, %385 : vector<2x32xf32>
    %484 = arith.addf %482, %483 : vector<2x32xf32>
    %cst_144 = arith.constant dense<0.000000e+00> : vector<2x128xf32>
    %485 = tpu.matmul %484, %222, %cst_144 {dimension_numbers = #tpu.dot_dimension_numbers<[1], [0], [0], [1], [0, 0, 1, 1], [], []>} : vector<2x32xf32>, vector<32x128xf32>, vector<2x128xf32> -> vector<2x128xf32>
    %486 = vector.broadcast %223 : vector<1x128xf32> to vector<2x128xf32>
    %487 = arith.addf %485, %486 : vector<2x128xf32>
    %cst_145 = arith.constant dense<0xFF800000> : vector<2xf32>
    %488 = vector.multi_reduction <maximumf>, %487, %cst_145 [1] : vector<2x128xf32> to vector<2xf32>
    %489 = vector.shape_cast %488 : vector<2xf32> to vector<2x1xf32>
    %490 = vector.broadcast %489 : vector<2x1xf32> to vector<2x128xf32>
    %491 = arith.subf %487, %490 : vector<2x128xf32>
    %492 = math.exp %491 : vector<2x128xf32>
    %cst_146 = arith.constant dense<0.000000e+00> : vector<2xf32>
    %493 = vector.multi_reduction <add>, %492, %cst_146 [1] : vector<2x128xf32> to vector<2xf32>
    %494 = vector.shape_cast %493 : vector<2xf32> to vector<2x1xf32>
    %495 = math.log %494 : vector<2x1xf32>
    %496 = arith.addf %495, %489 : vector<2x1xf32>
    %497 = vector.broadcast %496 : vector<2x1xf32> to vector<2x128xf32>
    %498 = arith.subf %487, %497 : vector<2x128xf32>
    %c2 = arith.constant 2 : index
    %c0_147 = arith.constant 0 : index
    %c0_148 = arith.constant 0 : index
    %499 = vector.load %arg20[%c2, %c0_147, %c0_148] : memref<7x2x128xf32, #tpu.memory_space<vmem>>, vector<1x2x128xf32>
    %500 = vector.shape_cast %499 : vector<1x2x128xf32> to vector<2x128xf32>
    %501 = vector.shape_cast %498 : vector<2x128xf32> to vector<1x2x128xf32>
    tpu.vector_store %arg20[%c2, %c0_147, %c0_148], %501 {strides = array<i32>} : memref<7x2x128xf32, #tpu.memory_space<vmem>>, vector<1x2x128xf32>,
    %cst_149 = arith.constant dense<0xFF800000> : vector<2xf32>
    %502 = vector.multi_reduction <maximumf>, %498, %cst_149 [1] : vector<2x128xf32> to vector<2xf32>
    %503 = vector.shape_cast %502 : vector<2xf32> to vector<2x1xf32>
    %504 = vector.broadcast %503 : vector<2x1xf32> to vector<2x128xf32>
    %505 = arith.cmpf oge, %498, %504 : vector<2x128xf32>
    %cst_150 = arith.constant 1.280000e+02 : f32
    %506 = vector.broadcast %cst_150 : f32 to vector<2x128xf32>
    %507 = arith.select %505, %229, %506 : vector<2x128xi1>, vector<2x128xf32>
    %cst_151 = arith.constant dense<0x7F800000> : vector<2xf32>
    %508 = vector.multi_reduction <minimumf>, %507, %cst_151 [1] : vector<2x128xf32> to vector<2xf32>
    %509 = vector.shape_cast %508 : vector<2xf32> to vector<2x1xf32>
    %510 = vector.broadcast %509 : vector<2x1xf32> to vector<2x16xf32>
    %511 = arith.cmpf oeq, %227, %510 : vector<2x16xf32>
    %512 = arith.extui %511 : vector<2x16xi1> to vector<2x16xi32>
    %513 = arith.sitofp %512 : vector<2x16xi32> to vector<2x16xf32>
    %514 = vector.extract_strided_slice %224 {offsets = [2, 0, 0], sizes = [1, 2, 16], strides = [1, 1, 1]} : vector<7x2x16xf32> to vector<1x2x16xf32>
    %515 = vector.shape_cast %514 : vector<1x2x16xf32> to vector<2x16xf32>
    %516 = vector.broadcast %225 : vector<1x1xf32> to vector<2x16xf32>
    %517 = arith.mulf %516, %515 : vector<2x16xf32>
    %cst_152 = arith.constant 1.000000e+00 : f32
    %518 = vector.broadcast %cst_152 : f32 to vector<1x1xf32>
    %519 = arith.subf %518, %225 : vector<1x1xf32>
    %520 = vector.broadcast %519 : vector<1x1xf32> to vector<2x16xf32>
    %521 = arith.mulf %520, %513 : vector<2x16xf32>
    %522 = arith.addf %517, %521 : vector<2x16xf32>
    %523 = vector.extract_strided_slice %522 {offsets = [0, 0], sizes = [1, 1], strides = [1, 1]} : vector<2x16xf32> to vector<1x1xf32>
    %cst_153 = arith.constant 5.000000e-01 : f32
    %524 = vector.broadcast %cst_153 : f32 to vector<1x1xf32>
    %525 = arith.cmpf olt, %433, %524 : vector<1x1xf32>
    %c3_i32 = arith.constant 3 : i32
    %526 = vector.broadcast %c3_i32 : i32 to vector<1x1xi32>
    %527 = arith.select %525, %526, %428 : vector<1x1xi1>, vector<1x1xi32>
    %cst_154 = arith.constant 5.000000e-01 : f32
    %528 = vector.broadcast %cst_154 : f32 to vector<1x1xf32>
    %529 = arith.cmpf ogt, %523, %528 : vector<1x1xf32>
    %530 = arith.andi %525, %529 : vector<1x1xi1>
    %cst_155 = arith.constant 1.000000e+00 : f32
    %531 = vector.broadcast %cst_155 : f32 to vector<1x1xf32>
    %532 = arith.select %530, %531, %433 : vector<1x1xi1>, vector<1x1xf32>
    %cst_156 = arith.constant dense<0.000000e+00> : vector<2x32xf32>
    %533 = tpu.matmul %522, %212, %cst_156 {dimension_numbers = #tpu.dot_dimension_numbers<[1], [0], [0], [1], [0, 0, 1, 1], [], []>} : vector<2x16xf32>, vector<16x32xf32>, vector<2x32xf32> -> vector<2x32xf32>
    %cst_157 = arith.constant dense<0.000000e+00> : vector<2x10xf32>
    %534 = tpu.matmul %533, %213, %cst_157 {dimension_numbers = #tpu.dot_dimension_numbers<[1], [0], [0], [1], [0, 0, 1, 1], [], []>} : vector<2x32xf32>, vector<32x10xf32>, vector<2x10xf32> -> vector<2x10xf32>
    %cst_158 = arith.constant dense<0.000000e+00> : vector<2x10xf32>
    %535 = tpu.matmul %484, %214, %cst_158 {dimension_numbers = #tpu.dot_dimension_numbers<[1], [0], [0], [1], [0, 0, 1, 1], [], []>} : vector<2x32xf32>, vector<32x10xf32>, vector<2x10xf32> -> vector<2x10xf32>
    %536 = arith.addf %534, %535 : vector<2x10xf32>
    %537 = vector.broadcast %215 : vector<1x10xf32> to vector<2x10xf32>
    %538 = arith.addf %536, %537 : vector<2x10xf32>
    %cst_159 = arith.constant dense<0xFF800000> : vector<2xf32>
    %539 = vector.multi_reduction <maximumf>, %538, %cst_159 [1] : vector<2x10xf32> to vector<2xf32>
    %540 = vector.shape_cast %539 : vector<2xf32> to vector<2x1xf32>
    %541 = vector.broadcast %540 : vector<2x1xf32> to vector<2x10xf32>
    %542 = arith.subf %538, %541 : vector<2x10xf32>
    %543 = math.exp %542 : vector<2x10xf32>
    %cst_160 = arith.constant dense<0.000000e+00> : vector<2xf32>
    %544 = vector.multi_reduction <add>, %543, %cst_160 [1] : vector<2x10xf32> to vector<2xf32>
    %545 = vector.shape_cast %544 : vector<2xf32> to vector<2x1xf32>
    %546 = tpu.reciprocal %545 {approx = true} : vector<2x1xf32> -> vector<2x1xf32>
    %547 = vector.broadcast %546 : vector<2x1xf32> to vector<2x10xf32>
    %548 = arith.mulf %543, %547 : vector<2x10xf32>
    %cst_161 = arith.constant dense<0.000000e+00> : vector<2x32xf32>
    %549 = tpu.matmul %548, %211, %cst_161 {dimension_numbers = #tpu.dot_dimension_numbers<[1], [0], [0], [1], [0, 0, 1, 1], [], []>} : vector<2x10xf32>, vector<10x32xf32>, vector<2x32xf32> -> vector<2x32xf32>
    %cst_162 = arith.constant dense<0.000000e+00> : vector<2x32xf32>
    %550 = tpu.matmul %533, %216, %cst_162 {dimension_numbers = #tpu.dot_dimension_numbers<[1], [0], [0], [1], [0, 0, 1, 1], [], []>} : vector<2x32xf32>, vector<32x32xf32>, vector<2x32xf32> -> vector<2x32xf32>
    %cst_163 = arith.constant dense<0.000000e+00> : vector<2x32xf32>
    %551 = tpu.matmul %549, %217, %cst_163 {dimension_numbers = #tpu.dot_dimension_numbers<[1], [0], [0], [1], [0, 0, 1, 1], [], []>} : vector<2x32xf32>, vector<32x32xf32>, vector<2x32xf32> -> vector<2x32xf32>
    %552 = arith.addf %550, %551 : vector<2x32xf32>
    %553 = vector.broadcast %218 : vector<1x32xf32> to vector<2x32xf32>
    %554 = arith.addf %552, %553 : vector<2x32xf32>
    %cst_164 = arith.constant 0.000000e+00 : f32
    %555 = vector.broadcast %cst_164 : f32 to vector<2x32xf32>
    %556 = arith.maximumf %554, %555 : vector<2x32xf32>
    %cst_165 = arith.constant dense<0.000000e+00> : vector<2x128xf32>
    %557 = tpu.matmul %556, %219, %cst_165 {dimension_numbers = #tpu.dot_dimension_numbers<[1], [0], [0], [1], [0, 0, 1, 1], [], []>} : vector<2x32xf32>, vector<32x128xf32>, vector<2x128xf32> -> vector<2x128xf32>
    %cst_166 = arith.constant dense<0.000000e+00> : vector<2x128xf32>
    %558 = tpu.matmul %484, %220, %cst_166 {dimension_numbers = #tpu.dot_dimension_numbers<[1], [0], [0], [1], [0, 0, 1, 1], [], []>} : vector<2x32xf32>, vector<32x128xf32>, vector<2x128xf32> -> vector<2x128xf32>
    %559 = arith.addf %557, %558 : vector<2x128xf32>
    %560 = vector.broadcast %221 : vector<1x128xf32> to vector<2x128xf32>
    %561 = arith.addf %559, %560 : vector<2x128xf32>
    %562 = vector.extract_strided_slice %561 {offsets = [0, 0], sizes = [2, 32], strides = [1, 1]} : vector<2x128xf32> to vector<2x32xf32>
    %563 = arith.negf %562 : vector<2x32xf32>
    %564 = math.exp %563 : vector<2x32xf32>
    %cst_167 = arith.constant 1.000000e+00 : f32
    %565 = vector.broadcast %cst_167 : f32 to vector<2x32xf32>
    %566 = arith.addf %565, %564 : vector<2x32xf32>
    %567 = arith.divf %565, %566 : vector<2x32xf32>
    %568 = vector.extract_strided_slice %561 {offsets = [0, 32], sizes = [2, 32], strides = [1, 1]} : vector<2x128xf32> to vector<2x32xf32>
    %569 = arith.negf %568 : vector<2x32xf32>
    %570 = math.exp %569 : vector<2x32xf32>
    %cst_168 = arith.constant 1.000000e+00 : f32
    %571 = vector.broadcast %cst_168 : f32 to vector<2x32xf32>
    %572 = arith.addf %571, %570 : vector<2x32xf32>
    %573 = arith.divf %571, %572 : vector<2x32xf32>
    %574 = vector.extract_strided_slice %561 {offsets = [0, 64], sizes = [2, 32], strides = [1, 1]} : vector<2x128xf32> to vector<2x32xf32>
    %575 = vector.extract_strided_slice %561 {offsets = [0, 96], sizes = [2, 32], strides = [1, 1]} : vector<2x128xf32> to vector<2x32xf32>
    %576 = arith.mulf %567, %575 : vector<2x32xf32>
    %577 = arith.addf %574, %576 : vector<2x32xf32>
    %578 = math.tanh %577 : vector<2x32xf32>
    %cst_169 = arith.constant 1.000000e+00 : f32
    %579 = vector.broadcast %cst_169 : f32 to vector<2x32xf32>
    %580 = arith.subf %579, %573 : vector<2x32xf32>
    %581 = arith.mulf %580, %578 : vector<2x32xf32>
    %582 = arith.mulf %573, %484 : vector<2x32xf32>
    %583 = arith.addf %581, %582 : vector<2x32xf32>
    %cst_170 = arith.constant dense<0.000000e+00> : vector<2x128xf32>
    %584 = tpu.matmul %583, %222, %cst_170 {dimension_numbers = #tpu.dot_dimension_numbers<[1], [0], [0], [1], [0, 0, 1, 1], [], []>} : vector<2x32xf32>, vector<32x128xf32>, vector<2x128xf32> -> vector<2x128xf32>
    %585 = vector.broadcast %223 : vector<1x128xf32> to vector<2x128xf32>
    %586 = arith.addf %584, %585 : vector<2x128xf32>
    %cst_171 = arith.constant dense<0xFF800000> : vector<2xf32>
    %587 = vector.multi_reduction <maximumf>, %586, %cst_171 [1] : vector<2x128xf32> to vector<2xf32>
    %588 = vector.shape_cast %587 : vector<2xf32> to vector<2x1xf32>
    %589 = vector.broadcast %588 : vector<2x1xf32> to vector<2x128xf32>
    %590 = arith.subf %586, %589 : vector<2x128xf32>
    %591 = math.exp %590 : vector<2x128xf32>
    %cst_172 = arith.constant dense<0.000000e+00> : vector<2xf32>
    %592 = vector.multi_reduction <add>, %591, %cst_172 [1] : vector<2x128xf32> to vector<2xf32>
    %593 = vector.shape_cast %592 : vector<2xf32> to vector<2x1xf32>
    %594 = math.log %593 : vector<2x1xf32>
    %595 = arith.addf %594, %588 : vector<2x1xf32>
    %596 = vector.broadcast %595 : vector<2x1xf32> to vector<2x128xf32>
    %597 = arith.subf %586, %596 : vector<2x128xf32>
    %c3 = arith.constant 3 : index
    %c0_173 = arith.constant 0 : index
    %c0_174 = arith.constant 0 : index
    %598 = vector.load %arg20[%c3, %c0_173, %c0_174] : memref<7x2x128xf32, #tpu.memory_space<vmem>>, vector<1x2x128xf32>
    %599 = vector.shape_cast %598 : vector<1x2x128xf32> to vector<2x128xf32>
    %600 = vector.shape_cast %597 : vector<2x128xf32> to vector<1x2x128xf32>
    tpu.vector_store %arg20[%c3, %c0_173, %c0_174], %600 {strides = array<i32>} : memref<7x2x128xf32, #tpu.memory_space<vmem>>, vector<1x2x128xf32>,
    %cst_175 = arith.constant dense<0xFF800000> : vector<2xf32>
    %601 = vector.multi_reduction <maximumf>, %597, %cst_175 [1] : vector<2x128xf32> to vector<2xf32>
    %602 = vector.shape_cast %601 : vector<2xf32> to vector<2x1xf32>
    %603 = vector.broadcast %602 : vector<2x1xf32> to vector<2x128xf32>
    %604 = arith.cmpf oge, %597, %603 : vector<2x128xf32>
    %cst_176 = arith.constant 1.280000e+02 : f32
    %605 = vector.broadcast %cst_176 : f32 to vector<2x128xf32>
    %606 = arith.select %604, %229, %605 : vector<2x128xi1>, vector<2x128xf32>
    %cst_177 = arith.constant dense<0x7F800000> : vector<2xf32>
    %607 = vector.multi_reduction <minimumf>, %606, %cst_177 [1] : vector<2x128xf32> to vector<2xf32>
    %608 = vector.shape_cast %607 : vector<2xf32> to vector<2x1xf32>
    %609 = vector.broadcast %608 : vector<2x1xf32> to vector<2x16xf32>
    %610 = arith.cmpf oeq, %227, %609 : vector<2x16xf32>
    %611 = arith.extui %610 : vector<2x16xi1> to vector<2x16xi32>
    %612 = arith.sitofp %611 : vector<2x16xi32> to vector<2x16xf32>
    %613 = vector.extract_strided_slice %224 {offsets = [3, 0, 0], sizes = [1, 2, 16], strides = [1, 1, 1]} : vector<7x2x16xf32> to vector<1x2x16xf32>
    %614 = vector.shape_cast %613 : vector<1x2x16xf32> to vector<2x16xf32>
    %615 = vector.broadcast %225 : vector<1x1xf32> to vector<2x16xf32>
    %616 = arith.mulf %615, %614 : vector<2x16xf32>
    %cst_178 = arith.constant 1.000000e+00 : f32
    %617 = vector.broadcast %cst_178 : f32 to vector<1x1xf32>
    %618 = arith.subf %617, %225 : vector<1x1xf32>
    %619 = vector.broadcast %618 : vector<1x1xf32> to vector<2x16xf32>
    %620 = arith.mulf %619, %612 : vector<2x16xf32>
    %621 = arith.addf %616, %620 : vector<2x16xf32>
    %622 = vector.extract_strided_slice %621 {offsets = [0, 0], sizes = [1, 1], strides = [1, 1]} : vector<2x16xf32> to vector<1x1xf32>
    %cst_179 = arith.constant 5.000000e-01 : f32
    %623 = vector.broadcast %cst_179 : f32 to vector<1x1xf32>
    %624 = arith.cmpf olt, %532, %623 : vector<1x1xf32>
    %c4_i32 = arith.constant 4 : i32
    %625 = vector.broadcast %c4_i32 : i32 to vector<1x1xi32>
    %626 = arith.select %624, %625, %527 : vector<1x1xi1>, vector<1x1xi32>
    %cst_180 = arith.constant 5.000000e-01 : f32
    %627 = vector.broadcast %cst_180 : f32 to vector<1x1xf32>
    %628 = arith.cmpf ogt, %622, %627 : vector<1x1xf32>
    %629 = arith.andi %624, %628 : vector<1x1xi1>
    %cst_181 = arith.constant 1.000000e+00 : f32
    %630 = vector.broadcast %cst_181 : f32 to vector<1x1xf32>
    %631 = arith.select %629, %630, %532 : vector<1x1xi1>, vector<1x1xf32>
    %cst_182 = arith.constant dense<0.000000e+00> : vector<2x32xf32>
    %632 = tpu.matmul %621, %212, %cst_182 {dimension_numbers = #tpu.dot_dimension_numbers<[1], [0], [0], [1], [0, 0, 1, 1], [], []>} : vector<2x16xf32>, vector<16x32xf32>, vector<2x32xf32> -> vector<2x32xf32>
    %cst_183 = arith.constant dense<0.000000e+00> : vector<2x10xf32>
    %633 = tpu.matmul %632, %213, %cst_183 {dimension_numbers = #tpu.dot_dimension_numbers<[1], [0], [0], [1], [0, 0, 1, 1], [], []>} : vector<2x32xf32>, vector<32x10xf32>, vector<2x10xf32> -> vector<2x10xf32>
    %cst_184 = arith.constant dense<0.000000e+00> : vector<2x10xf32>
    %634 = tpu.matmul %583, %214, %cst_184 {dimension_numbers = #tpu.dot_dimension_numbers<[1], [0], [0], [1], [0, 0, 1, 1], [], []>} : vector<2x32xf32>, vector<32x10xf32>, vector<2x10xf32> -> vector<2x10xf32>
    %635 = arith.addf %633, %634 : vector<2x10xf32>
    %636 = vector.broadcast %215 : vector<1x10xf32> to vector<2x10xf32>
    %637 = arith.addf %635, %636 : vector<2x10xf32>
    %cst_185 = arith.constant dense<0xFF800000> : vector<2xf32>
    %638 = vector.multi_reduction <maximumf>, %637, %cst_185 [1] : vector<2x10xf32> to vector<2xf32>
    %639 = vector.shape_cast %638 : vector<2xf32> to vector<2x1xf32>
    %640 = vector.broadcast %639 : vector<2x1xf32> to vector<2x10xf32>
    %641 = arith.subf %637, %640 : vector<2x10xf32>
    %642 = math.exp %641 : vector<2x10xf32>
    %cst_186 = arith.constant dense<0.000000e+00> : vector<2xf32>
    %643 = vector.multi_reduction <add>, %642, %cst_186 [1] : vector<2x10xf32> to vector<2xf32>
    %644 = vector.shape_cast %643 : vector<2xf32> to vector<2x1xf32>
    %645 = tpu.reciprocal %644 {approx = true} : vector<2x1xf32> -> vector<2x1xf32>
    %646 = vector.broadcast %645 : vector<2x1xf32> to vector<2x10xf32>
    %647 = arith.mulf %642, %646 : vector<2x10xf32>
    %cst_187 = arith.constant dense<0.000000e+00> : vector<2x32xf32>
    %648 = tpu.matmul %647, %211, %cst_187 {dimension_numbers = #tpu.dot_dimension_numbers<[1], [0], [0], [1], [0, 0, 1, 1], [], []>} : vector<2x10xf32>, vector<10x32xf32>, vector<2x32xf32> -> vector<2x32xf32>
    %cst_188 = arith.constant dense<0.000000e+00> : vector<2x32xf32>
    %649 = tpu.matmul %632, %216, %cst_188 {dimension_numbers = #tpu.dot_dimension_numbers<[1], [0], [0], [1], [0, 0, 1, 1], [], []>} : vector<2x32xf32>, vector<32x32xf32>, vector<2x32xf32> -> vector<2x32xf32>
    %cst_189 = arith.constant dense<0.000000e+00> : vector<2x32xf32>
    %650 = tpu.matmul %648, %217, %cst_189 {dimension_numbers = #tpu.dot_dimension_numbers<[1], [0], [0], [1], [0, 0, 1, 1], [], []>} : vector<2x32xf32>, vector<32x32xf32>, vector<2x32xf32> -> vector<2x32xf32>
    %651 = arith.addf %649, %650 : vector<2x32xf32>
    %652 = vector.broadcast %218 : vector<1x32xf32> to vector<2x32xf32>
    %653 = arith.addf %651, %652 : vector<2x32xf32>
    %cst_190 = arith.constant 0.000000e+00 : f32
    %654 = vector.broadcast %cst_190 : f32 to vector<2x32xf32>
    %655 = arith.maximumf %653, %654 : vector<2x32xf32>
    %cst_191 = arith.constant dense<0.000000e+00> : vector<2x128xf32>
    %656 = tpu.matmul %655, %219, %cst_191 {dimension_numbers = #tpu.dot_dimension_numbers<[1], [0], [0], [1], [0, 0, 1, 1], [], []>} : vector<2x32xf32>, vector<32x128xf32>, vector<2x128xf32> -> vector<2x128xf32>
    %cst_192 = arith.constant dense<0.000000e+00> : vector<2x128xf32>
    %657 = tpu.matmul %583, %220, %cst_192 {dimension_numbers = #tpu.dot_dimension_numbers<[1], [0], [0], [1], [0, 0, 1, 1], [], []>} : vector<2x32xf32>, vector<32x128xf32>, vector<2x128xf32> -> vector<2x128xf32>
    %658 = arith.addf %656, %657 : vector<2x128xf32>
    %659 = vector.broadcast %221 : vector<1x128xf32> to vector<2x128xf32>
    %660 = arith.addf %658, %659 : vector<2x128xf32>
    %661 = vector.extract_strided_slice %660 {offsets = [0, 0], sizes = [2, 32], strides = [1, 1]} : vector<2x128xf32> to vector<2x32xf32>
    %662 = arith.negf %661 : vector<2x32xf32>
    %663 = math.exp %662 : vector<2x32xf32>
    %cst_193 = arith.constant 1.000000e+00 : f32
    %664 = vector.broadcast %cst_193 : f32 to vector<2x32xf32>
    %665 = arith.addf %664, %663 : vector<2x32xf32>
    %666 = arith.divf %664, %665 : vector<2x32xf32>
    %667 = vector.extract_strided_slice %660 {offsets = [0, 32], sizes = [2, 32], strides = [1, 1]} : vector<2x128xf32> to vector<2x32xf32>
    %668 = arith.negf %667 : vector<2x32xf32>
    %669 = math.exp %668 : vector<2x32xf32>
    %cst_194 = arith.constant 1.000000e+00 : f32
    %670 = vector.broadcast %cst_194 : f32 to vector<2x32xf32>
    %671 = arith.addf %670, %669 : vector<2x32xf32>
    %672 = arith.divf %670, %671 : vector<2x32xf32>
    %673 = vector.extract_strided_slice %660 {offsets = [0, 64], sizes = [2, 32], strides = [1, 1]} : vector<2x128xf32> to vector<2x32xf32>
    %674 = vector.extract_strided_slice %660 {offsets = [0, 96], sizes = [2, 32], strides = [1, 1]} : vector<2x128xf32> to vector<2x32xf32>
    %675 = arith.mulf %666, %674 : vector<2x32xf32>
    %676 = arith.addf %673, %675 : vector<2x32xf32>
    %677 = math.tanh %676 : vector<2x32xf32>
    %cst_195 = arith.constant 1.000000e+00 : f32
    %678 = vector.broadcast %cst_195 : f32 to vector<2x32xf32>
    %679 = arith.subf %678, %672 : vector<2x32xf32>
    %680 = arith.mulf %679, %677 : vector<2x32xf32>
    %681 = arith.mulf %672, %583 : vector<2x32xf32>
    %682 = arith.addf %680, %681 : vector<2x32xf32>
    %cst_196 = arith.constant dense<0.000000e+00> : vector<2x128xf32>
    %683 = tpu.matmul %682, %222, %cst_196 {dimension_numbers = #tpu.dot_dimension_numbers<[1], [0], [0], [1], [0, 0, 1, 1], [], []>} : vector<2x32xf32>, vector<32x128xf32>, vector<2x128xf32> -> vector<2x128xf32>
    %684 = vector.broadcast %223 : vector<1x128xf32> to vector<2x128xf32>
    %685 = arith.addf %683, %684 : vector<2x128xf32>
    %cst_197 = arith.constant dense<0xFF800000> : vector<2xf32>
    %686 = vector.multi_reduction <maximumf>, %685, %cst_197 [1] : vector<2x128xf32> to vector<2xf32>
    %687 = vector.shape_cast %686 : vector<2xf32> to vector<2x1xf32>
    %688 = vector.broadcast %687 : vector<2x1xf32> to vector<2x128xf32>
    %689 = arith.subf %685, %688 : vector<2x128xf32>
    %690 = math.exp %689 : vector<2x128xf32>
    %cst_198 = arith.constant dense<0.000000e+00> : vector<2xf32>
    %691 = vector.multi_reduction <add>, %690, %cst_198 [1] : vector<2x128xf32> to vector<2xf32>
    %692 = vector.shape_cast %691 : vector<2xf32> to vector<2x1xf32>
    %693 = math.log %692 : vector<2x1xf32>
    %694 = arith.addf %693, %687 : vector<2x1xf32>
    %695 = vector.broadcast %694 : vector<2x1xf32> to vector<2x128xf32>
    %696 = arith.subf %685, %695 : vector<2x128xf32>
    %c4 = arith.constant 4 : index
    %c0_199 = arith.constant 0 : index
    %c0_200 = arith.constant 0 : index
    %697 = vector.load %arg20[%c4, %c0_199, %c0_200] : memref<7x2x128xf32, #tpu.memory_space<vmem>>, vector<1x2x128xf32>
    %698 = vector.shape_cast %697 : vector<1x2x128xf32> to vector<2x128xf32>
    %699 = vector.shape_cast %696 : vector<2x128xf32> to vector<1x2x128xf32>
    tpu.vector_store %arg20[%c4, %c0_199, %c0_200], %699 {strides = array<i32>} : memref<7x2x128xf32, #tpu.memory_space<vmem>>, vector<1x2x128xf32>,
    %cst_201 = arith.constant dense<0xFF800000> : vector<2xf32>
    %700 = vector.multi_reduction <maximumf>, %696, %cst_201 [1] : vector<2x128xf32> to vector<2xf32>
    %701 = vector.shape_cast %700 : vector<2xf32> to vector<2x1xf32>
    %702 = vector.broadcast %701 : vector<2x1xf32> to vector<2x128xf32>
    %703 = arith.cmpf oge, %696, %702 : vector<2x128xf32>
    %cst_202 = arith.constant 1.280000e+02 : f32
    %704 = vector.broadcast %cst_202 : f32 to vector<2x128xf32>
    %705 = arith.select %703, %229, %704 : vector<2x128xi1>, vector<2x128xf32>
    %cst_203 = arith.constant dense<0x7F800000> : vector<2xf32>
    %706 = vector.multi_reduction <minimumf>, %705, %cst_203 [1] : vector<2x128xf32> to vector<2xf32>
    %707 = vector.shape_cast %706 : vector<2xf32> to vector<2x1xf32>
    %708 = vector.broadcast %707 : vector<2x1xf32> to vector<2x16xf32>
    %709 = arith.cmpf oeq, %227, %708 : vector<2x16xf32>
    %710 = arith.extui %709 : vector<2x16xi1> to vector<2x16xi32>
    %711 = arith.sitofp %710 : vector<2x16xi32> to vector<2x16xf32>
    %712 = vector.extract_strided_slice %224 {offsets = [4, 0, 0], sizes = [1, 2, 16], strides = [1, 1, 1]} : vector<7x2x16xf32> to vector<1x2x16xf32>
    %713 = vector.shape_cast %712 : vector<1x2x16xf32> to vector<2x16xf32>
    %714 = vector.broadcast %225 : vector<1x1xf32> to vector<2x16xf32>
    %715 = arith.mulf %714, %713 : vector<2x16xf32>
    %cst_204 = arith.constant 1.000000e+00 : f32
    %716 = vector.broadcast %cst_204 : f32 to vector<1x1xf32>
    %717 = arith.subf %716, %225 : vector<1x1xf32>
    %718 = vector.broadcast %717 : vector<1x1xf32> to vector<2x16xf32>
    %719 = arith.mulf %718, %711 : vector<2x16xf32>
    %720 = arith.addf %715, %719 : vector<2x16xf32>
    %721 = vector.extract_strided_slice %720 {offsets = [0, 0], sizes = [1, 1], strides = [1, 1]} : vector<2x16xf32> to vector<1x1xf32>
    %cst_205 = arith.constant 5.000000e-01 : f32
    %722 = vector.broadcast %cst_205 : f32 to vector<1x1xf32>
    %723 = arith.cmpf olt, %631, %722 : vector<1x1xf32>
    %c5_i32 = arith.constant 5 : i32
    %724 = vector.broadcast %c5_i32 : i32 to vector<1x1xi32>
    %725 = arith.select %723, %724, %626 : vector<1x1xi1>, vector<1x1xi32>
    %cst_206 = arith.constant 5.000000e-01 : f32
    %726 = vector.broadcast %cst_206 : f32 to vector<1x1xf32>
    %727 = arith.cmpf ogt, %721, %726 : vector<1x1xf32>
    %728 = arith.andi %723, %727 : vector<1x1xi1>
    %cst_207 = arith.constant 1.000000e+00 : f32
    %729 = vector.broadcast %cst_207 : f32 to vector<1x1xf32>
    %730 = arith.select %728, %729, %631 : vector<1x1xi1>, vector<1x1xf32>
    %cst_208 = arith.constant dense<0.000000e+00> : vector<2x32xf32>
    %731 = tpu.matmul %720, %212, %cst_208 {dimension_numbers = #tpu.dot_dimension_numbers<[1], [0], [0], [1], [0, 0, 1, 1], [], []>} : vector<2x16xf32>, vector<16x32xf32>, vector<2x32xf32> -> vector<2x32xf32>
    %cst_209 = arith.constant dense<0.000000e+00> : vector<2x10xf32>
    %732 = tpu.matmul %731, %213, %cst_209 {dimension_numbers = #tpu.dot_dimension_numbers<[1], [0], [0], [1], [0, 0, 1, 1], [], []>} : vector<2x32xf32>, vector<32x10xf32>, vector<2x10xf32> -> vector<2x10xf32>
    %cst_210 = arith.constant dense<0.000000e+00> : vector<2x10xf32>
    %733 = tpu.matmul %682, %214, %cst_210 {dimension_numbers = #tpu.dot_dimension_numbers<[1], [0], [0], [1], [0, 0, 1, 1], [], []>} : vector<2x32xf32>, vector<32x10xf32>, vector<2x10xf32> -> vector<2x10xf32>
    %734 = arith.addf %732, %733 : vector<2x10xf32>
    %735 = vector.broadcast %215 : vector<1x10xf32> to vector<2x10xf32>
    %736 = arith.addf %734, %735 : vector<2x10xf32>
    %cst_211 = arith.constant dense<0xFF800000> : vector<2xf32>
    %737 = vector.multi_reduction <maximumf>, %736, %cst_211 [1] : vector<2x10xf32> to vector<2xf32>
    %738 = vector.shape_cast %737 : vector<2xf32> to vector<2x1xf32>
    %739 = vector.broadcast %738 : vector<2x1xf32> to vector<2x10xf32>
    %740 = arith.subf %736, %739 : vector<2x10xf32>
    %741 = math.exp %740 : vector<2x10xf32>
    %cst_212 = arith.constant dense<0.000000e+00> : vector<2xf32>
    %742 = vector.multi_reduction <add>, %741, %cst_212 [1] : vector<2x10xf32> to vector<2xf32>
    %743 = vector.shape_cast %742 : vector<2xf32> to vector<2x1xf32>
    %744 = tpu.reciprocal %743 {approx = true} : vector<2x1xf32> -> vector<2x1xf32>
    %745 = vector.broadcast %744 : vector<2x1xf32> to vector<2x10xf32>
    %746 = arith.mulf %741, %745 : vector<2x10xf32>
    %cst_213 = arith.constant dense<0.000000e+00> : vector<2x32xf32>
    %747 = tpu.matmul %746, %211, %cst_213 {dimension_numbers = #tpu.dot_dimension_numbers<[1], [0], [0], [1], [0, 0, 1, 1], [], []>} : vector<2x10xf32>, vector<10x32xf32>, vector<2x32xf32> -> vector<2x32xf32>
    %cst_214 = arith.constant dense<0.000000e+00> : vector<2x32xf32>
    %748 = tpu.matmul %731, %216, %cst_214 {dimension_numbers = #tpu.dot_dimension_numbers<[1], [0], [0], [1], [0, 0, 1, 1], [], []>} : vector<2x32xf32>, vector<32x32xf32>, vector<2x32xf32> -> vector<2x32xf32>
    %cst_215 = arith.constant dense<0.000000e+00> : vector<2x32xf32>
    %749 = tpu.matmul %747, %217, %cst_215 {dimension_numbers = #tpu.dot_dimension_numbers<[1], [0], [0], [1], [0, 0, 1, 1], [], []>} : vector<2x32xf32>, vector<32x32xf32>, vector<2x32xf32> -> vector<2x32xf32>
    %750 = arith.addf %748, %749 : vector<2x32xf32>
    %751 = vector.broadcast %218 : vector<1x32xf32> to vector<2x32xf32>
    %752 = arith.addf %750, %751 : vector<2x32xf32>
    %cst_216 = arith.constant 0.000000e+00 : f32
    %753 = vector.broadcast %cst_216 : f32 to vector<2x32xf32>
    %754 = arith.maximumf %752, %753 : vector<2x32xf32>
    %cst_217 = arith.constant dense<0.000000e+00> : vector<2x128xf32>
    %755 = tpu.matmul %754, %219, %cst_217 {dimension_numbers = #tpu.dot_dimension_numbers<[1], [0], [0], [1], [0, 0, 1, 1], [], []>} : vector<2x32xf32>, vector<32x128xf32>, vector<2x128xf32> -> vector<2x128xf32>
    %cst_218 = arith.constant dense<0.000000e+00> : vector<2x128xf32>
    %756 = tpu.matmul %682, %220, %cst_218 {dimension_numbers = #tpu.dot_dimension_numbers<[1], [0], [0], [1], [0, 0, 1, 1], [], []>} : vector<2x32xf32>, vector<32x128xf32>, vector<2x128xf32> -> vector<2x128xf32>
    %757 = arith.addf %755, %756 : vector<2x128xf32>
    %758 = vector.broadcast %221 : vector<1x128xf32> to vector<2x128xf32>
    %759 = arith.addf %757, %758 : vector<2x128xf32>
    %760 = vector.extract_strided_slice %759 {offsets = [0, 0], sizes = [2, 32], strides = [1, 1]} : vector<2x128xf32> to vector<2x32xf32>
    %761 = arith.negf %760 : vector<2x32xf32>
    %762 = math.exp %761 : vector<2x32xf32>
    %cst_219 = arith.constant 1.000000e+00 : f32
    %763 = vector.broadcast %cst_219 : f32 to vector<2x32xf32>
    %764 = arith.addf %763, %762 : vector<2x32xf32>
    %765 = arith.divf %763, %764 : vector<2x32xf32>
    %766 = vector.extract_strided_slice %759 {offsets = [0, 32], sizes = [2, 32], strides = [1, 1]} : vector<2x128xf32> to vector<2x32xf32>
    %767 = arith.negf %766 : vector<2x32xf32>
    %768 = math.exp %767 : vector<2x32xf32>
    %cst_220 = arith.constant 1.000000e+00 : f32
    %769 = vector.broadcast %cst_220 : f32 to vector<2x32xf32>
    %770 = arith.addf %769, %768 : vector<2x32xf32>
    %771 = arith.divf %769, %770 : vector<2x32xf32>
    %772 = vector.extract_strided_slice %759 {offsets = [0, 64], sizes = [2, 32], strides = [1, 1]} : vector<2x128xf32> to vector<2x32xf32>
    %773 = vector.extract_strided_slice %759 {offsets = [0, 96], sizes = [2, 32], strides = [1, 1]} : vector<2x128xf32> to vector<2x32xf32>
    %774 = arith.mulf %765, %773 : vector<2x32xf32>
    %775 = arith.addf %772, %774 : vector<2x32xf32>
    %776 = math.tanh %775 : vector<2x32xf32>
    %cst_221 = arith.constant 1.000000e+00 : f32
    %777 = vector.broadcast %cst_221 : f32 to vector<2x32xf32>
    %778 = arith.subf %777, %771 : vector<2x32xf32>
    %779 = arith.mulf %778, %776 : vector<2x32xf32>
    %780 = arith.mulf %771, %682 : vector<2x32xf32>
    %781 = arith.addf %779, %780 : vector<2x32xf32>
    %cst_222 = arith.constant dense<0.000000e+00> : vector<2x128xf32>
    %782 = tpu.matmul %781, %222, %cst_222 {dimension_numbers = #tpu.dot_dimension_numbers<[1], [0], [0], [1], [0, 0, 1, 1], [], []>} : vector<2x32xf32>, vector<32x128xf32>, vector<2x128xf32> -> vector<2x128xf32>
    %783 = vector.broadcast %223 : vector<1x128xf32> to vector<2x128xf32>
    %784 = arith.addf %782, %783 : vector<2x128xf32>
    %cst_223 = arith.constant dense<0xFF800000> : vector<2xf32>
    %785 = vector.multi_reduction <maximumf>, %784, %cst_223 [1] : vector<2x128xf32> to vector<2xf32>
    %786 = vector.shape_cast %785 : vector<2xf32> to vector<2x1xf32>
    %787 = vector.broadcast %786 : vector<2x1xf32> to vector<2x128xf32>
    %788 = arith.subf %784, %787 : vector<2x128xf32>
    %789 = math.exp %788 : vector<2x128xf32>
    %cst_224 = arith.constant dense<0.000000e+00> : vector<2xf32>
    %790 = vector.multi_reduction <add>, %789, %cst_224 [1] : vector<2x128xf32> to vector<2xf32>
    %791 = vector.shape_cast %790 : vector<2xf32> to vector<2x1xf32>
    %792 = math.log %791 : vector<2x1xf32>
    %793 = arith.addf %792, %786 : vector<2x1xf32>
    %794 = vector.broadcast %793 : vector<2x1xf32> to vector<2x128xf32>
    %795 = arith.subf %784, %794 : vector<2x128xf32>
    %c5 = arith.constant 5 : index
    %c0_225 = arith.constant 0 : index
    %c0_226 = arith.constant 0 : index
    %796 = vector.load %arg20[%c5, %c0_225, %c0_226] : memref<7x2x128xf32, #tpu.memory_space<vmem>>, vector<1x2x128xf32>
    %797 = vector.shape_cast %796 : vector<1x2x128xf32> to vector<2x128xf32>
    %798 = vector.shape_cast %795 : vector<2x128xf32> to vector<1x2x128xf32>
    tpu.vector_store %arg20[%c5, %c0_225, %c0_226], %798 {strides = array<i32>} : memref<7x2x128xf32, #tpu.memory_space<vmem>>, vector<1x2x128xf32>,
    %cst_227 = arith.constant dense<0xFF800000> : vector<2xf32>
    %799 = vector.multi_reduction <maximumf>, %795, %cst_227 [1] : vector<2x128xf32> to vector<2xf32>
    %800 = vector.shape_cast %799 : vector<2xf32> to vector<2x1xf32>
    %801 = vector.broadcast %800 : vector<2x1xf32> to vector<2x128xf32>
    %802 = arith.cmpf oge, %795, %801 : vector<2x128xf32>
    %cst_228 = arith.constant 1.280000e+02 : f32
    %803 = vector.broadcast %cst_228 : f32 to vector<2x128xf32>
    %804 = arith.select %802, %229, %803 : vector<2x128xi1>, vector<2x128xf32>
    %cst_229 = arith.constant dense<0x7F800000> : vector<2xf32>
    %805 = vector.multi_reduction <minimumf>, %804, %cst_229 [1] : vector<2x128xf32> to vector<2xf32>
    %806 = vector.shape_cast %805 : vector<2xf32> to vector<2x1xf32>
    %807 = vector.broadcast %806 : vector<2x1xf32> to vector<2x16xf32>
    %808 = arith.cmpf oeq, %227, %807 : vector<2x16xf32>
    %809 = arith.extui %808 : vector<2x16xi1> to vector<2x16xi32>
    %810 = arith.sitofp %809 : vector<2x16xi32> to vector<2x16xf32>
    %811 = vector.extract_strided_slice %224 {offsets = [5, 0, 0], sizes = [1, 2, 16], strides = [1, 1, 1]} : vector<7x2x16xf32> to vector<1x2x16xf32>
    %812 = vector.shape_cast %811 : vector<1x2x16xf32> to vector<2x16xf32>
    %813 = vector.broadcast %225 : vector<1x1xf32> to vector<2x16xf32>
    %814 = arith.mulf %813, %812 : vector<2x16xf32>
    %cst_230 = arith.constant 1.000000e+00 : f32
    %815 = vector.broadcast %cst_230 : f32 to vector<1x1xf32>
    %816 = arith.subf %815, %225 : vector<1x1xf32>
    %817 = vector.broadcast %816 : vector<1x1xf32> to vector<2x16xf32>
    %818 = arith.mulf %817, %810 : vector<2x16xf32>
    %819 = arith.addf %814, %818 : vector<2x16xf32>
    %820 = vector.extract_strided_slice %819 {offsets = [0, 0], sizes = [1, 1], strides = [1, 1]} : vector<2x16xf32> to vector<1x1xf32>
    %cst_231 = arith.constant 5.000000e-01 : f32
    %821 = vector.broadcast %cst_231 : f32 to vector<1x1xf32>
    %822 = arith.cmpf olt, %730, %821 : vector<1x1xf32>
    %c6_i32 = arith.constant 6 : i32
    %823 = vector.broadcast %c6_i32 : i32 to vector<1x1xi32>
    %824 = arith.select %822, %823, %725 : vector<1x1xi1>, vector<1x1xi32>
    %cst_232 = arith.constant 5.000000e-01 : f32
    %825 = vector.broadcast %cst_232 : f32 to vector<1x1xf32>
    %826 = arith.cmpf ogt, %820, %825 : vector<1x1xf32>
    %827 = arith.andi %822, %826 : vector<1x1xi1>
    %cst_233 = arith.constant 1.000000e+00 : f32
    %828 = vector.broadcast %cst_233 : f32 to vector<1x1xf32>
    %829 = arith.select %827, %828, %730 : vector<1x1xi1>, vector<1x1xf32>
    %cst_234 = arith.constant dense<0.000000e+00> : vector<2x32xf32>
    %830 = tpu.matmul %819, %212, %cst_234 {dimension_numbers = #tpu.dot_dimension_numbers<[1], [0], [0], [1], [0, 0, 1, 1], [], []>} : vector<2x16xf32>, vector<16x32xf32>, vector<2x32xf32> -> vector<2x32xf32>
    %cst_235 = arith.constant dense<0.000000e+00> : vector<2x10xf32>
    %831 = tpu.matmul %830, %213, %cst_235 {dimension_numbers = #tpu.dot_dimension_numbers<[1], [0], [0], [1], [0, 0, 1, 1], [], []>} : vector<2x32xf32>, vector<32x10xf32>, vector<2x10xf32> -> vector<2x10xf32>
    %cst_236 = arith.constant dense<0.000000e+00> : vector<2x10xf32>
    %832 = tpu.matmul %781, %214, %cst_236 {dimension_numbers = #tpu.dot_dimension_numbers<[1], [0], [0], [1], [0, 0, 1, 1], [], []>} : vector<2x32xf32>, vector<32x10xf32>, vector<2x10xf32> -> vector<2x10xf32>
    %833 = arith.addf %831, %832 : vector<2x10xf32>
    %834 = vector.broadcast %215 : vector<1x10xf32> to vector<2x10xf32>
    %835 = arith.addf %833, %834 : vector<2x10xf32>
    %cst_237 = arith.constant dense<0xFF800000> : vector<2xf32>
    %836 = vector.multi_reduction <maximumf>, %835, %cst_237 [1] : vector<2x10xf32> to vector<2xf32>
    %837 = vector.shape_cast %836 : vector<2xf32> to vector<2x1xf32>
    %838 = vector.broadcast %837 : vector<2x1xf32> to vector<2x10xf32>
    %839 = arith.subf %835, %838 : vector<2x10xf32>
    %840 = math.exp %839 : vector<2x10xf32>
    %cst_238 = arith.constant dense<0.000000e+00> : vector<2xf32>
    %841 = vector.multi_reduction <add>, %840, %cst_238 [1] : vector<2x10xf32> to vector<2xf32>
    %842 = vector.shape_cast %841 : vector<2xf32> to vector<2x1xf32>
    %843 = tpu.reciprocal %842 {approx = true} : vector<2x1xf32> -> vector<2x1xf32>
    %844 = vector.broadcast %843 : vector<2x1xf32> to vector<2x10xf32>
    %845 = arith.mulf %840, %844 : vector<2x10xf32>
    %cst_239 = arith.constant dense<0.000000e+00> : vector<2x32xf32>
    %846 = tpu.matmul %845, %211, %cst_239 {dimension_numbers = #tpu.dot_dimension_numbers<[1], [0], [0], [1], [0, 0, 1, 1], [], []>} : vector<2x10xf32>, vector<10x32xf32>, vector<2x32xf32> -> vector<2x32xf32>
    %cst_240 = arith.constant dense<0.000000e+00> : vector<2x32xf32>
    %847 = tpu.matmul %830, %216, %cst_240 {dimension_numbers = #tpu.dot_dimension_numbers<[1], [0], [0], [1], [0, 0, 1, 1], [], []>} : vector<2x32xf32>, vector<32x32xf32>, vector<2x32xf32> -> vector<2x32xf32>
    %cst_241 = arith.constant dense<0.000000e+00> : vector<2x32xf32>
    %848 = tpu.matmul %846, %217, %cst_241 {dimension_numbers = #tpu.dot_dimension_numbers<[1], [0], [0], [1], [0, 0, 1, 1], [], []>} : vector<2x32xf32>, vector<32x32xf32>, vector<2x32xf32> -> vector<2x32xf32>
    %849 = arith.addf %847, %848 : vector<2x32xf32>
    %850 = vector.broadcast %218 : vector<1x32xf32> to vector<2x32xf32>
    %851 = arith.addf %849, %850 : vector<2x32xf32>
    %cst_242 = arith.constant 0.000000e+00 : f32
    %852 = vector.broadcast %cst_242 : f32 to vector<2x32xf32>
    %853 = arith.maximumf %851, %852 : vector<2x32xf32>
    %cst_243 = arith.constant dense<0.000000e+00> : vector<2x128xf32>
    %854 = tpu.matmul %853, %219, %cst_243 {dimension_numbers = #tpu.dot_dimension_numbers<[1], [0], [0], [1], [0, 0, 1, 1], [], []>} : vector<2x32xf32>, vector<32x128xf32>, vector<2x128xf32> -> vector<2x128xf32>
    %cst_244 = arith.constant dense<0.000000e+00> : vector<2x128xf32>
    %855 = tpu.matmul %781, %220, %cst_244 {dimension_numbers = #tpu.dot_dimension_numbers<[1], [0], [0], [1], [0, 0, 1, 1], [], []>} : vector<2x32xf32>, vector<32x128xf32>, vector<2x128xf32> -> vector<2x128xf32>
    %856 = arith.addf %854, %855 : vector<2x128xf32>
    %857 = vector.broadcast %221 : vector<1x128xf32> to vector<2x128xf32>
    %858 = arith.addf %856, %857 : vector<2x128xf32>
    %859 = vector.extract_strided_slice %858 {offsets = [0, 0], sizes = [2, 32], strides = [1, 1]} : vector<2x128xf32> to vector<2x32xf32>
    %860 = arith.negf %859 : vector<2x32xf32>
    %861 = math.exp %860 : vector<2x32xf32>
    %cst_245 = arith.constant 1.000000e+00 : f32
    %862 = vector.broadcast %cst_245 : f32 to vector<2x32xf32>
    %863 = arith.addf %862, %861 : vector<2x32xf32>
    %864 = arith.divf %862, %863 : vector<2x32xf32>
    %865 = vector.extract_strided_slice %858 {offsets = [0, 32], sizes = [2, 32], strides = [1, 1]} : vector<2x128xf32> to vector<2x32xf32>
    %866 = arith.negf %865 : vector<2x32xf32>
    %867 = math.exp %866 : vector<2x32xf32>
    %cst_246 = arith.constant 1.000000e+00 : f32
    %868 = vector.broadcast %cst_246 : f32 to vector<2x32xf32>
    %869 = arith.addf %868, %867 : vector<2x32xf32>
    %870 = arith.divf %868, %869 : vector<2x32xf32>
    %871 = vector.extract_strided_slice %858 {offsets = [0, 64], sizes = [2, 32], strides = [1, 1]} : vector<2x128xf32> to vector<2x32xf32>
    %872 = vector.extract_strided_slice %858 {offsets = [0, 96], sizes = [2, 32], strides = [1, 1]} : vector<2x128xf32> to vector<2x32xf32>
    %873 = arith.mulf %864, %872 : vector<2x32xf32>
    %874 = arith.addf %871, %873 : vector<2x32xf32>
    %875 = math.tanh %874 : vector<2x32xf32>
    %cst_247 = arith.constant 1.000000e+00 : f32
    %876 = vector.broadcast %cst_247 : f32 to vector<2x32xf32>
    %877 = arith.subf %876, %870 : vector<2x32xf32>
    %878 = arith.mulf %877, %875 : vector<2x32xf32>
    %879 = arith.mulf %870, %781 : vector<2x32xf32>
    %880 = arith.addf %878, %879 : vector<2x32xf32>
    %cst_248 = arith.constant dense<0.000000e+00> : vector<2x128xf32>
    %881 = tpu.matmul %880, %222, %cst_248 {dimension_numbers = #tpu.dot_dimension_numbers<[1], [0], [0], [1], [0, 0, 1, 1], [], []>} : vector<2x32xf32>, vector<32x128xf32>, vector<2x128xf32> -> vector<2x128xf32>
    %882 = vector.broadcast %223 : vector<1x128xf32> to vector<2x128xf32>
    %883 = arith.addf %881, %882 : vector<2x128xf32>
    %cst_249 = arith.constant dense<0xFF800000> : vector<2xf32>
    %884 = vector.multi_reduction <maximumf>, %883, %cst_249 [1] : vector<2x128xf32> to vector<2xf32>
    %885 = vector.shape_cast %884 : vector<2xf32> to vector<2x1xf32>
    %886 = vector.broadcast %885 : vector<2x1xf32> to vector<2x128xf32>
    %887 = arith.subf %883, %886 : vector<2x128xf32>
    %888 = math.exp %887 : vector<2x128xf32>
    %cst_250 = arith.constant dense<0.000000e+00> : vector<2xf32>
    %889 = vector.multi_reduction <add>, %888, %cst_250 [1] : vector<2x128xf32> to vector<2xf32>
    %890 = vector.shape_cast %889 : vector<2xf32> to vector<2x1xf32>
    %891 = math.log %890 : vector<2x1xf32>
    %892 = arith.addf %891, %885 : vector<2x1xf32>
    %893 = vector.broadcast %892 : vector<2x1xf32> to vector<2x128xf32>
    %894 = arith.subf %883, %893 : vector<2x128xf32>
    %c6 = arith.constant 6 : index
    %c0_251 = arith.constant 0 : index
    %c0_252 = arith.constant 0 : index
    %895 = vector.load %arg20[%c6, %c0_251, %c0_252] : memref<7x2x128xf32, #tpu.memory_space<vmem>>, vector<1x2x128xf32>
    %896 = vector.shape_cast %895 : vector<1x2x128xf32> to vector<2x128xf32>
    %897 = vector.shape_cast %894 : vector<2x128xf32> to vector<1x2x128xf32>
    tpu.vector_store %arg20[%c6, %c0_251, %c0_252], %897 {strides = array<i32>} : memref<7x2x128xf32, #tpu.memory_space<vmem>>, vector<1x2x128xf32>,
    %cst_253 = arith.constant 5.000000e-01 : f32
    %898 = vector.broadcast %cst_253 : f32 to vector<1x1xf32>
    %899 = arith.cmpf olt, %829, %898 : vector<1x1xf32>
    %c7_i32 = arith.constant 7 : i32
    %900 = vector.broadcast %c7_i32 : i32 to vector<1x1xi32>
    %901 = arith.select %899, %900, %824 : vector<1x1xi1>, vector<1x1xi32>
    %c0_254 = arith.constant 0 : index
    %c0_255 = arith.constant 0 : index
    %902 = vector.load %arg21[%c0_254, %c0_255] : memref<1x1xi32, #tpu.memory_space<vmem>>, vector<1x1xi32>
    tpu.vector_store %arg21[%c0_254, %c0_255], %901 {strides = array<i32>} : memref<1x1xi32, #tpu.memory_space<vmem>>, vector<1x1xi32>,
    return
  }
  func.func @transform_0(%arg0: i32) -> (i32, i32) {
    %c0_i32 = arith.constant 0 : i32
    %c0_i32_0 = arith.constant 0 : i32
    %c0_i32_1 = arith.constant 0 : i32
    return %c0_i32, %c0_i32_0 : i32, i32
  }
  func.func @transform_1(%arg0: i32) -> (i32, i32, i32) {
    %c0_i32 = arith.constant 0 : i32
    %c0_i32_0 = arith.constant 0 : i32
    %c0_i32_1 = arith.constant 0 : i32
    %c0_i32_2 = arith.constant 0 : i32
    return %c0_i32, %c0_i32_0, %c0_i32_1 : i32, i32, i32
  }
  func.func @transform_2(%arg0: i32) -> (i32, i32) {
    %c0_i32 = arith.constant 0 : i32
    %c0_i32_0 = arith.constant 0 : i32
    %c0_i32_1 = arith.constant 0 : i32
    return %c0_i32, %c0_i32_0 : i32, i32
  }
  func.func @transform_3(%arg0: i32) -> (i32, i32) {
    %c0_i32 = arith.constant 0 : i32
    %c0_i32_0 = arith.constant 0 : i32
    %c0_i32_1 = arith.constant 0 : i32
    return %c0_i32, %c0_i32_0 : i32, i32
  }
  func.func @transform_4(%arg0: i32) -> (i32, i32) {
    %c0_i32 = arith.constant 0 : i32
    %c0_i32_0 = arith.constant 0 : i32
    %c0_i32_1 = arith.constant 0 : i32
    return %c0_i32, %c0_i32_0 : i32, i32
  }
  func.func @transform_5(%arg0: i32) -> (i32, i32) {
    %c0_i32 = arith.constant 0 : i32
    %c0_i32_0 = arith.constant 0 : i32
    %c0_i32_1 = arith.constant 0 : i32
    return %c0_i32, %c0_i32_0 : i32, i32
  }
  func.func @transform_6(%arg0: i32) -> (i32, i32) {
    %c0_i32 = arith.constant 0 : i32
    %c0_i32_0 = arith.constant 0 : i32
    %c0_i32_1 = arith.constant 0 : i32
    return %c0_i32, %c0_i32_0 : i32, i32
  }
  func.func @transform_7(%arg0: i32) -> (i32, i32) {
    %c0_i32 = arith.constant 0 : i32
    %c0_i32_0 = arith.constant 0 : i32
    %c0_i32_1 = arith.constant 0 : i32
    return %c0_i32, %c0_i32_0 : i32, i32
  }
  func.func @transform_8(%arg0: i32) -> (i32, i32) {
    %c0_i32 = arith.constant 0 : i32
    %c0_i32_0 = arith.constant 0 : i32
    %c0_i32_1 = arith.constant 0 : i32
    return %c0_i32, %c0_i32_0 : i32, i32
  }
  func.func @transform_9(%arg0: i32) -> (i32, i32) {
    %c0_i32 = arith.constant 0 : i32
    %c0_i32_0 = arith.constant 0 : i32
    %c0_i32_1 = arith.constant 0 : i32
    return %c0_i32, %c0_i32_0 : i32, i32
  }
  func.func @transform_10(%arg0: i32) -> (i32, i32) {
    %c0_i32 = arith.constant 0 : i32
    %c0_i32_0 = arith.constant 0 : i32
    %c0_i32_1 = arith.constant 0 : i32
    return %c0_i32, %c0_i32_0 : i32, i32
  }
  func.func @transform_11(%arg0: i32) -> (i32, i32) {
    %c0_i32 = arith.constant 0 : i32
    %c0_i32_0 = arith.constant 0 : i32
    %c0_i32_1 = arith.constant 0 : i32
    return %c0_i32, %c0_i32_0 : i32, i32
  }
  func.func @transform_12(%arg0: i32) -> (i32, i32) {
    %c0_i32 = arith.constant 0 : i32
    %c0_i32_0 = arith.constant 0 : i32
    %c0_i32_1 = arith.constant 0 : i32
    return %c0_i32, %c0_i32_0 : i32, i32
  }
  func.func @transform_13(%arg0: i32) -> (i32, i32) {
    %c0_i32 = arith.constant 0 : i32
    %c0_i32_0 = arith.constant 0 : i32
    %c0_i32_1 = arith.constant 0 : i32
    return %c0_i32, %c0_i32_0 : i32, i32
  }
  func.func @transform_14(%arg0: i32) -> (i32, i32) {
    %c0_i32 = arith.constant 0 : i32
    %c0_i32_0 = arith.constant 0 : i32
    %c0_i32_1 = arith.constant 0 : i32
    return %c0_i32, %c0_i32_0 : i32, i32
  }
  func.func @transform_15(%arg0: i32) -> (i32, i32) {
    %c0_i32 = arith.constant 0 : i32
    %c0_i32_0 = arith.constant 0 : i32
    %c0_i32_1 = arith.constant 0 : i32
    return %c0_i32, %c0_i32_0 : i32, i32
  }
  func.func @transform_16(%arg0: i32) -> (i32, i32) {
    %c0_i32 = arith.constant 0 : i32
    %c0_i32_0 = arith.constant 0 : i32
    %c0_i32_1 = arith.constant 0 : i32
    return %c0_i32, %c0_i32_0 : i32, i32
  }
  func.func @transform_17(%arg0: i32) -> (i32, i32) {
    %c0_i32 = arith.constant 0 : i32
    %c0_i32_0 = arith.constant 0 : i32
    %c0_i32_1 = arith.constant 0 : i32
    return %c0_i32, %c0_i32_0 : i32, i32
  }
  func.func @transform_18(%arg0: i32) -> (i32, i32) {
    %c0_i32 = arith.constant 0 : i32
    %c0_i32_0 = arith.constant 0 : i32
    %c0_i32_1 = arith.constant 0 : i32
    return %c0_i32, %c0_i32_0 : i32, i32
  }
  func.func @transform_19(%arg0: i32) -> (i32, i32, i32) {
    %c0_i32 = arith.constant 0 : i32
    %c0_i32_0 = arith.constant 0 : i32
    %c0_i32_1 = arith.constant 0 : i32
    %c0_i32_2 = arith.constant 0 : i32
    return %c0_i32, %c0_i32_0, %c0_i32_1 : i32, i32, i32
  }
  func.func @transform_20(%arg0: i32) -> (i32, i32) {
    %c0_i32 = arith.constant 0 : i32
    %c0_i32_0 = arith.constant 0 : i32
    %c0_i32_1 = arith.constant 0 : i32
    return %c0_i32, %c0_i32_0 : i32, i32
  }
}

</mosaic_0001>

<bundles_post_ra>
// kernel: eq.1
= control target key start
LH: loop header
LB: loop body
LE: loop exit
PB: predicated region body
PF: predicated region fallthrough
CT: control target
= control target key end

     0   :  { %s59_s10 = smov 12   ;;  %s60_s11 = smov 8   ;;  %vm3_vm0 = vcmask 15360   ;;  %vm9_vm1 = vcmask 113760   ;;  %vm15_vm2 = vcmask 97360   ;;  %vm21_vm3 = vcmask 80960   ;;  %s99_s0 = inlined_call_operand.vmem [shape: s32[7,2], index: 0, kind: input, shape index: {}]   ;;  %s100_s1 = inlined_call_operand.vmem [shape: s32[14], index: 1, kind: output, shape index: {}]  }
   0x1   :  { %v47_v0 = vld [vmem:[%s99_s0 + $0x6] sm:$0x1]   ;;  %v49_v1 = vld [vmem:[%s99_s0 + $0x4] sm:$0x1]   ;;  %v51_v2 = vld [vmem:[%s99_s0 + $0x2] sm:$0x1]  }
   0x2   :  { %7 = vrot.lane.b32.xlu0 %v47_v0, %s59_s10  ;;  %19 = vrot.lane.b32.xlu1 %v49_v1, %s60_s11  ;;  %s61_s14 = smov 4   ;;  %v48_v3 = vld [vmem:[%s99_s0 + $0x5] sm:$0x1]   ;;  %v50_v4 = vld [vmem:[%s99_s0 + $0x3] sm:$0x1]   ;;  %s62_s21 = smov 10  }
   0x3   :  { %31 = vrot.lane.b32.xlu2 %v51_v2, %s61_s14  ;;  %v52_v5 = vld [vmem:[%s99_s0 + $0x1] sm:$0x1]   ;;  %s63_s22 = smov 6   ;;  %s64_s23 = smov 2   ;;  %v2_v6 = vld [vmem:[%s99_s0] sm:$0x1]  }
   0x4   :  { %4 = vst.msk [vmem:[#allocation0] sm:$0x1] %vm3_vm0, %v2_v6   ;;  %vm27_vm4 = vcmask 64560   ;;  %vm33_vm5 = vcmask 48160   ;;  %vm39_vm6 = vcmask 31760  }
   0xa   :  { %13 = vrot.lane.b32.xlu0 %v48_v3, %s62_s21  ;;  %25 = vrot.lane.b32.xlu1 %v50_v4, %s63_s22 }
   0xb   :  { %37 = vrot.lane.b32.xlu2 %v52_v5, %s64_s23 }
  0x5d   :  { %v32_v7 = vpop.permute.xlu2 %31  }
  0x65   :  { %v38_v8 = vpop.permute.xlu2 %37  }
  0x74   :  { %v8_v9 = vpop.permute.xlu0 %7   ;;  %v20_v10 = vpop.permute.xlu1 %19  }
  0x75   :  { %10 = vst.msk [vmem:[#allocation0] sm:$0x1] %vm9_vm1, %v8_v9  }
  0x7c   :  { %v14_v11 = vpop.permute.xlu0 %13   ;;  %v26_v12 = vpop.permute.xlu1 %25  }
  0x7d   :  { %16 = vst.msk [vmem:[#allocation0] sm:$0x1] %vm15_vm2, %v14_v11  }
  0x7e   :  { %22 = vst.msk [vmem:[#allocation0] sm:$0x1] %vm21_vm3, %v20_v10  }
  0x7f   :  { %28 = vst.msk [vmem:[#allocation0] sm:$0x1] %vm27_vm4, %v26_v12  }
  0x80   :  { %34 = vst.msk [vmem:[#allocation0] sm:$0x1] %vm33_vm5, %v32_v7  }
  0x81   :  { %40 = vst.msk [vmem:[#allocation0] sm:$0x1] %vm39_vm6, %v38_v8  }
  0x88   :  { %v43_v13 = vld [vmem:[#allocation0] sm:$0x1] }
  0x89   :  { %46 = vst [vmem:[%s100_s1] sm:$0x1] %v43_v13 }

// kernel: _forward_core.1
= control target key start
LH: loop header
LB: loop body
LE: loop exit
PB: predicated region body
PF: predicated region fallthrough
CT: control target
= control target key end

     0   :  { %s4546_s0 = inlined_call_operand.vmem [shape: f32[14,16], index: 0, kind: input, shape index: {}]   ;;  %s4547_s1 = inlined_call_operand.vmem [shape: f32[7,2,16], index: 1, kind: input, shape index: {}]   ;;  %s4548_s2 = inlined_call_operand.<no memory space> [shape: f32[1,1], index: 2, kind: input, shape index: {}]   ;;  %s4549_s3 = inlined_call_operand.vmem [shape: f32[16,32], index: 3, kind: input, shape index: {}]   ;;  %s4550_s4 = inlined_call_operand.vmem [shape: f32[32,128], index: 4, kind: input, shape index: {}]   ;;  %s4551_s5 = inlined_call_operand.vmem [shape: f32[32,128], index: 5, kind: input, shape index: {}]   ;;  %s4552_s6 = inlined_call_operand.vmem [shape: f32[1,128], index: 6, kind: input, shape index: {}]   ;;  %s4553_s7 = inlined_call_operand.hbm [shape: f32[16,32], index: 7, kind: input, shape index: {}]   ;;  %s4554_s8 = inlined_call_operand.vmem [shape: f32[32,10], index: 8, kind: input, shape index: {}]   ;;  %s4555_s9 = inlined_call_operand.vmem [shape: f32[32,10], index: 9, kind: input, shape index: {}]   ;;  %s4556_s10 = inlined_call_operand.vmem [shape: f32[1,10], index: 10, kind: input, shape index: {}]   ;;  %s4557_s11 = inlined_call_operand.vmem [shape: f32[32,32], index: 11, kind: input, shape index: {}]   ;;  %s4558_s12 = inlined_call_operand.vmem [shape: f32[32,32], index: 12, kind: input, shape index: {}]   ;;  %s4559_s13 = inlined_call_operand.vmem [shape: f32[1,32], index: 13, kind: input, shape index: {}]   ;;  %s4560_s14 = inlined_call_operand.hbm [shape: f32[32,128], index: 14, kind: input, shape index: {}]   ;;  %s4561_s15 = inlined_call_operand.hbm [shape: f32[32,128], index: 15, kind: input, shape index: {}]   ;;  %s4562_s16 = inlined_call_operand.vmem [shape: f32[1,128], index: 16, kind: input, shape index: {}]   ;;  %s4563_s17 = inlined_call_operand.hbm [shape: f32[32,128], index: 17, kind: input, shape index: {}]   ;;  %s4564_s18 = inlined_call_operand.vmem [shape: f32[1,128], index: 18, kind: input, shape index: {}]   ;;  %s4565_s19 = inlined_call_operand.hbm [shape: f32[7,2,128], index: 19, kind: output, shape index: {0}]   ;;  %s4566_s20 = inlined_call_operand.hbm [shape: s32[1,1], index: 20, kind: output, shape index: {1}]  }
   0x1   :  { %4571 = sst [smem:[#allocation19_spill]] %s4546_s0 }
   0x2   :  { %4572 = sst [smem:[#allocation20_spill]] %s4547_s1 }
   0x3   :  { %4573 = sst [smem:[#allocation21_spill]] %s4548_s2 }
   0x4   :  { %4574 = sst [smem:[#allocation22_spill]] %s4549_s3 }
   0x5   :  { %4575 = sst [smem:[#allocation23_spill]] %s4550_s4 }
   0x6   :  { %s4576_s23 = sld [smem:[#allocation21_spill]] }
   0xc   :  { %v26_v0 = vstv %s4576_s23 }
   0xd   :  { %27 = vst [vmem:[#allocation2] sm:$0x1] %v26_v0 }
   0xe   :  { %28 = vsyncpa [#allocation4], 0 }
   0xf   :  { %29 = vsyncpa [#allocation7], 0 }
  0x10   :  { %30 = vsyncpa [#allocation10], 0 }
  0x11   :  { %31 = vsyncpa [#allocation5], 0 }
  0x12   :  { %32 = vsyncpa [#allocation13], 0  ;;  %s76_s25 = sshll.u32 %s4560_s14, 4  ;;  %s3391_s3 = smov [#allocation6]   ;;  %s77_s25 = int_to_ptr.hbm [resolvable:$true] %s76_s25 }
  0x13   :  { %s78_s26 = sshll.u32 %s3391_s3, 4  ;;  %s51_s4 = sshll.u32 %s4553_s7, 4  ;;  %s79_s26 = int_to_ptr.vmem [resolvable:$true] %s78_s26  ;;  %s52_s4 = int_to_ptr.hbm [resolvable:$true] %s51_s4 }
  0x14   :  { %s3392_s29 = smov 128   ;;  %s3393_s30 = smov 8  }
  0x15   :  { %84 = dma.hbm_to_vmem [thread:$0]  %s77_s25, 512, %s79_s26, [#allocation7], %s3392_s29, %s3392_s29, %s3393_s30  }
  0x16   :  { %s3394_s0 = smov [#allocation3]   ;;  %s89_s23 = sshll.u32 %s4561_s15, 4  ;;  %s90_s23 = int_to_ptr.hbm [resolvable:$true] %s89_s23 }
  0x17   :  { %s53_s21 = sshll.u32 %s3394_s0, 4  ;;  %s104_s2 = sshll.u32 %s4563_s17, 4  ;;  %s54_s21 = int_to_ptr.vmem [resolvable:$true] %s53_s21  ;;  %s105_s2 = int_to_ptr.hbm [resolvable:$true] %s104_s2 }
  0x18   :  { %59 = dma.hbm_to_vmem [thread:$0]  %s52_s4, 256, %s54_s21, [#allocation4], %s3392_s29, %s3392_s29, %s3393_s30  }
  0x19   :  { %s3395_s3 = smov [#allocation8]   ;;  %s3396_s7 = smov [#allocation9]  }
  0x1a   :  { %s91_s27 = sshll.u32 %s3395_s3, 4  ;;  %s106_s25 = sshll.u32 %s3396_s7, 4  ;;  %s92_s27 = int_to_ptr.vmem [resolvable:$true] %s91_s27  ;;  %s107_s25 = int_to_ptr.vmem [resolvable:$true] %s106_s25 }
  0x1b   :  { %97 = dma.hbm_to_vmem [thread:$0]  %s90_s23, 512, %s92_s27, [#allocation7], %s3392_s29, %s3392_s29, %s3393_s30  }
  0x1c   :  { %112 = dma.hbm_to_vmem [thread:$0]  %s105_s2, 512, %s107_s25, [#allocation10], %s3392_s29, %s3392_s29, %s3393_s30  }
  0x1d   :  { %3381 = dma.done.wait [#allocation4], 256  }
  0x1e   :  { %3382 = vsyncadd [#allocation4], 4294967040 }
  0x1f   :  { %3383 = dma.done.wait [#allocation7], 1024  }
  0x20   :  { %3384 = vsyncadd [#allocation7], 4294966272 }
  0x21   :  { %3385 = dma.done.wait [#allocation10], 512  }
  0x22   :  { %3386 = vsyncadd [#allocation10], 4294966784  ;;  %s4577_s28 = sld [smem:[#allocation22_spill]]  ;;  %vm135_vm0 = vcmask 130048   ;;  %v3538_v4 = vld [vmem:[%s4551_s5 + $0x18] sm:$0xff]  ;;  %v3543_v5 = vld [vmem:[%s4551_s5 + $0x10] sm:$0xff] }
  0x23   :  { %s4578_s1 = sld [smem:[#allocation19_spill]]  ;;  %190 = vmatpush.msra.mxu1 %v3538_v4  ;;  %v3549_v6 = vld [vmem:[%s4551_s5 + $0x8] sm:$0xff]  ;;  %280 = vmatpush.msra.mxu3 %v3538_v4  ;;  %v3573_v10 = vld [vmem:[%s4551_s5] sm:$0xff]  ;;  %v3397_v11 = vmov 0.0   ;;  %vm174_vm1 = vcmask 261120   ;;  %s3398_s29 = smov 32  }
  0x24   :  { %s4579_s27 = sld [smem:[#allocation23_spill]]  ;;  %v3632_v16 = vld [vmem:[%s4552_s6] ss:$0 sm:$0xff]  ;;  %s3399_s6 = smov 64  }
  0x25   :  { %191 = vmatpush.msra.mxu1 %v3543_v5  ;;  %281 = vmatpush.msra.mxu3 %v3543_v5  ;;  %s3400_s30 = smov 96   ;;  %s4580_s7 = sld [smem:[#allocation20_spill]] }
  0x26   :  { %s2911_s0 = sshll.u32 %s4566_s20, 4  ;;  %s3404_s21 = smov [#allocation11]   ;;  %s2912_s0 = int_to_ptr.hbm [resolvable:$true] %s2911_s0 }
  0x27   :  { %192 = vmatpush.msra.mxu1 %v3549_v6  ;;  %282 = vmatpush.msra.mxu3 %v3549_v6  ;;  %s2895_s22 = sshll.u32 %s3404_s21, 4  ;;  %s3405_s14 = smov 2   ;;  %s2896_s22 = int_to_ptr.vmem [resolvable:$true] %s2895_s22 }
  0x28   :  { %v134_v1 = vld [vmem:[%s4577_s28 + $0x8] sm:$0xff]  ;;  %v133_v2 = vld [vmem:[%s4577_s28] sm:$0xff] }
  0x29   :  { %156 = vmatpush.msra.mxu0 %v134_v1  ;;  %v131_v3 = vld [vmem:[%s4578_s1] sm:$0xff]  ;;  %193 = vmatpush.msra.mxu1 %v3573_v10 }
  0x2a   :  { %v3554_v7 = vld [vmem:[%s4579_s27 + $0x18] sm:$0xff]  ;;  %v3559_v8 = vld [vmem:[%s4579_s27 + $0x10] sm:$0xff]  ;;  %v3566_v9 = vld [vmem:[%s4579_s27 + $0x8] sm:$0xff]  ;;  %194 = vmatmul.f32.vlgmr.msra.gmra.mxu1 %v3397_v11  ;;  %283 = vmatpush.msra.mxu3 %v3573_v10 }
  0x2b   :  { %157 = vmatpush.msra.mxu0 %v133_v2  ;;  %213 = vmatpush.msra.mxu2 %v3554_v7  ;;  %v3600_v12 = vld [vmem:[%s4579_s27] sm:$0xff] }
  0x2c   :  { %2928 = vmatmul.msk.f32.vlgmr.msra.gmra.mxu0 %vm135_vm0, %v131_v3  ;;  %303 = vmatpush.msrb.mxu1 %v3554_v7 }
  0x2d   :  { %214 = vmatpush.msra.mxu2 %v3559_v8  ;;  %454 = vmatpush.msrb.mxu0 %v3538_v4 }
  0x2e   :  { %390 = vmatpush.msrb.mxu3 %v3554_v7  ;;  %304 = vmatpush.msrb.mxu1 %v3559_v8 }
  0x2f   :  { %215 = vmatpush.msra.mxu2 %v3566_v9  ;;  %455 = vmatpush.msrb.mxu0 %v3543_v5 }
  0x30   :  { %391 = vmatpush.msrb.mxu3 %v3559_v8  ;;  %305 = vmatpush.msrb.mxu1 %v3566_v9 }
  0x31   :  { %456 = vmatpush.msrb.mxu0 %v3549_v6  ;;  %216 = vmatpush.msra.mxu2 %v3600_v12 }
  0x32   :  { %392 = vmatpush.msrb.mxu3 %v3566_v9  ;;  %306 = vmatpush.msrb.mxu1 %v3600_v12 }
  0x33   :  { %457 = vmatpush.msrb.mxu0 %v3573_v10  ;;  %367 = vmatpush.msrb.mxu2 %v3538_v4 }
  0x34   :  { %477 = vmatpush.msra.mxu1 %v3554_v7  ;;  %393 = vmatpush.msrb.mxu3 %v3600_v12 }
  0x35   :  { %628 = vmatpush.msra.mxu0 %v3538_v4  ;;  %368 = vmatpush.msrb.mxu2 %v3543_v5 }
  0x36   :  { %478 = vmatpush.msra.mxu1 %v3559_v8 }
  0x37   :  { %629 = vmatpush.msra.mxu0 %v3543_v5  ;;  %369 = vmatpush.msrb.mxu2 %v3549_v6 }
  0x38   :  { %479 = vmatpush.msra.mxu1 %v3566_v9 }
  0x39   :  { %630 = vmatpush.msra.mxu0 %v3549_v6  ;;  %370 = vmatpush.msrb.mxu2 %v3573_v10 }
  0x3a   :  { %480 = vmatpush.msra.mxu1 %v3600_v12 }
  0x3b   :  { %631 = vmatpush.msra.mxu0 %v3573_v10 }
  0xa7   :  { %v195_v17 = vpop.f32.mrf.mxu1 }
  0xa9   :  { %v3613_v13 = vpop.f32.mrf.mxu0 }
  0xaa   :  { %v288_v14 = vrot.slane %v3613_v13, 2  ;;  %2930 = vmatmul.msk.f32.vlgmr.msra.gmra.mxu2 %vm174_vm1, %v3613_v13  ;;  %v462_v15 = vrot.slane %v3613_v13, 6  ;;  %v375_v45 = vrot.slane %v3613_v13, 4 }
  0xab   :  { %541 = vmatpush.msra.mxu2 %v3538_v4 }
  0xac   :  { %2933 = vmatmul.msk.f32.vlgmr.msrb.gmra.mxu1 %vm174_vm1, %v288_v14 }
  0xad   :  { %651 = vmatpush.msrb.mxu1 %v3554_v7  ;;  %542 = vmatpush.msra.mxu2 %v3543_v5 }
  0xaf   :  { %652 = vmatpush.msrb.mxu1 %v3559_v8  ;;  %543 = vmatpush.msra.mxu2 %v3549_v6 }
  0xb1   :  { %653 = vmatpush.msrb.mxu1 %v3566_v9  ;;  %544 = vmatpush.msra.mxu2 %v3573_v10 }
  0xb3   :  { %654 = vmatpush.msrb.mxu1 %v3600_v12 }
  0xb4   :  { %2939 = vmatmul.msk.f32.vlgmr.msra.gmra.mxu1 %vm174_vm1, %v462_v15 }
 0x129   :  { %v308_v46 = vpop.f32.mrf.mxu1 }
 0x12d   :  { %v218_v18 = vpop.f32.mrf.mxu2 }
 0x12e   :  { %v219_v19 = vadd.f32 %v218_v18, %v195_v17 }
 0x130   :  { %v224_v20 = vadd.f32 %v3632_v16, %v219_v19 }
 0x132   :  { %245 = vrot.lane.b32.xlu0 %v224_v20, %s3398_s29  ;;  %v2931_v21 = vmul.f32 -1.442695, %v224_v20 }
 0x134   :  { %3063 = vpow2.f32 %v2931_v21 }
 0x13a   :  { %v3064_v22 = vpop.eup %3063 }
 0x13b   :  { %v228_v23 = vadd.f32 1.0, %v3064_v22 }
 0x13d   :  { %3065 = vrcp.f32 %v228_v23  ;;  %v240_v29 = vand.u32 2147483648, %v228_v23  ;;  %vm234_vm3 = vweird.f32 %v228_v23  ;;  %v238_v30 = vand.u32 2147483647, %v228_v23 }
 0x13f   :  { %v241_v32 = vor.u32 1.1754944e-38, %v240_v29  ;;  %vm239_vm5 = vcmp.eq.f32.partialorder %v238_v30, 8.507059e+37 }
 0x143   :  { %v3066_v24 = vpop.eup %3065 }
 0x144   :  { %v230_v25 = vmul.f32 %v3066_v24, %v228_v23  ;;  %vm235_vm2 = vweird.f32 %v3066_v24 }
 0x145   :  { %vm236_vm4 = vmor %vm234_vm3, %vm235_vm2 }
 0x146   :  { %v231_v26 = vsub.f32 1.0, %v230_v25 }
 0x148   :  { %v232_v27 = vmul.f32 %v3066_v24, %v231_v26 }
 0x14a   :  { %v233_v28 = vadd.f32 %v3066_v24, %v232_v27 }
 0x14c   :  { %v237_v31 = vsel %vm236_vm4, %v3066_v24, %v233_v28 }
 0x14d   :  { %v242_v34 = vsel %vm239_vm5, %v241_v32, %v237_v31 }
 0x14e   :  { %v255_v39 = vsub.f32 1.0, %v242_v34  ;;  %v261_v41 = vmul.f32 0.0, %v242_v34 }
 0x1a4   :  { %v246_v33 = vpop.permute.xlu0 %245 }
 0x1a5   :  { %v248_v35 = vmul.f32 %v246_v33, %v242_v34  ;;  %v132_v34 = vld [vmem:[%s4578_s1 + $0x8] sm:$0x3f] }
 0x1a6   :  { %2929 = vmatmul.msk.f32.gmra.mxu0 %vm135_vm0, %v132_v34 }
 0x1a7   :  { %250 = vrot.lane.b32.xlu0 %v248_v35, %s3399_s6 }
 0x219   :  { %v251_v36 = vpop.permute.xlu0 %250 }
 0x21a   :  { %v253_v37 = vadd.f32 %v251_v36, %v224_v20 }
 0x21c   :  { %3067 = vtanh.f32 %v253_v37 }
 0x222   :  { %v3068_v38 = vpop.eup %3067 }
 0x223   :  { %257 = vrot.lane.b32.xlu1 %v3068_v38, %s3400_s30 }
 0x295   :  { %v258_v40 = vpop.permute.xlu1 %257 }
 0x296   :  { %v260_v42 = vmul.f32 %v258_v40, %v255_v39 }
 0x298   :  { %v3638_v43 = vadd.f32 %v261_v41, %v260_v42  ;;  %v162_v41 = vpop.f32.mrf.mxu0 }
 0x299   :  { %v636_v42 = vrot.slane %v162_v41, 2 }
 0x29a   :  { %264 = vrot.lane.b32.xlu1 %v3638_v43, %s3400_s30 }
 0x29b   :  { %2945 = vmatmul.msk.f32.vlgmr.msrb.gmra.mxu1 %vm174_vm1, %v636_v42 }
 0x30c   :  { %v265_v44 = vpop.permute.xlu1 %264 }
 0x30d   :  { %2932 = vmatmul.msk.f32.vlgmr.msra.gmra.mxu3 %vm174_vm1, %v265_v44  ;;  %v723_v44 = vrot.slane %v162_v41, 4 }
 0x30e   :  { %564 = vmatpush.msra.mxu3 %v3554_v7 }
 0x310   :  { %565 = vmatpush.msra.mxu3 %v3559_v8 }
 0x312   :  { %566 = vmatpush.msra.mxu3 %v3566_v9 }
 0x314   :  { %567 = vmatpush.msra.mxu3 %v3600_v12 }
 0x315   :  { %2936 = vmatmul.msk.f32.vlgmr.msrb.gmra.mxu3 %vm174_vm1, %v375_v45  ;;  %v482_v45 = vpop.f32.mrf.mxu1 }
 0x316   :  { %738 = vmatpush.msrb.mxu3 %v3554_v7 }
 0x318   :  { %739 = vmatpush.msrb.mxu3 %v3559_v8 }
 0x31a   :  { %740 = vmatpush.msrb.mxu3 %v3566_v9 }
 0x31c   :  { %741 = vmatpush.msrb.mxu3 %v3600_v12 }
 0x31d   :  { %2942 = vmatmul.msk.f32.vlgmr.msra.gmra.mxu3 %vm174_vm1, %v162_v41  ;;  %v656_v41 = vpop.f32.mrf.mxu1 }
 0x325   :  { %2948 = vmatmul.msk.f32.vlgmr.msrb.gmra.mxu3 %vm174_vm1, %v723_v44 }
 0x390   :  { %v285_v47 = vpop.f32.mrf.mxu3 }
 0x391   :  { %v309_v48 = vadd.f32 %v308_v46, %v285_v47 }
 0x393   :  { %v311_v49 = vadd.f32 %v3632_v16, %v309_v48 }
 0x395   :  { %332 = vrot.lane.b32.xlu2 %v311_v49, %s3398_s29  ;;  %v2934_v50 = vmul.f32 -1.442695, %v311_v49 }
 0x397   :  { %3069 = vpow2.f32 %v2934_v50 }
 0x398   :  { %v395_v15 = vpop.f32.mrf.mxu3 }
 0x39d   :  { %v3070_v51 = vpop.eup %3069 }
 0x39e   :  { %v315_v52 = vadd.f32 1.0, %v3070_v51 }
 0x3a0   :  { %3071 = vrcp.f32 %v315_v52  ;;  %v327_v58 = vand.u32 2147483648, %v315_v52  ;;  %vm321_vm7 = vweird.f32 %v315_v52  ;;  %v325_v59 = vand.u32 2147483647, %v315_v52 }
 0x3a2   :  { %v328_v61 = vor.u32 1.1754944e-38, %v327_v58  ;;  %vm326_vm9 = vcmp.eq.f32.partialorder %v325_v59, 8.507059e+37 }
 0x3a6   :  { %v3072_v53 = vpop.eup %3071 }
 0x3a7   :  { %v317_v54 = vmul.f32 %v3072_v53, %v315_v52  ;;  %vm322_vm6 = vweird.f32 %v3072_v53 }
 0x3a8   :  { %vm323_vm8 = vmor %vm321_vm7, %vm322_vm6 }
 0x3a9   :  { %v318_v55 = vsub.f32 1.0, %v317_v54 }
 0x3ab   :  { %v319_v56 = vmul.f32 %v3072_v53, %v318_v55 }
 0x3ad   :  { %v320_v57 = vadd.f32 %v3072_v53, %v319_v56 }
 0x3af   :  { %v324_v60 = vsel %vm323_vm8, %v3072_v53, %v320_v57 }
 0x3b0   :  { %v329_v63 = vsel %vm326_vm9, %v328_v61, %v324_v60 }
 0x3b1   :  { %v342_v7 = vsub.f32 1.0, %v329_v63  ;;  %v348_v9 = vmul.f32 %v329_v63, %v3638_v43 }
 0x3ef   :  { %v333_v62 = vpop.permute.xlu2 %332 }
 0x3f0   :  { %v335_v0 = vmul.f32 %v333_v62, %v329_v63 }
 0x3f2   :  { %337 = vrot.lane.b32.xlu2 %v335_v0, %s3399_s6 }
 0x44c   :  { %v338_v1 = vpop.permute.xlu2 %337 }
 0x44d   :  { %v340_v2 = vadd.f32 %v338_v1, %v311_v49 }
 0x44f   :  { %3073 = vtanh.f32 %v340_v2 }
 0x455   :  { %v3074_v3 = vpop.eup %3073 }
 0x456   :  { %344 = vrot.lane.b32.xlu0 %v3074_v3, %s3400_s30 }
 0x4c8   :  { %v345_v8 = vpop.permute.xlu0 %344 }
 0x4c9   :  { %v347_v12 = vmul.f32 %v345_v8, %v342_v7 }
 0x4cb   :  { %v3658_v13 = vadd.f32 %v348_v9, %v347_v12 }
 0x4cd   :  { %351 = vrot.lane.b32.xlu1 %v3658_v13, %s3400_s30 }
 0x53f   :  { %v352_v14 = vpop.permute.xlu1 %351 }
 0x540   :  { %2935 = vmatmul.msk.f32.vlgmr.msrb.gmra.mxu2 %vm174_vm1, %v352_v14 }
 0x541   :  { %715 = vmatpush.msrb.mxu2 %v3538_v4 }
 0x543   :  { %716 = vmatpush.msrb.mxu2 %v3543_v5 }
 0x545   :  { %717 = vmatpush.msrb.mxu2 %v3549_v6 }
 0x547   :  { %718 = vmatpush.msrb.mxu2 %v3573_v10 }
 0x5c3   :  { %v372_v17 = vpop.f32.mrf.mxu2 }
 0x5c4   :  { %v396_v18 = vadd.f32 %v395_v15, %v372_v17  ;;  %v569_v15 = vpop.f32.mrf.mxu3 }
 0x5c6   :  { %v398_v19 = vadd.f32 %v3632_v16, %v396_v18 }
 0x5c8   :  { %419 = vrot.lane.b32.xlu2 %v398_v19, %s3398_s29  ;;  %v2937_v20 = vmul.f32 -1.442695, %v398_v19 }
 0x5ca   :  { %3075 = vpow2.f32 %v2937_v20 }
 0x5d0   :  { %v3076_v21 = vpop.eup %3075 }
 0x5d1   :  { %v402_v22 = vadd.f32 1.0, %v3076_v21 }
 0x5d3   :  { %3077 = vrcp.f32 %v402_v22  ;;  %v414_v6 = vand.u32 2147483648, %v402_v22  ;;  %vm408_vm11 = vweird.f32 %v402_v22  ;;  %v412_v10 = vand.u32 2147483647, %v402_v22 }
 0x5d5   :  { %v415_v27 = vor.u32 1.1754944e-38, %v414_v6  ;;  %vm413_vm13 = vcmp.eq.f32.partialorder %v412_v10, 8.507059e+37 }
 0x5d9   :  { %v3078_v23 = vpop.eup %3077 }
 0x5da   :  { %v404_v4 = vmul.f32 %v3078_v23, %v402_v22  ;;  %vm409_vm10 = vweird.f32 %v3078_v23 }
 0x5db   :  { %vm410_vm12 = vmor %vm408_vm11, %vm409_vm10 }
 0x5dc   :  { %v405_v24 = vsub.f32 1.0, %v404_v4 }
 0x5de   :  { %v406_v5 = vmul.f32 %v3078_v23, %v405_v24 }
 0x5e0   :  { %v407_v25 = vadd.f32 %v3078_v23, %v406_v5 }
 0x5e2   :  { %v411_v26 = vsel %vm410_vm12, %v3078_v23, %v407_v25 }
 0x5e3   :  { %v416_v29 = vsel %vm413_vm13, %v415_v27, %v411_v26 }
 0x5e4   :  { %v429_v35 = vsub.f32 1.0, %v416_v29  ;;  %v435_v37 = vmul.f32 %v416_v29, %v3658_v13 }
 0x622   :  { %v420_v28 = vpop.permute.xlu2 %419 }
 0x623   :  { %v422_v30 = vmul.f32 %v420_v28, %v416_v29 }
 0x625   :  { %424 = vrot.lane.b32.xlu0 %v422_v30, %s3399_s6 }
 0x697   :  { %v425_v31 = vpop.permute.xlu0 %424 }
 0x698   :  { %v427_v32 = vadd.f32 %v425_v31, %v398_v19 }
 0x69a   :  { %3079 = vtanh.f32 %v427_v32 }
 0x6a0   :  { %v3080_v33 = vpop.eup %3079 }
 0x6a1   :  { %431 = vrot.lane.b32.xlu1 %v3080_v33, %s3400_s30 }
 0x713   :  { %v432_v36 = vpop.permute.xlu1 %431 }
 0x714   :  { %v434_v38 = vmul.f32 %v432_v36, %v429_v35 }
 0x716   :  { %v3676_v39 = vadd.f32 %v435_v37, %v434_v38 }
 0x718   :  { %438 = vrot.lane.b32.xlu2 %v3676_v39, %s3400_s30 }
 0x772   :  { %v439_v40 = vpop.permute.xlu2 %438 }
 0x773   :  { %2938 = vmatmul.msk.f32.vlgmr.msrb.gmra.mxu0 %vm174_vm1, %v439_v40 }
 0x7f0   :  { %v459_v46 = vpop.f32.mrf.mxu0 }
 0x7f1   :  { %v483_v47 = vadd.f32 %v482_v45, %v459_v46 }
 0x7f3   :  { %v485_v48 = vadd.f32 %v3632_v16, %v483_v47 }
 0x7f5   :  { %506 = vrot.lane.b32.xlu0 %v485_v48, %s3398_s29  ;;  %v2940_v49 = vmul.f32 -1.442695, %v485_v48 }
 0x7f7   :  { %3081 = vpow2.f32 %v2940_v49 }
 0x7fd   :  { %v3082_v50 = vpop.eup %3081 }
 0x7fe   :  { %v489_v51 = vadd.f32 1.0, %v3082_v50 }
 0x800   :  { %3083 = vrcp.f32 %v489_v51  ;;  %v501_v57 = vand.u32 2147483648, %v489_v51  ;;  %vm495_vm15 = vweird.f32 %v489_v51  ;;  %v499_v58 = vand.u32 2147483647, %v489_v51 }
 0x802   :  { %v502_v60 = vor.u32 1.1754944e-38, %v501_v57  ;;  %vm500_vm3 = vcmp.eq.f32.partialorder %v499_v58, 8.507059e+37 }
 0x806   :  { %v3084_v52 = vpop.eup %3083 }
 0x807   :  { %v491_v53 = vmul.f32 %v3084_v52, %v489_v51  ;;  %vm496_vm14 = vweird.f32 %v3084_v52 }
 0x808   :  { %vm497_vm2 = vmor %vm495_vm15, %vm496_vm14 }
 0x809   :  { %v492_v54 = vsub.f32 1.0, %v491_v53 }
 0x80b   :  { %v493_v55 = vmul.f32 %v3084_v52, %v492_v54 }
 0x80d   :  { %v494_v56 = vadd.f32 %v3084_v52, %v493_v55 }
 0x80f   :  { %v498_v59 = vsel %vm497_vm2, %v3084_v52, %v494_v56 }
 0x810   :  { %v503_v62 = vsel %vm500_vm3, %v502_v60, %v498_v59  ;;  %vm798_vm3 = vcmask 1040384  }
 0x811   :  { %v516_v3 = vsub.f32 1.0, %v503_v62  ;;  %v522_v8 = vmul.f32 %v503_v62, %v3676_v39 }
 0x867   :  { %v507_v61 = vpop.permute.xlu0 %506 }
 0x868   :  { %v509_v63 = vmul.f32 %v507_v61, %v503_v62 }
 0x86a   :  { %511 = vrot.lane.b32.xlu1 %v509_v63, %s3399_s6 }
 0x8dc   :  { %v512_v0 = vpop.permute.xlu1 %511 }
 0x8dd   :  { %v514_v1 = vadd.f32 %v512_v0, %v485_v48 }
 0x8df   :  { %3085 = vtanh.f32 %v514_v1 }
 0x8e5   :  { %v3086_v2 = vpop.eup %3085 }
 0x8e6   :  { %518 = vrot.lane.b32.xlu2 %v3086_v2, %s3400_s30 }
 0x940   :  { %v519_v7 = vpop.permute.xlu2 %518 }
 0x941   :  { %v521_v9 = vmul.f32 %v519_v7, %v516_v3 }
 0x943   :  { %v3689_v12 = vadd.f32 %v522_v8, %v521_v9  ;;  %v743_v9 = vpop.f32.mrf.mxu3 }
 0x945   :  { %525 = vrot.lane.b32.xlu0 %v3689_v12, %s3400_s30 }
 0x9b7   :  { %v526_v14 = vpop.permute.xlu0 %525 }
 0x9b8   :  { %2941 = vmatmul.msk.f32.vlgmr.msra.gmra.mxu2 %vm174_vm1, %v526_v14 }
 0xa3b   :  { %v546_v17 = vpop.f32.mrf.mxu2 }
 0xa3c   :  { %v570_v18 = vadd.f32 %v569_v15, %v546_v17 }
 0xa3e   :  { %v572_v19 = vadd.f32 %v3632_v16, %v570_v18 }
 0xa40   :  { %593 = vrot.lane.b32.xlu1 %v572_v19, %s3398_s29  ;;  %v2943_v20 = vmul.f32 -1.442695, %v572_v19 }
 0xa42   :  { %3087 = vpow2.f32 %v2943_v20 }
 0xa48   :  { %v3088_v21 = vpop.eup %3087 }
 0xa49   :  { %v576_v22 = vadd.f32 1.0, %v3088_v21 }
 0xa4b   :  { %3089 = vrcp.f32 %v576_v22  ;;  %v588_v6 = vand.u32 2147483648, %v576_v22  ;;  %vm582_vm5 = vweird.f32 %v576_v22  ;;  %v586_v10 = vand.u32 2147483647, %v576_v22 }
 0xa4d   :  { %v589_v27 = vor.u32 1.1754944e-38, %v588_v6  ;;  %vm587_vm7 = vcmp.eq.f32.partialorder %v586_v10, 8.507059e+37 }
 0xa51   :  { %v3090_v23 = vpop.eup %3089 }
 0xa52   :  { %v578_v4 = vmul.f32 %v3090_v23, %v576_v22  ;;  %vm583_vm4 = vweird.f32 %v3090_v23 }
 0xa53   :  { %vm584_vm6 = vmor %vm582_vm5, %vm583_vm4  ;;  %vm800_vm4 = vcmask 1041408   ;;  %vm802_vm5 = vcmask 1042432  }
 0xa54   :  { %v579_v24 = vsub.f32 1.0, %v578_v4 }
 0xa56   :  { %v580_v5 = vmul.f32 %v3090_v23, %v579_v24 }
 0xa58   :  { %v581_v25 = vadd.f32 %v3090_v23, %v580_v5 }
 0xa5a   :  { %v585_v26 = vsel %vm584_vm6, %v3090_v23, %v581_v25  ;;  %vm804_vm6 = vcmask 1043456  }
 0xa5b   :  { %v590_v29 = vsel %vm587_vm7, %v589_v27, %v585_v26  ;;  %vm806_vm7 = vcmask 1044480  }
 0xa5c   :  { %v603_v34 = vsub.f32 1.0, %v590_v29  ;;  %v609_v36 = vmul.f32 %v590_v29, %v3689_v12 }
 0xab2   :  { %v594_v28 = vpop.permute.xlu1 %593 }
 0xab3   :  { %v596_v30 = vmul.f32 %v594_v28, %v590_v29  ;;  %v3717_v28 = vld [vmem:[#allocation3 + $0x8] sm:$0xff]  ;;  %v3719_v29 = vld [vmem:[#allocation3] sm:$0xff] }
 0xab4   :  { %876 = vmatpush.msrb.mxu0 %v3717_v28 }
 0xab5   :  { %598 = vrot.lane.b32.xlu2 %v596_v30, %s3399_s6  ;;  %v853_v30 = vlaneseq }
 0xab6   :  { %877 = vmatpush.msrb.mxu0 %v3719_v29 }
 0xb0f   :  { %v599_v31 = vpop.permute.xlu2 %598 }
 0xb10   :  { %v601_v32 = vadd.f32 %v599_v31, %v572_v19  ;;  %v854_v31 = vand.u32 127, %v853_v30  ;;  %v3879_v30 = vld [vmem:[%s4558_s12] sm:$0xff] }
 0xb12   :  { %3091 = vtanh.f32 %v601_v32  ;;  %v3723_v32 = vcvt.s32.f32 %v854_v31  ;;  %v3882_v31 = vld [vmem:[#allocation9 + $0x18] sm:$0xff] }
 0xb14   :  { %vm856_vm2 = vcmp.eq.f32.partialorder %v3723_v32, 0.0 }
 0xb18   :  { %v3092_v33 = vpop.eup %3091 }
 0xb19   :  { %605 = vrot.lane.b32.xlu0 %v3092_v33, %s3400_s30  ;;  %v2950_v33 = vsel %vm856_vm2, 1.0, %v3397_v11 }
 0xb8b   :  { %v606_v35 = vpop.permute.xlu0 %605 }
 0xb8c   :  { %v608_v37 = vmul.f32 %v606_v35, %v603_v34 }
 0xb8e   :  { %v3699_v38 = vadd.f32 %v609_v36, %v608_v37  ;;  %v3732_v37 = vld [vmem:[%s4554_s8 + $0x18] sm:$0xff] }
 0xb8f   :  { %921 = vmatpush.msra.mxu2 %v3732_v37 }
 0xb90   :  { %612 = vrot.lane.b32.xlu1 %v3699_v38, %s3400_s30 }
 0xc02   :  { %v613_v40 = vpop.permute.xlu1 %612 }
 0xc03   :  { %2944 = vmatmul.msk.f32.vlgmr.msra.gmra.mxu0 %vm174_vm1, %v613_v40  ;;  %v3737_v40 = vld [vmem:[%s4554_s8 + $0x10] sm:$0xff] }
 0xc04   :  { %922 = vmatpush.msra.mxu2 %v3737_v40 }
 0xc0b   :  { %2951 = vmatmul.msk.f32.vlgmr.msrb.gmra.mxu0 %vm135_vm0, %v2950_v33  ;;  %v3886_v33 = vld [vmem:[#allocation9 + $0x10] sm:$0xff] }
 0xc80   :  { %v633_v42 = vpop.f32.mrf.mxu0 }
 0xc81   :  { %v657_v44 = vadd.f32 %v656_v41, %v633_v42  ;;  %v3743_v41 = vld [vmem:[%s4555_s9 + $0x18] sm:$0xff]  ;;  %v3748_v42 = vld [vmem:[%s4554_s8 + $0x8] sm:$0xff] }
 0xc82   :  { %898 = vmatpush.msra.mxu1 %v3743_v41  ;;  %923 = vmatpush.msra.mxu2 %v3748_v42 }
 0xc83   :  { %v659_v45 = vadd.f32 %v3632_v16, %v657_v44  ;;  %v3754_v44 = vld [vmem:[%s4555_s9 + $0x10] sm:$0xff] }
 0xc84   :  { %899 = vmatpush.msra.mxu1 %v3754_v44 }
 0xc85   :  { %680 = vrot.lane.b32.xlu2 %v659_v45, %s3398_s29  ;;  %v2946_v46 = vmul.f32 -1.442695, %v659_v45 }
 0xc87   :  { %3093 = vpow2.f32 %v2946_v46  ;;  %v3765_v46 = vld [vmem:[%s4554_s8] sm:$0xff] }
 0xc88   :  { %924 = vmatpush.msra.mxu2 %v3765_v46 }
 0xc8d   :  { %v3094_v47 = vpop.eup %3093 }
 0xc8e   :  { %v663_v48 = vadd.f32 1.0, %v3094_v47  ;;  %v3769_v47 = vld [vmem:[#allocation8 + $0x18] sm:$0xff] }
 0xc90   :  { %3095 = vrcp.f32 %v663_v48  ;;  %v675_v54 = vand.u32 2147483648, %v663_v48  ;;  %vm669_vm9 = vweird.f32 %v663_v48  ;;  %v673_v55 = vand.u32 2147483647, %v663_v48 }
 0xc92   :  { %v676_v57 = vor.u32 1.1754944e-38, %v675_v54  ;;  %vm674_vm11 = vcmp.eq.f32.partialorder %v673_v55, 8.507059e+37  ;;  %v789_v55 = vrot.slane %v3689_v12, 5 }
 0xc96   :  { %v3096_v49 = vpop.eup %3095 }
 0xc97   :  { %v665_v50 = vmul.f32 %v3096_v49, %v663_v48  ;;  %vm670_vm8 = vweird.f32 %v3096_v49  ;;  %v3774_v48 = vld [vmem:[%s4555_s9] sm:$0xff] }
 0xc98   :  { %vm671_vm10 = vmor %vm669_vm9, %vm670_vm8  ;;  %vm808_vm8 = vcmask 1045504   ;;  %vm810_vm9 = vcmask 1046528  }
 0xc99   :  { %v666_v51 = vsub.f32 1.0, %v665_v50  ;;  %v3782_v50 = vld [vmem:[#allocation8 + $0x8] sm:$0xff] }
 0xc9b   :  { %v667_v52 = vmul.f32 %v3096_v49, %v666_v51  ;;  %v3785_v51 = vld [vmem:[#allocation8] sm:$0xff] }
 0xc9d   :  { %v668_v53 = vadd.f32 %v3096_v49, %v667_v52  ;;  %v785_v52 = vrot.slane %v3658_v13, 7 }
 0xc9f   :  { %v672_v56 = vsel %vm671_vm10, %v3096_v49, %v668_v53  ;;  %v3778_v49 = vld [vmem:[#allocation8 + $0x10] sm:$0xff]  ;;  %v787_v53 = vrot.slane %v3676_v39, 6  ;;  %vm933_vm10 = vcmask 74752  }
 0xca0   :  { %v677_v59 = vsel %vm674_vm11, %v676_v57, %v672_v56  ;;  %v791_v57 = vrot.slane %v3699_v38, 4  ;;  %vm951_vm11 = vcmask 80896  }
 0xca1   :  { %v690_v0 = vsub.f32 1.0, %v677_v59  ;;  %v696_v2 = vmul.f32 %v677_v59, %v3699_v38 }
 0xcdf   :  { %v681_v58 = vpop.permute.xlu2 %680 }
 0xce0   :  { %v683_v60 = vmul.f32 %v681_v58, %v677_v59 }
 0xce2   :  { %685 = vrot.lane.b32.xlu0 %v683_v60, %s3399_s6  ;;  %v799_v60 = vsel %vm798_vm3, %v3638_v43, %v785_v52 }
 0xce3   :  { %v801_v13 = vsel %vm800_vm4, %v799_v60, %v787_v53  ;;  %v3895_v53 = vld [vmem:[#allocation9] sm:$0xff] }
 0xce4   :  { %v803_v39 = vsel %vm802_vm5, %v801_v13, %v789_v55 }
 0xce5   :  { %v805_v38 = vsel %vm804_vm6, %v803_v39, %v791_v57  ;;  %v3908_v57 = vld [vmem:[#allocation6 + $0x8] sm:$0xff] }
 0xd54   :  { %v686_v61 = vpop.permute.xlu0 %685 }
 0xd55   :  { %v688_v62 = vadd.f32 %v686_v61, %v659_v45  ;;  %v3760_v45 = vld [vmem:[%s4555_s9 + $0x8] sm:$0xff] }
 0xd56   :  { %900 = vmatpush.msra.mxu1 %v3760_v45 }
 0xd57   :  { %3097 = vtanh.f32 %v688_v62 }
 0xd58   :  { %901 = vmatpush.msra.mxu1 %v3774_v48 }
 0xd5d   :  { %v3098_v63 = vpop.eup %3097 }
 0xd5e   :  { %692 = vrot.lane.b32.xlu1 %v3098_v63, %s3400_s30 }
 0xdd0   :  { %v693_v1 = vpop.permute.xlu1 %692 }
 0xdd1   :  { %v695_v3 = vmul.f32 %v693_v1, %v690_v0 }
 0xdd3   :  { %v3709_v7 = vadd.f32 %v696_v2, %v695_v3  ;;  %v879_v2 = vpop.f32.mrf.mxu0  ;;  %v3812_v3 = vld [vmem:[%s4557_s11 + $0x18] sm:$0xff] }
 0xdd4   :  { %1012 = vmatpush.msrb.mxu1 %v3812_v3 }
 0xdd5   :  { %699 = vrot.lane.b32.xlu2 %v3709_v7, %s3400_s30  ;;  %v793_v61 = vrot.slane %v3709_v7, 3 }
 0xdd7   :  { %v807_v63 = vsel %vm806_vm7, %v805_v38, %v793_v61  ;;  %v3932_v38 = vld [vmem:[%s4562_s16] ss:$0 sm:$0xff] }
 0xe2f   :  { %v700_v8 = vpop.permute.xlu2 %699 }
 0xe30   :  { %2947 = vmatmul.msk.f32.vlgmr.msrb.gmra.mxu2 %vm174_vm1, %v700_v8  ;;  %v3823_v8 = vld [vmem:[%s4557_s11 + $0x8] sm:$0xff] }
 0xe31   :  { %1037 = vmatpush.msrb.mxu2 %v3769_v47 }
 0xe33   :  { %1038 = vmatpush.msrb.mxu2 %v3778_v49 }
 0xe35   :  { %1039 = vmatpush.msrb.mxu2 %v3782_v50 }
 0xe37   :  { %1040 = vmatpush.msrb.mxu2 %v3785_v51 }
 0xe38   :  { %2953 = vmatmul.msk.f32.vlgmr.msra.gmra.mxu2 %vm174_vm1, %v879_v2 }
 0xe39   :  { %1219 = vmatpush.msra.mxu2 %v3743_v41 }
 0xe3b   :  { %1220 = vmatpush.msra.mxu2 %v3754_v44 }
 0xe3d   :  { %1221 = vmatpush.msra.mxu2 %v3760_v45 }
 0xe3f   :  { %1222 = vmatpush.msra.mxu2 %v3774_v48 }
 0xeb3   :  { %v720_v14 = vpop.f32.mrf.mxu2 }
 0xeb4   :  { %v744_v15 = vadd.f32 %v743_v9, %v720_v14  ;;  %v3829_v9 = vld [vmem:[%s4557_s11] sm:$0xff] }
 0xeb6   :  { %v746_v17 = vadd.f32 %v3632_v16, %v744_v15 }
 0xeb8   :  { %767 = vrot.lane.b32.xlu0 %v746_v17, %s3398_s29  ;;  %v2949_v18 = vmul.f32 -1.442695, %v746_v17 }
 0xeba   :  { %3099 = vpow2.f32 %v2949_v18 }
 0xec0   :  { %v3100_v19 = vpop.eup %3099 }
 0xec1   :  { %v750_v20 = vadd.f32 1.0, %v3100_v19  ;;  %v3852_v19 = vld [vmem:[%s4556_s10] ss:$0 sm:$0xff] }
 0xec3   :  { %3101 = vrcp.f32 %v750_v20  ;;  %v762_v5 = vand.u32 2147483648, %v750_v20  ;;  %vm756_vm13 = vweird.f32 %v750_v20  ;;  %v760_v25 = vand.u32 2147483647, %v750_v20 }
 0xec5   :  { %v763_v10 = vor.u32 1.1754944e-38, %v762_v5  ;;  %vm761_vm15 = vcmp.eq.f32.partialorder %v760_v25, 8.507059e+37 }
 0xec9   :  { %v3102_v21 = vpop.eup %3101 }
 0xeca   :  { %v752_v22 = vmul.f32 %v3102_v21, %v750_v20  ;;  %vm757_vm12 = vweird.f32 %v3102_v21  ;;  %v926_v20 = vpop.f32.mrf.mxu2 }
 0xecb   :  { %vm758_vm14 = vmor %vm756_vm13, %vm757_vm12 }
 0xecc   :  { %v753_v23 = vsub.f32 1.0, %v752_v22 }
 0xece   :  { %v754_v4 = vmul.f32 %v3102_v21, %v753_v23 }
 0xed0   :  { %v755_v24 = vadd.f32 %v3102_v21, %v754_v4 }
 0xed2   :  { %v759_v6 = vsel %vm758_vm14, %v3102_v21, %v755_v24 }
 0xed3   :  { %v764_v26 = vsel %vm761_vm15, %v763_v10, %v759_v6 }
 0xed4   :  { %v777_v54 = vsub.f32 1.0, %v764_v26  ;;  %v783_v58 = vmul.f32 %v764_v26, %v3709_v7  ;;  %v3817_v7 = vld [vmem:[%s4557_s11 + $0x10] sm:$0xff] }
 0xed5   :  { %1013 = vmatpush.msrb.mxu1 %v3817_v7 }
 0xed7   :  { %1014 = vmatpush.msrb.mxu1 %v3823_v8 }
 0xed9   :  { %1015 = vmatpush.msrb.mxu1 %v3829_v9 }
 0xf2a   :  { %v768_v16 = vpop.permute.xlu0 %767 }
 0xf2b   :  { %v770_v27 = vmul.f32 %v768_v16, %v764_v26  ;;  %v3860_v16 = vld [vmem:[%s4558_s12 + $0x18] sm:$0xff]  ;;  %v3865_v26 = vld [vmem:[%s4558_s12 + $0x10] sm:$0xff] }
 0xf2c   :  { %992 = vmatpush.msra.mxu0 %v3860_v16 }
 0xf2d   :  { %772 = vrot.lane.b32.xlu1 %v770_v27, %s3399_s6  ;;  %v3872_v27 = vld [vmem:[%s4558_s12 + $0x8] sm:$0xff] }
 0xf2e   :  { %993 = vmatpush.msra.mxu0 %v3865_v26 }
 0xf30   :  { %994 = vmatpush.msra.mxu0 %v3872_v27 }
 0xf32   :  { %995 = vmatpush.msra.mxu0 %v3879_v30 }
 0xf34   :  { %1130 = vmatpush.msrb.mxu0 %v3882_v31 }
 0xf36   :  { %1131 = vmatpush.msrb.mxu0 %v3886_v33 }
 0xf9f   :  { %v773_v34 = vpop.permute.xlu1 %772 }
 0xfa0   :  { %v775_v35 = vadd.f32 %v773_v34, %v746_v17  ;;  %v3890_v34 = vld [vmem:[#allocation9 + $0x8] sm:$0xff] }
 0xfa1   :  { %1132 = vmatpush.msrb.mxu0 %v3890_v34 }
 0xfa2   :  { %3103 = vtanh.f32 %v775_v35 }
 0xfa3   :  { %1133 = vmatpush.msrb.mxu0 %v3895_v53 }
 0xfa8   :  { %v3104_v36 = vpop.eup %3103 }
 0xfa9   :  { %779 = vrot.lane.b32.xlu2 %v3104_v36, %s3400_s30 }
0x1003   :  { %v780_v56 = vpop.permute.xlu2 %779 }
0x1004   :  { %v782_v59 = vmul.f32 %v780_v56, %v777_v54  ;;  %v3898_v54 = vld [vmem:[#allocation6 + $0x18] sm:$0xff]  ;;  %v3905_v56 = vld [vmem:[#allocation6 + $0x10] sm:$0xff] }
0x1006   :  { %v3797_v62 = vadd.f32 %v783_v58, %v782_v59  ;;  %v3911_v58 = vld [vmem:[#allocation6] sm:$0xff]  ;;  %v3921_v59 = vld [vmem:[%s4559_s13] ss:$0 sm:$0xff] }
0x1008   :  { %v796_v12 = vrot.slane %v3797_v62, 2  ;;  %882 = vrot.lane.b32.xlu0 %v3797_v62, %s3400_s30 }
0x100a   :  { %v809_v0 = vsel %vm808_vm8, %v807_v63, %v796_v12 }
0x100b   :  { %v811_v43 = vsel %vm810_vm9, %v809_v0, 0.0 }
0x100c   :  { %v3049_v1 = vpack.i.bf16 %v811_v43, %v3397_v11 }
0x1010   :  { %3050 = vrot.lane.b32.xlu0 %v3049_v1, %s3400_s30 }
0x107a   :  { %v883_v14 = vpop.permute.xlu0 %882 }
0x107b   :  { %2952 = vmatmul.msk.f32.vlgmr.msra.gmra.mxu1 %vm174_vm1, %v883_v14  ;;  %2958 = vmatmul.msk.f32.vlgmr.msrb.gmra.mxu2 %vm174_vm1, %v883_v14 }
0x107c   :  { %1201 = vmatpush.msra.mxu1 %v3717_v28  ;;  %1320 = vmatpush.msrb.mxu2 %v3812_v3 }
0x107e   :  { %1202 = vmatpush.msra.mxu1 %v3719_v29  ;;  %1321 = vmatpush.msrb.mxu2 %v3817_v7 }
0x1080   :  { %1322 = vmatpush.msrb.mxu2 %v3823_v8 }
0x1082   :  { %v3051_v15 = vpop.permute.xlu0 %3050  ;;  %1323 = vmatpush.msrb.mxu2 %v3829_v9 }
0x1083   :  { %v3841_v17 = vunpack.i.l.bf16 %v3051_v15  ;;  %2957 = vmatmul.msk.f32.vlgmr.msrb.gmra.mxu1 %vm174_vm1, %v879_v2  ;;  %v3844_v18 = vunpack.i.h.bf16 %v3051_v15 }
0x1084   :  { %1300 = vmatpush.msrb.mxu1 %v3860_v16 }
0x1085   :  { %2954 = vmatpush.msk.msra.mxu3 %vm800_vm4, %v3841_v17 }
0x1086   :  { %1301 = vmatpush.msrb.mxu1 %v3865_v26 }
0x1087   :  { %972 = vmatpush.msra.mxu3 %v3844_v18 }
0x1088   :  { %1302 = vmatpush.msrb.mxu1 %v3872_v27 }
0x1089   :  { %1060 = vmatpush.msrb.mxu3 %v3898_v54 }
0x108a   :  { %1303 = vmatpush.msrb.mxu1 %v3879_v30 }
0x108b   :  { %1061 = vmatpush.msrb.mxu3 %v3905_v56 }
0x108d   :  { %1062 = vmatpush.msrb.mxu3 %v3908_v57 }
0x108f   :  { %1063 = vmatpush.msrb.mxu3 %v3911_v58 }
0x10f8   :  { %v903_v21 = vpop.f32.mrf.mxu1 }
0x10f9   :  { %v927_v22 = vadd.f32 %v926_v20, %v903_v21 }
0x10fb   :  { %v932_v23 = vadd.f32 %v3852_v19, %v927_v22 }
0x10fd   :  { %v934_v4 = vsel %vm933_vm10, %v932_v23, -inf }
0x10fe   :  { %935 = vmax.xlane.f32.xlu1 %v934_v4  ;;  %v1042_v63 = vpop.f32.mrf.mxu2 }
0x1100   :  { %v1017_v60 = vpop.f32.mrf.mxu1 }
0x1171   :  { %v936_v24 = vpop.xlane.xlu1 %935 }
0x1172   :  { %v937_v5 = vsub.f32 %v932_v23, %v936_v24 }
0x1174   :  { %v938_v25 = vmul.f32 1.442695, %v937_v5 }
0x1176   :  { %3105 = vpow2.f32 %v938_v25 }
0x117c   :  { %v3106_v6 = vpop.eup %3105 }
0x117d   :  { %v940_v10 = vsel %vm933_vm10, %v3106_v6, 0.0 }
0x117e   :  { %941 = vadd.xlane.f32.xlu2 %v940_v10 }
0x11f1   :  { %v942_v35 = vpop.xlane.xlu2 %941 }
0x11f2   :  { %3107 = vrcp.f32 %v942_v35 }
0x11f8   :  { %v3108_v36 = vpop.eup %3107 }
0x11f9   :  { %v944_v52 = vmul.f32 %v3108_v36, %v3106_v6 }
0x11fb   :  { %2955 = vmatmul.msk.f32.vlgmr.msra.gmra.mxu3 %vm951_vm11, %v944_v52 }
0x11fc   :  { %1242 = vmatpush.msra.mxu3 %v3732_v37 }
0x11fe   :  { %1243 = vmatpush.msra.mxu3 %v3737_v40 }
0x1200   :  { %1244 = vmatpush.msra.mxu3 %v3748_v42 }
0x1202   :  { %1245 = vmatpush.msra.mxu3 %v3765_v46 }
0x127e   :  { %v974_v55 = vpop.f32.mrf.mxu3 }
0x127f   :  { %2956 = vmatmul.msk.f32.vlgmr.msra.gmra.mxu0 %vm174_vm1, %v974_v55 }
0x1280   :  { %2966 = vmatpush.msk.msra.mxu0 %vm800_vm4, %v3841_v17 }
0x1282   :  { %1280 = vmatpush.msra.mxu0 %v3844_v18 }
0x12fc   :  { %v997_v61 = vpop.f32.mrf.mxu0 }
0x12fd   :  { %v1018_v13 = vadd.f32 %v1017_v60, %v997_v61 }
0x12ff   :  { %v1023_v39 = vadd.f32 %v3921_v59, %v1018_v13 }
0x1301   :  { %v1024_v12 = vmax.f32 %v1023_v39, 0.0 }
0x1303   :  { %2959 = vmatmul.msk.f32.vlgmr.msrb.gmra.mxu3 %vm174_vm1, %v1024_v12 }
0x1304   :  { %1342 = vmatpush.msrb.mxu3 %v3769_v47 }
0x1306   :  { %1343 = vmatpush.msrb.mxu3 %v3778_v49 }
0x1308   :  { %1344 = vmatpush.msrb.mxu3 %v3782_v50 }
0x130a   :  { %1345 = vmatpush.msrb.mxu3 %v3785_v51 }
0x1386   :  { %v1065_v0 = vpop.f32.mrf.mxu3 }
0x1387   :  { %v1066_v43 = vadd.f32 %v1065_v0, %v1042_v63 }
0x1389   :  { %v1071_v1 = vadd.f32 %v3932_v38, %v1066_v43 }
0x138b   :  { %1092 = vrot.lane.b32.xlu0 %v1071_v1, %s3398_s29  ;;  %v2960_v2 = vmul.f32 -1.442695, %v1071_v1 }
0x138d   :  { %3109 = vpow2.f32 %v2960_v2 }
0x1393   :  { %v3110_v14 = vpop.eup %3109 }
0x1394   :  { %v1075_v15 = vadd.f32 1.0, %v3110_v14 }
0x1396   :  { %3111 = vrcp.f32 %v1075_v15  ;;  %v1087_v24 = vand.u32 2147483648, %v1075_v15  ;;  %vm1081_vm13 = vweird.f32 %v1075_v15  ;;  %v1085_v5 = vand.u32 2147483647, %v1075_v15 }
0x1398   :  { %v1088_v6 = vor.u32 1.1754944e-38, %v1087_v24  ;;  %vm1086_vm15 = vcmp.eq.f32.partialorder %v1085_v5, 8.507059e+37 }
0x139c   :  { %v3112_v20 = vpop.eup %3111 }
0x139d   :  { %v1077_v21 = vmul.f32 %v3112_v20, %v1075_v15  ;;  %vm1082_vm12 = vweird.f32 %v3112_v20 }
0x139e   :  { %vm1083_vm14 = vmor %vm1081_vm13, %vm1082_vm12 }
0x139f   :  { %v1078_v22 = vsub.f32 1.0, %v1077_v21 }
0x13a1   :  { %v1079_v23 = vmul.f32 %v3112_v20, %v1078_v22 }
0x13a3   :  { %v1080_v4 = vadd.f32 %v3112_v20, %v1079_v23 }
0x13a5   :  { %v1084_v25 = vsel %vm1083_vm14, %v3112_v20, %v1080_v4 }
0x13a6   :  { %v1089_v35 = vsel %vm1086_vm15, %v1088_v6, %v1084_v25 }
0x13a7   :  { %v1102_v61 = vsub.f32 1.0, %v1089_v35  ;;  %v1108_v39 = vmul.f32 %v1089_v35, %v3797_v62  ;;  %v3958_v62 = vld [vmem:[%s4564_s18] ss:$0 sm:$0xff] }
0x13fd   :  { %v1093_v10 = vpop.permute.xlu0 %1092 }
0x13fe   :  { %v1095_v36 = vmul.f32 %v1093_v10, %v1089_v35  ;;  %v3062_v10 = vld [vmem:[#allocation2] ss:$0 sm:$0xff]  ;;  %v3401_v35 = vmov 0  }
0x13ff   :  { %3054 = vset.pattern.permute.xlu1 %v3401_v35  ;;  %3055 = vset.pattern.permute.xlu2 %v3401_v35 }
0x1400   :  { %1097 = vrot.lane.b32.xlu0 %v1095_v36, %s3399_s6 }
0x1401   :  { %3056 = vset.pattern.permute.xlu0 %v3401_v35 }
0x1472   :  { %v1098_v52 = vpop.permute.xlu0 %1097 }
0x1473   :  { %v1100_v55 = vadd.f32 %v1098_v52, %v1071_v1 }
0x1475   :  { %3113 = vtanh.f32 %v1100_v55 }
0x147b   :  { %v3114_v60 = vpop.eup %3113 }
0x147c   :  { %1104 = vrot.lane.b32.xlu0 %v3114_v60, %s3400_s30  ;;  %v852_v60 = vld [vmem:[#allocation2] sm:$0x1] }
0x14ee   :  { %v1105_v13 = vpop.permute.xlu0 %1104 }
0x14ef   :  { %v1107_v12 = vmul.f32 %v1105_v13, %v1102_v61  ;;  %v1170_v61 = vsub.f32 1.0, %v852_v60 }
0x14f1   :  { %v3939_v63 = vadd.f32 %v1108_v39, %v1107_v12  ;;  %v1172_v13 = vperm.slane %v1170_v61, 0  ;;  %v846_v12 = vld [vmem:[%s4580_s7] sm:$0x3] }
0x14f3   :  { %1114 = vrot.lane.b32.xlu0 %v3939_v63, %s3400_s30 }
0x1565   :  { %v3943_v0 = vpop.permute.xlu0 %1114 }
0x1566   :  { %2961 = vmatmul.msk.f32.vlgmr.msrb.gmra.mxu0 %vm174_vm1, %v3943_v0  ;;  %2964 = vmatmul.msk.f32.vlgmr.msra.gmra.mxu2 %vm174_vm1, %v3943_v0 }
0x1567   :  { %1365 = vmatpush.msrb.mxu0 %v3898_v54  ;;  %1488 = vmatpush.msra.mxu2 %v3717_v28 }
0x1569   :  { %1366 = vmatpush.msrb.mxu0 %v3905_v56  ;;  %1489 = vmatpush.msra.mxu2 %v3719_v29 }
0x156b   :  { %1367 = vmatpush.msrb.mxu0 %v3908_v57 }
0x156d   :  { %1368 = vmatpush.msrb.mxu0 %v3911_v58 }
0x15e3   :  { %v1135_v43 = vpop.f32.mrf.mxu0 }
0x15e4   :  { %v1136_v1 = vadd.f32 %v3958_v62, %v1135_v43 }
0x15e6   :  { %v1138_v2 = vsel %vm800_vm4, %v1136_v1, -inf }
0x15e7   :  { %1139 = vmax.xlane.f32.xlu2 %v1138_v2 }
0x165a   :  { %v1140_v14 = vpop.xlane.xlu2 %1139 }
0x165b   :  { %v1141_v15 = vsub.f32 %v1136_v1, %v1140_v14 }
0x165d   :  { %v1142_v20 = vmul.f32 1.442695, %v1141_v15 }
0x165f   :  { %3115 = vpow2.f32 %v1142_v20 }
0x1665   :  { %v3116_v21 = vpop.eup %3115 }
0x1666   :  { %v1144_v22 = vsel %vm800_vm4, %v3116_v21, 0.0 }
0x1667   :  { %1145 = vadd.xlane.f32.xlu1 %v1144_v22  ;;  %v1224_v22 = vpop.f32.mrf.mxu2 }
0x1680   :  { %1166 = vperm.xlu1 %3054, %v3062_v10  }
0x16da   :  { %v1146_v23 = vpop.xlane.xlu1 %1145 }
0x16db   :  { %3117 = vlog2.f32 %v1146_v23 }
0x16e1   :  { %v3118_v4 = vpop.eup %3117 }
0x16e2   :  { %v1148_v24 = vmul.f32 0.6931472, %v3118_v4 }
0x16e4   :  { %v1149_v5 = vadd.f32 %v1148_v24, %v1140_v14 }
0x16e6   :  { %v1150_v25 = vsub.f32 %v1136_v1, %v1149_v5 }
0x16e8   :  { %v1152_v6 = vsel %vm800_vm4, %v1150_v25, -inf  ;;  %1151 = vst [vmem:[#allocation11] sm:$0x3] %v1150_v25 }
0x16e9   :  { %1153 = vmax.xlane.f32.xlu0 %v1152_v6 }
0x16f2   :  { %v3969_v43 = vpop.permute.xlu1 %1166 }
0x16f3   :  { %v1169_v1 = vmul.f32 %v3969_v43, %v846_v12 }
0x175c   :  { %v1154_v36 = vpop.xlane.xlu0 %1153 }
0x175d   :  { %vm1155_vm2 = vcmp.ge.f32.partialorder %v1150_v25, %v1154_v36 }
0x175e   :  { %v1156_v52 = vsel %vm1155_vm2, %v3723_v32, 128.0 }
0x175f   :  { %v1157_v55 = vsel %vm800_vm4, %v1156_v52, inf }
0x1760   :  { %1158 = vmin.xlane.f32.xlu2 %v1157_v55 }
0x1778   :  { %1174 = vperm.xlu2 %3055, %v1172_v13  }
0x17d3   :  { %v1159_v39 = vpop.xlane.xlu2 %1158 }
0x17d4   :  { %vm1160_vm3 = vcmp.eq.f32.partialorder %v3723_v32, %v1159_v39 }
0x17d5   :  { %v2962_v2 = vsel %vm1160_vm3, 1.0, %v3397_v11 }
0x17db   :  { %v3974_v14 = vpop.permute.xlu2 %1174 }
0x17dc   :  { %v1177_v15 = vmul.f32 %v2962_v2, %v3974_v14 }
0x17de   :  { %v3977_v20 = vadd.f32 %v1177_v15, %v1169_v1 }
0x17e0   :  { %2963 = vmatmul.msk.f32.vlgmr.msra.gmra.mxu1 %vm135_vm0, %v3977_v20  ;;  %vm1181_vm12 = vcmp.gt.f32.partialorder %v3977_v20, 0.5  ;;  %v3402_v20 = vmov 1  }
0x17e1   :  { %1429 = vmatpush.msra.mxu1 %v3882_v31 }
0x17e3   :  { %1430 = vmatpush.msra.mxu1 %v3886_v33 }
0x17e5   :  { %1431 = vmatpush.msra.mxu1 %v3890_v34 }
0x17e7   :  { %1432 = vmatpush.msra.mxu1 %v3895_v53 }
0x185d   :  { %v1204_v21 = vpop.f32.mrf.mxu1 }
0x185e   :  { %2965 = vmatmul.msk.f32.vlgmr.msra.gmra.mxu3 %vm174_vm1, %v1204_v21  ;;  %2969 = vmatmul.msk.f32.vlgmr.msrb.gmra.mxu2 %vm174_vm1, %v1204_v21 }
0x185f   :  { %1506 = vmatpush.msra.mxu3 %v3743_v41  ;;  %1587 = vmatpush.msrb.mxu2 %v3860_v16 }
0x1861   :  { %1507 = vmatpush.msra.mxu3 %v3754_v44  ;;  %1588 = vmatpush.msrb.mxu2 %v3865_v26 }
0x1863   :  { %1508 = vmatpush.msra.mxu3 %v3760_v45  ;;  %1589 = vmatpush.msrb.mxu2 %v3872_v27 }
0x1865   :  { %1509 = vmatpush.msra.mxu3 %v3774_v48  ;;  %1590 = vmatpush.msrb.mxu2 %v3879_v30 }
0x1866   :  { %2970 = vmatmul.msk.f32.vlgmr.msrb.gmra.mxu3 %vm174_vm1, %v3943_v0 }
0x1867   :  { %1607 = vmatpush.msrb.mxu3 %v3812_v3 }
0x1869   :  { %1608 = vmatpush.msrb.mxu3 %v3817_v7 }
0x186b   :  { %1609 = vmatpush.msrb.mxu3 %v3823_v8 }
0x186d   :  { %1610 = vmatpush.msrb.mxu3 %v3829_v9 }
0x18e1   :  { %v1247_v23 = vpop.f32.mrf.mxu3  ;;  %v1325_v61 = vpop.f32.mrf.mxu2 }
0x18e2   :  { %v1248_v4 = vadd.f32 %v1247_v23, %v1224_v22 }
0x18e4   :  { %v1250_v24 = vadd.f32 %v3852_v19, %v1248_v4 }
0x18e6   :  { %v1251_v5 = vsel %vm933_vm10, %v1250_v24, -inf }
0x18e7   :  { %1252 = vmax.xlane.f32.xlu1 %v1251_v5 }
0x18e9   :  { %v1347_v2 = vpop.f32.mrf.mxu3 }
0x195a   :  { %v1253_v25 = vpop.xlane.xlu1 %1252 }
0x195b   :  { %v1254_v6 = vsub.f32 %v1250_v24, %v1253_v25 }
0x195d   :  { %v1255_v10 = vmul.f32 1.442695, %v1254_v6 }
0x195f   :  { %3119 = vpow2.f32 %v1255_v10 }
0x1965   :  { %v3120_v0 = vpop.eup %3119 }
0x1966   :  { %v1257_v35 = vsel %vm933_vm10, %v3120_v0, 0.0 }
0x1967   :  { %1258 = vadd.xlane.f32.xlu2 %v1257_v35 }
0x19da   :  { %v1259_v36 = vpop.xlane.xlu2 %1258 }
0x19db   :  { %3121 = vrcp.f32 %v1259_v36 }
0x19e1   :  { %v3122_v52 = vpop.eup %3121 }
0x19e2   :  { %v1261_v55 = vmul.f32 %v3122_v52, %v3120_v0 }
0x19e4   :  { %2967 = vmatmul.msk.f32.vlgmr.msra.gmra.mxu0 %vm951_vm11, %v1261_v55 }
0x19e5   :  { %1529 = vmatpush.msra.mxu0 %v3732_v37 }
0x19e7   :  { %1530 = vmatpush.msra.mxu0 %v3737_v40 }
0x19e9   :  { %1531 = vmatpush.msra.mxu0 %v3748_v42 }
0x19eb   :  { %1532 = vmatpush.msra.mxu0 %v3765_v46 }
0x1a61   :  { %v1282_v60 = vpop.f32.mrf.mxu0 }
0x1a62   :  { %2968 = vmatmul.msk.f32.vlgmr.msrb.gmra.mxu1 %vm174_vm1, %v1282_v60 }
0x1a63   :  { %2978 = vmatpush.msk.msrb.mxu1 %vm800_vm4, %v3841_v17 }
0x1a65   :  { %1567 = vmatpush.msrb.mxu1 %v3844_v18 }
0x1adf   :  { %v1305_v13 = vpop.f32.mrf.mxu1 }
0x1ae0   :  { %v1326_v39 = vadd.f32 %v1325_v61, %v1305_v13 }
0x1ae2   :  { %v1328_v12 = vadd.f32 %v3921_v59, %v1326_v39 }
0x1ae4   :  { %v1329_v1 = vmax.f32 %v1328_v12, 0.0 }
0x1ae6   :  { %2971 = vmatmul.msk.f32.vlgmr.msrb.gmra.mxu0 %vm174_vm1, %v1329_v1 }
0x1ae7   :  { %1629 = vmatpush.msrb.mxu0 %v3769_v47 }
0x1ae9   :  { %1630 = vmatpush.msrb.mxu0 %v3778_v49 }
0x1aeb   :  { %1631 = vmatpush.msrb.mxu0 %v3782_v50 }
0x1aed   :  { %1632 = vmatpush.msrb.mxu0 %v3785_v51 }
0x1b63   :  { %v1370_v15 = vpop.f32.mrf.mxu0 }
0x1b64   :  { %v1371_v21 = vadd.f32 %v1370_v15, %v1347_v2 }
0x1b66   :  { %v1373_v22 = vadd.f32 %v3932_v38, %v1371_v21 }
0x1b68   :  { %1394 = vrot.lane.b32.xlu0 %v1373_v22, %s3398_s29  ;;  %v2972_v23 = vmul.f32 -1.442695, %v1373_v22 }
0x1b6a   :  { %3123 = vpow2.f32 %v2972_v23 }
0x1b70   :  { %v3124_v4 = vpop.eup %3123 }
0x1b71   :  { %v1377_v24 = vadd.f32 1.0, %v3124_v4 }
0x1b73   :  { %3125 = vrcp.f32 %v1377_v24  ;;  %v1389_v35 = vand.u32 2147483648, %v1377_v24  ;;  %vm1383_vm6 = vweird.f32 %v1377_v24  ;;  %v1387_v36 = vand.u32 2147483647, %v1377_v24 }
0x1b75   :  { %v1390_v55 = vor.u32 1.1754944e-38, %v1389_v35  ;;  %vm1388_vm8 = vcmp.eq.f32.partialorder %v1387_v36, 8.507059e+37 }
0x1b79   :  { %v3126_v5 = vpop.eup %3125 }
0x1b7a   :  { %v1379_v25 = vmul.f32 %v3126_v5, %v1377_v24  ;;  %vm1384_vm5 = vweird.f32 %v3126_v5 }
0x1b7b   :  { %vm1385_vm7 = vmor %vm1383_vm6, %vm1384_vm5 }
0x1b7c   :  { %v1380_v6 = vsub.f32 1.0, %v1379_v25 }
0x1b7e   :  { %v1381_v10 = vmul.f32 %v3126_v5, %v1380_v6 }
0x1b80   :  { %v1382_v0 = vadd.f32 %v3126_v5, %v1381_v10 }
0x1b82   :  { %v1386_v52 = vsel %vm1385_vm7, %v3126_v5, %v1382_v0 }
0x1b83   :  { %v1391_v61 = vsel %vm1388_vm8, %v1390_v55, %v1386_v52 }
0x1b84   :  { %v1404_v2 = vsub.f32 1.0, %v1391_v61  ;;  %v1410_v21 = vmul.f32 %v1391_v61, %v3939_v63 }
0x1bda   :  { %v1395_v60 = vpop.permute.xlu0 %1394 }
0x1bdb   :  { %v1397_v13 = vmul.f32 %v1395_v60, %v1391_v61 }
0x1bdd   :  { %1399 = vrot.lane.b32.xlu0 %v1397_v13, %s3399_s6 }
0x1c4f   :  { %v1400_v39 = vpop.permute.xlu0 %1399 }
0x1c50   :  { %v1402_v12 = vadd.f32 %v1400_v39, %v1373_v22 }
0x1c52   :  { %3127 = vtanh.f32 %v1402_v12 }
0x1c58   :  { %v3128_v1 = vpop.eup %3127 }
0x1c59   :  { %1406 = vrot.lane.b32.xlu1 %v3128_v1, %s3400_s30 }
0x1ccb   :  { %v1407_v15 = vpop.permute.xlu1 %1406 }
0x1ccc   :  { %v1409_v23 = vmul.f32 %v1407_v15, %v1404_v2  ;;  %v847_v2 = vld [vmem:[%s4580_s7 + $0x2] sm:$0x3] }
0x1cce   :  { %v4024_v4 = vadd.f32 %v1410_v21, %v1409_v23  ;;  %v1463_v23 = vmul.f32 %v3969_v43, %v847_v2 }
0x1cd0   :  { %1413 = vrot.lane.b32.xlu0 %v4024_v4, %s3400_s30 }
0x1d42   :  { %v4028_v24 = vpop.permute.xlu0 %1413 }
0x1d43   :  { %2973 = vmatmul.msk.f32.vlgmr.msra.gmra.mxu1 %vm174_vm1, %v4028_v24  ;;  %2976 = vmatmul.msk.f32.vlgmr.msra.gmra.mxu3 %vm174_vm1, %v4028_v24 }
0x1d44   :  { %1652 = vmatpush.msra.mxu1 %v3898_v54  ;;  %1775 = vmatpush.msra.mxu3 %v3717_v28 }
0x1d46   :  { %1653 = vmatpush.msra.mxu1 %v3905_v56  ;;  %1776 = vmatpush.msra.mxu3 %v3719_v29 }
0x1d48   :  { %1654 = vmatpush.msra.mxu1 %v3908_v57 }
0x1d4a   :  { %1655 = vmatpush.msra.mxu1 %v3911_v58 }
0x1dc0   :  { %v1434_v63 = vpop.f32.mrf.mxu1 }
0x1dc1   :  { %v1435_v22 = vadd.f32 %v3958_v62, %v1434_v63 }
0x1dc3   :  { %v1437_v5 = vsel %vm800_vm4, %v1435_v22, -inf }
0x1dc4   :  { %1438 = vmax.xlane.f32.xlu2 %v1437_v5 }
0x1e37   :  { %v1439_v25 = vpop.xlane.xlu2 %1438 }
0x1e38   :  { %v1440_v6 = vsub.f32 %v1435_v22, %v1439_v25 }
0x1e3a   :  { %v1441_v10 = vmul.f32 1.442695, %v1440_v6 }
0x1e3c   :  { %3129 = vpow2.f32 %v1441_v10 }
0x1e42   :  { %v3130_v0 = vpop.eup %3129 }
0x1e43   :  { %v1443_v35 = vsel %vm800_vm4, %v3130_v0, 0.0 }
0x1e44   :  { %1444 = vadd.xlane.f32.xlu0 %v1443_v35 }
0x1eb7   :  { %v1445_v36 = vpop.xlane.xlu0 %1444 }
0x1eb8   :  { %3131 = vlog2.f32 %v1445_v36 }
0x1ebe   :  { %v3132_v52 = vpop.eup %3131 }
0x1ebf   :  { %v1447_v55 = vmul.f32 0.6931472, %v3132_v52 }
0x1ec1   :  { %v1448_v60 = vadd.f32 %v1447_v55, %v1439_v25 }
0x1ec3   :  { %v1449_v61 = vsub.f32 %v1435_v22, %v1448_v60  ;;  %v1183_v22 = vsel %vm1181_vm12, 1.0, %v3397_v11 }
0x1ec4   :  { %vm1466_vm14 = vcmp.lt.f32.partialorder %v1183_v22, 0.5 }
0x1ec5   :  { %v1452_v13 = vsel %vm800_vm4, %v1449_v61, -inf  ;;  %1451 = vst [vmem:[#allocation11 + $0x2] sm:$0x3] %v1449_v61  ;;  %v1467_v6 = vsel %vm1466_vm14, 2, %v3402_v20 }
0x1ec6   :  { %1453 = vmax.xlane.f32.xlu2 %v1452_v13 }
0x1f39   :  { %v1454_v39 = vpop.xlane.xlu2 %1453 }
0x1f3a   :  { %vm1455_vm9 = vcmp.ge.f32.partialorder %v1449_v61, %v1454_v39 }
0x1f3b   :  { %v1456_v12 = vsel %vm1455_vm9, %v3723_v32, 128.0 }
0x1f3c   :  { %v1457_v1 = vsel %vm800_vm4, %v1456_v12, inf }
0x1f3d   :  { %1458 = vmin.xlane.f32.xlu2 %v1457_v1 }
0x1fb0   :  { %v1459_v15 = vpop.xlane.xlu2 %1458 }
0x1fb1   :  { %vm1460_vm13 = vcmp.eq.f32.partialorder %v3723_v32, %v1459_v15 }
0x1fb2   :  { %v2974_v21 = vsel %vm1460_vm13, 1.0, %v3397_v11 }
0x1fb3   :  { %v1464_v63 = vmul.f32 %v2974_v21, %v3974_v14 }
0x1fb5   :  { %v1465_v5 = vadd.f32 %v1464_v63, %v1463_v23 }
0x1fb7   :  { %vm1468_vm15 = vcmp.gt.f32.partialorder %v1465_v5, 0.5  ;;  %2975 = vmatmul.msk.f32.vlgmr.msra.gmra.mxu2 %vm135_vm0, %v1465_v5 }
0x1fb8   :  { %vm1469_vm2 = vmand %vm1466_vm14, %vm1468_vm15  ;;  %1716 = vmatpush.msra.mxu2 %v3882_v31 }
0x1fb9   :  { %v4057_v25 = vsel %vm1469_vm2, 1.0, %v1183_v22 }
0x1fba   :  { %1717 = vmatpush.msra.mxu2 %v3886_v33  ;;  %vm1753_vm3 = vcmp.lt.f32.partialorder %v4057_v25, 0.5 }
0x1fbb   :  { %v4063_v10 = vsel %vm1753_vm3, 3, %v1467_v6 }
0x1fbc   :  { %1718 = vmatpush.msra.mxu2 %v3890_v34 }
0x1fbe   :  { %1719 = vmatpush.msra.mxu2 %v3895_v53 }
0x203a   :  { %v1491_v0 = vpop.f32.mrf.mxu2 }
0x203b   :  { %2977 = vmatmul.msk.f32.vlgmr.msra.gmra.mxu0 %vm174_vm1, %v1491_v0  ;;  %2981 = vmatmul.msk.f32.vlgmr.msrb.gmra.mxu3 %vm174_vm1, %v1491_v0 }
0x203c   :  { %1793 = vmatpush.msra.mxu0 %v3743_v41  ;;  %1874 = vmatpush.msrb.mxu3 %v3860_v16  ;;  %v1511_v41 = vpop.f32.mrf.mxu3 }
0x203e   :  { %1794 = vmatpush.msra.mxu0 %v3754_v44  ;;  %1875 = vmatpush.msrb.mxu3 %v3865_v26 }
0x2040   :  { %1795 = vmatpush.msra.mxu0 %v3760_v45  ;;  %1876 = vmatpush.msrb.mxu3 %v3872_v27 }
0x2042   :  { %1796 = vmatpush.msra.mxu0 %v3774_v48  ;;  %1877 = vmatpush.msrb.mxu3 %v3879_v30 }
0x2043   :  { %2982 = vmatmul.msk.f32.vlgmr.msrb.gmra.mxu0 %vm174_vm1, %v4028_v24 }
0x2044   :  { %1894 = vmatpush.msrb.mxu0 %v3812_v3 }
0x2046   :  { %1895 = vmatpush.msrb.mxu0 %v3817_v7 }
0x2048   :  { %1896 = vmatpush.msrb.mxu0 %v3823_v8 }
0x204a   :  { %1897 = vmatpush.msrb.mxu0 %v3829_v9 }
0x20b8   :  { %v1534_v44 = vpop.f32.mrf.mxu0 }
0x20b9   :  { %v1535_v45 = vadd.f32 %v1534_v44, %v1511_v41 }
0x20bb   :  { %v1537_v35 = vadd.f32 %v3852_v19, %v1535_v45 }
0x20bd   :  { %v1538_v48 = vsel %vm933_vm10, %v1537_v35, -inf }
0x20be   :  { %1539 = vmax.xlane.f32.xlu1 %v1538_v48  ;;  %v1612_v1 = vpop.f32.mrf.mxu3 }
0x2131   :  { %v1540_v36 = vpop.xlane.xlu1 %1539 }
0x2132   :  { %v1541_v52 = vsub.f32 %v1537_v35, %v1540_v36 }
0x2134   :  { %v1542_v55 = vmul.f32 1.442695, %v1541_v52 }
0x2136   :  { %3133 = vpow2.f32 %v1542_v55 }
0x213c   :  { %v3134_v24 = vpop.eup %3133 }
0x213d   :  { %v1544_v60 = vsel %vm933_vm10, %v3134_v24, 0.0 }
0x213e   :  { %1545 = vadd.xlane.f32.xlu2 %v1544_v60 }
0x21b1   :  { %v1546_v61 = vpop.xlane.xlu2 %1545 }
0x21b2   :  { %3135 = vrcp.f32 %v1546_v61 }
0x21b8   :  { %v3136_v13 = vpop.eup %3135 }
0x21b9   :  { %v1548_v39 = vmul.f32 %v3136_v13, %v3134_v24 }
0x21bb   :  { %2979 = vmatmul.msk.f32.vlgmr.msrb.gmra.mxu1 %vm951_vm11, %v1548_v39 }
0x21bc   :  { %1816 = vmatpush.msrb.mxu1 %v3732_v37 }
0x21be   :  { %1817 = vmatpush.msrb.mxu1 %v3737_v40  ;;  %v1634_v40 = vpop.f32.mrf.mxu0 }
0x21c0   :  { %1818 = vmatpush.msrb.mxu1 %v3748_v42 }
0x21c2   :  { %1819 = vmatpush.msrb.mxu1 %v3765_v46 }
0x2238   :  { %v1569_v12 = vpop.f32.mrf.mxu1 }
0x2239   :  { %2980 = vmatmul.msk.f32.vlgmr.msrb.gmra.mxu2 %vm174_vm1, %v1569_v12 }
0x223a   :  { %2990 = vmatpush.msk.msrb.mxu2 %vm800_vm4, %v3841_v17 }
0x223c   :  { %1854 = vmatpush.msrb.mxu2 %v3844_v18 }
0x22bc   :  { %v1592_v2 = vpop.f32.mrf.mxu2 }
0x22bd   :  { %v1613_v15 = vadd.f32 %v1612_v1, %v1592_v2 }
0x22bf   :  { %v1615_v21 = vadd.f32 %v3921_v59, %v1613_v15 }
0x22c1   :  { %v1616_v37 = vmax.f32 %v1615_v21, 0.0 }
0x22c3   :  { %2983 = vmatmul.msk.f32.vlgmr.msra.gmra.mxu1 %vm174_vm1, %v1616_v37 }
0x22c4   :  { %1916 = vmatpush.msra.mxu1 %v3769_v47 }
0x22c6   :  { %1917 = vmatpush.msra.mxu1 %v3778_v49 }
0x22c8   :  { %1918 = vmatpush.msra.mxu1 %v3782_v50 }
0x22ca   :  { %1919 = vmatpush.msra.mxu1 %v3785_v51 }
0x2340   :  { %v1657_v42 = vpop.f32.mrf.mxu1 }
0x2341   :  { %v1658_v46 = vadd.f32 %v1657_v42, %v1634_v40 }
0x2343   :  { %v1660_v23 = vadd.f32 %v3932_v38, %v1658_v46 }
0x2345   :  { %1681 = vrot.lane.b32.xlu2 %v1660_v23, %s3398_s29  ;;  %v2984_v63 = vmul.f32 -1.442695, %v1660_v23 }
0x2347   :  { %3137 = vpow2.f32 %v2984_v63 }
0x234d   :  { %v3138_v22 = vpop.eup %3137 }
0x234e   :  { %v1664_v5 = vadd.f32 1.0, %v3138_v22 }
0x2350   :  { %3139 = vrcp.f32 %v1664_v5  ;;  %v1676_v50 = vand.u32 2147483648, %v1664_v5  ;;  %vm1670_vm6 = vweird.f32 %v1664_v5  ;;  %v1674_v51 = vand.u32 2147483647, %v1664_v5 }
0x2352   :  { %v1677_v44 = vor.u32 1.1754944e-38, %v1676_v50  ;;  %vm1675_vm8 = vcmp.eq.f32.partialorder %v1674_v51, 8.507059e+37 }
0x2356   :  { %v3140_v20 = vpop.eup %3139 }
0x2357   :  { %v1666_v47 = vmul.f32 %v3140_v20, %v1664_v5  ;;  %vm1671_vm5 = vweird.f32 %v3140_v20 }
0x2358   :  { %vm1672_vm7 = vmor %vm1670_vm6, %vm1671_vm5 }
0x2359   :  { %v1667_v6 = vsub.f32 1.0, %v1666_v47 }
0x235b   :  { %v1668_v49 = vmul.f32 %v3140_v20, %v1667_v6  ;;  %v848_v6 = vld [vmem:[%s4580_s7 + $0x4] sm:$0x3] }
0x235c   :  { %v1750_v50 = vmul.f32 %v3969_v43, %v848_v6 }
0x235d   :  { %v1669_v0 = vadd.f32 %v3140_v20, %v1668_v49 }
0x235f   :  { %v1673_v41 = vsel %vm1672_vm7, %v3140_v20, %v1669_v0 }
0x2360   :  { %v1678_v35 = vsel %vm1675_vm8, %v1677_v44, %v1673_v41 }
0x2361   :  { %v1691_v24 = vsub.f32 1.0, %v1678_v35  ;;  %v1697_v61 = vmul.f32 %v1678_v35, %v4024_v4 }
0x239f   :  { %v1682_v45 = vpop.permute.xlu2 %1681 }
0x23a0   :  { %v1684_v48 = vmul.f32 %v1682_v45, %v1678_v35 }
0x23a2   :  { %1686 = vrot.lane.b32.xlu0 %v1684_v48, %s3399_s6 }
0x2414   :  { %v1687_v36 = vpop.permute.xlu0 %1686 }
0x2415   :  { %v1689_v52 = vadd.f32 %v1687_v36, %v1660_v23 }
0x2417   :  { %3141 = vtanh.f32 %v1689_v52 }
0x241d   :  { %v3142_v55 = vpop.eup %3141 }
0x241e   :  { %1693 = vrot.lane.b32.xlu2 %v3142_v55, %s3400_s30  ;;  %v4200_v55 = vld [vmem:[%s4554_s8 + $0x10] sm:$0xff] }
0x2478   :  { %v1694_v60 = vpop.permute.xlu2 %1693 }
0x2479   :  { %v1696_v13 = vmul.f32 %v1694_v60, %v1691_v24  ;;  %v4206_v24 = vld [vmem:[%s4554_s8 + $0x8] sm:$0xff]  ;;  %v4212_v60 = vld [vmem:[%s4554_s8] sm:$0xff] }
0x247b   :  { %v4106_v39 = vadd.f32 %v1697_v61, %v1696_v13 }
0x247d   :  { %1700 = vrot.lane.b32.xlu1 %v4106_v39, %s3400_s30 }
0x24ef   :  { %v4110_v12 = vpop.permute.xlu1 %1700 }
0x24f0   :  { %2985 = vmatmul.msk.f32.vlgmr.msra.gmra.mxu2 %vm174_vm1, %v4110_v12  ;;  %2988 = vmatmul.msk.f32.vlgmr.msra.gmra.mxu0 %vm174_vm1, %v4110_v12 }
0x24f1   :  { %1939 = vmatpush.msra.mxu2 %v3898_v54  ;;  %2062 = vmatpush.msra.mxu0 %v3717_v28 }
0x24f3   :  { %1940 = vmatpush.msra.mxu2 %v3905_v56  ;;  %2063 = vmatpush.msra.mxu0 %v3719_v29 }
0x24f5   :  { %1941 = vmatpush.msra.mxu2 %v3908_v57 }
0x24f7   :  { %1942 = vmatpush.msra.mxu2 %v3911_v58 }
0x2573   :  { %v1721_v4 = vpop.f32.mrf.mxu2 }
0x2574   :  { %v1722_v1 = vadd.f32 %v3958_v62, %v1721_v4 }
0x2576   :  { %v1724_v2 = vsel %vm800_vm4, %v1722_v1, -inf }
0x2577   :  { %1725 = vmax.xlane.f32.xlu2 %v1724_v2 }
0x25ea   :  { %v1726_v15 = vpop.xlane.xlu2 %1725 }
0x25eb   :  { %v1727_v21 = vsub.f32 %v1722_v1, %v1726_v15 }
0x25ed   :  { %v1728_v37 = vmul.f32 1.442695, %v1727_v21  ;;  %v4224_v21 = vld [vmem:[#allocation8 + $0x10] sm:$0xff] }
0x25ef   :  { %3143 = vpow2.f32 %v1728_v37  ;;  %v4227_v37 = vld [vmem:[#allocation8 + $0x8] sm:$0xff] }
0x25f5   :  { %v3144_v40 = vpop.eup %3143 }
0x25f6   :  { %v1730_v28 = vsel %vm800_vm4, %v3144_v40, 0.0  ;;  %v4230_v40 = vld [vmem:[#allocation8] sm:$0xff] }
0x25f7   :  { %1731 = vadd.xlane.f32.xlu0 %v1730_v28 }
0x266a   :  { %v1732_v42 = vpop.xlane.xlu0 %1731 }
0x266b   :  { %3145 = vlog2.f32 %v1732_v42 }
0x2671   :  { %v3146_v29 = vpop.eup %3145 }
0x2672   :  { %v1734_v46 = vmul.f32 0.6931472, %v3146_v29 }
0x2674   :  { %v1735_v23 = vadd.f32 %v1734_v46, %v1726_v15  ;;  %v4221_v15 = vld [vmem:[#allocation8 + $0x18] sm:$0xff] }
0x2676   :  { %v1736_v63 = vsub.f32 %v1722_v1, %v1735_v23 }
0x2678   :  { %v1739_v22 = vsel %vm800_vm4, %v1736_v63, -inf  ;;  %1738 = vst [vmem:[#allocation11 + $0x4] sm:$0x3] %v1736_v63 }
0x2679   :  { %1740 = vmax.xlane.f32.xlu1 %v1739_v22 }
0x26ec   :  { %v1741_v5 = vpop.xlane.xlu1 %1740 }
0x26ed   :  { %vm1742_vm9 = vcmp.ge.f32.partialorder %v1736_v63, %v1741_v5 }
0x26ee   :  { %v1743_v20 = vsel %vm1742_vm9, %v3723_v32, 128.0 }
0x26ef   :  { %v1744_v47 = vsel %vm800_vm4, %v1743_v20, inf }
0x26f0   :  { %1745 = vmin.xlane.f32.xlu2 %v1744_v47 }
0x2763   :  { %v1746_v49 = vpop.xlane.xlu2 %1745 }
0x2764   :  { %vm1747_vm12 = vcmp.eq.f32.partialorder %v3723_v32, %v1746_v49 }
0x2765   :  { %v2986_v0 = vsel %vm1747_vm12, 1.0, %v3397_v11 }
0x2766   :  { %v1751_v51 = vmul.f32 %v2986_v0, %v3974_v14 }
0x2768   :  { %v1752_v41 = vadd.f32 %v1751_v51, %v1750_v50 }
0x276a   :  { %vm1755_vm13 = vcmp.gt.f32.partialorder %v1752_v41, 0.5  ;;  %2987 = vmatmul.msk.f32.vlgmr.msra.gmra.mxu3 %vm135_vm0, %v1752_v41 }
0x276b   :  { %vm1756_vm14 = vmand %vm1753_vm3, %vm1755_vm13  ;;  %2003 = vmatpush.msra.mxu3 %v3882_v31  ;;  %v4156_v31 = vld [vmem:[%s4555_s9 + $0x18] sm:$0xff] }
0x276c   :  { %v4140_v44 = vsel %vm1756_vm14, 1.0, %v4057_v25 }
0x276d   :  { %2004 = vmatpush.msra.mxu3 %v3886_v33  ;;  %vm2040_vm15 = vcmp.lt.f32.partialorder %v4140_v44, 0.5  ;;  %v4163_v33 = vld [vmem:[%s4555_s9 + $0x10] sm:$0xff] }
0x276e   :  { %v4147_v45 = vsel %vm2040_vm15, 4, %v4063_v10 }
0x276f   :  { %2005 = vmatpush.msra.mxu3 %v3890_v34  ;;  %v4170_v34 = vld [vmem:[%s4555_s9 + $0x8] sm:$0xff] }
0x2771   :  { %2006 = vmatpush.msra.mxu3 %v3895_v53 }
0x27ed   :  { %v1778_v35 = vpop.f32.mrf.mxu3 }
0x27ee   :  { %2989 = vmatmul.msk.f32.vlgmr.msrb.gmra.mxu1 %vm174_vm1, %v1778_v35  ;;  %2993 = vmatmul.msk.f32.vlgmr.msrb.gmra.mxu0 %vm174_vm1, %v1778_v35 }
0x27ef   :  { %2080 = vmatpush.msrb.mxu1 %v4156_v31  ;;  %2161 = vmatpush.msrb.mxu0 %v3860_v16  ;;  %v4177_v16 = vld [vmem:[%s4555_s9] sm:$0xff]  ;;  %s2897_s9 = sshll.u32 %s4565_s19, 4  ;;  %s2898_s9 = int_to_ptr.hbm [resolvable:$true] %s2897_s9 }
0x27f1   :  { %2081 = vmatpush.msrb.mxu1 %v4163_v33  ;;  %2162 = vmatpush.msrb.mxu0 %v3865_v26  ;;  %v1798_v26 = vpop.f32.mrf.mxu0 }
0x27f3   :  { %2082 = vmatpush.msrb.mxu1 %v4170_v34  ;;  %2163 = vmatpush.msrb.mxu0 %v3872_v27 }
0x27f5   :  { %2083 = vmatpush.msrb.mxu1 %v4177_v16  ;;  %2164 = vmatpush.msrb.mxu0 %v3879_v30 }
0x27f6   :  { %2994 = vmatmul.msk.f32.vlgmr.msra.gmra.mxu1 %vm174_vm1, %v4110_v12 }
0x27f7   :  { %2181 = vmatpush.msra.mxu1 %v3812_v3 }
0x27f9   :  { %2182 = vmatpush.msra.mxu1 %v3817_v7 }
0x27fb   :  { %2183 = vmatpush.msra.mxu1 %v3823_v8 }
0x27fd   :  { %2184 = vmatpush.msra.mxu1 %v3829_v9 }
0x286b   :  { %v1821_v27 = vpop.f32.mrf.mxu1  ;;  %v1899_v13 = vpop.f32.mrf.mxu0 }
0x286c   :  { %v1822_v53 = vadd.f32 %v1821_v27, %v1798_v26 }
0x286e   :  { %v1824_v25 = vadd.f32 %v3852_v19, %v1822_v53  ;;  %v4194_v19 = vld [vmem:[%s4554_s8 + $0x18] sm:$0xff] }
0x2870   :  { %v1825_v10 = vsel %vm933_vm10, %v1824_v25, -inf }
0x2871   :  { %1826 = vmax.xlane.f32.xlu0 %v1825_v10 }
0x28e4   :  { %v1827_v30 = vpop.xlane.xlu0 %1826 }
0x28e5   :  { %v1828_v48 = vsub.f32 %v1824_v25, %v1827_v30 }
0x28e7   :  { %v1829_v36 = vmul.f32 1.442695, %v1828_v48 }
0x28e9   :  { %3147 = vpow2.f32 %v1829_v36 }
0x28ef   :  { %v3148_v52 = vpop.eup %3147 }
0x28f0   :  { %v1831_v3 = vsel %vm933_vm10, %v3148_v52, 0.0 }
0x28f1   :  { %1832 = vadd.xlane.f32.xlu2 %v1831_v3  ;;  %v4249_v3 = vld [vmem:[#allocation3 + $0x8] sm:$0xff] }
0x2964   :  { %v1833_v7 = vpop.xlane.xlu2 %1832 }
0x2965   :  { %3149 = vrcp.f32 %v1833_v7 }
0x296b   :  { %v3150_v8 = vpop.eup %3149 }
0x296c   :  { %v1835_v9 = vmul.f32 %v3150_v8, %v3148_v52 }
0x296e   :  { %2991 = vmatmul.msk.f32.vlgmr.msrb.gmra.mxu2 %vm951_vm11, %v1835_v9 }
0x296f   :  { %2103 = vmatpush.msrb.mxu2 %v4194_v19 }
0x2971   :  { %2104 = vmatpush.msrb.mxu2 %v4200_v55 }
0x2973   :  { %2105 = vmatpush.msrb.mxu2 %v4206_v24 }
0x2975   :  { %2106 = vmatpush.msrb.mxu2 %v4212_v60 }
0x29f1   :  { %v1856_v61 = vpop.f32.mrf.mxu2 }
0x29f2   :  { %2992 = vmatmul.msk.f32.vlgmr.msrb.gmra.mxu3 %vm174_vm1, %v1856_v61 }
0x29f3   :  { %3002 = vmatpush.msk.msrb.mxu3 %vm800_vm4, %v3841_v17 }
0x29f5   :  { %2141 = vmatpush.msrb.mxu3 %v3844_v18 }
0x2a75   :  { %v1879_v12 = vpop.f32.mrf.mxu3 }
0x2a76   :  { %v1900_v4 = vadd.f32 %v1899_v13, %v1879_v12 }
0x2a78   :  { %v1902_v1 = vadd.f32 %v3921_v59, %v1900_v4  ;;  %v1921_v59 = vpop.f32.mrf.mxu1 }
0x2a7a   :  { %v1903_v2 = vmax.f32 %v1902_v1, 0.0 }
0x2a7c   :  { %2995 = vmatmul.msk.f32.vlgmr.msra.gmra.mxu2 %vm174_vm1, %v1903_v2 }
0x2a7d   :  { %2203 = vmatpush.msra.mxu2 %v4221_v15 }
0x2a7f   :  { %2204 = vmatpush.msra.mxu2 %v4224_v21 }
0x2a81   :  { %2205 = vmatpush.msra.mxu2 %v4227_v37 }
0x2a83   :  { %2206 = vmatpush.msra.mxu2 %v4230_v40 }
0x2aff   :  { %v1944_v28 = vpop.f32.mrf.mxu2 }
0x2b00   :  { %v1945_v42 = vadd.f32 %v1944_v28, %v1921_v59 }
0x2b02   :  { %v1947_v29 = vadd.f32 %v3932_v38, %v1945_v42 }
0x2b04   :  { %1968 = vrot.lane.b32.xlu0 %v1947_v29, %s3398_s29  ;;  %v2996_v46 = vmul.f32 -1.442695, %v1947_v29 }
0x2b06   :  { %3151 = vpow2.f32 %v2996_v46 }
0x2b0c   :  { %v3152_v23 = vpop.eup %3151 }
0x2b0d   :  { %v1951_v63 = vadd.f32 1.0, %v3152_v23 }
0x2b0f   :  { %3153 = vrcp.f32 %v1951_v63  ;;  %v1963_v49 = vand.u32 2147483648, %v1951_v63  ;;  %vm1957_vm3 = vweird.f32 %v1951_v63  ;;  %v1961_v0 = vand.u32 2147483647, %v1951_v63 }
0x2b11   :  { %v1964_v51 = vor.u32 1.1754944e-38, %v1963_v49  ;;  %vm1962_vm6 = vcmp.eq.f32.partialorder %v1961_v0, 8.507059e+37  ;;  %v4289_v0 = vld [vmem:[#allocation9 + $0x8] sm:$0xff] }
0x2b15   :  { %v3154_v22 = vpop.eup %3153 }
0x2b16   :  { %v1953_v5 = vmul.f32 %v3154_v22, %v1951_v63  ;;  %vm1958_vm2 = vweird.f32 %v3154_v22 }
0x2b17   :  { %vm1959_vm5 = vmor %vm1957_vm3, %vm1958_vm2 }
0x2b18   :  { %v1954_v20 = vsub.f32 1.0, %v1953_v5 }
0x2b1a   :  { %v1955_v47 = vmul.f32 %v3154_v22, %v1954_v20  ;;  %v4274_v20 = vld [vmem:[#allocation9 + $0x18] sm:$0xff] }
0x2b1c   :  { %v1956_v6 = vadd.f32 %v3154_v22, %v1955_v47 }
0x2b1e   :  { %v1960_v50 = vsel %vm1959_vm5, %v3154_v22, %v1956_v6  ;;  %v4280_v6 = vld [vmem:[#allocation9 + $0x10] sm:$0xff] }
0x2b1f   :  { %v1965_v41 = vsel %vm1962_vm6, %v1964_v51, %v1960_v50  ;;  %v4292_v50 = vld [vmem:[#allocation9] sm:$0xff] }
0x2b20   :  { %v1978_v25 = vsub.f32 1.0, %v1965_v41  ;;  %v1984_v30 = vmul.f32 %v1965_v41, %v4106_v39  ;;  %v4253_v39 = vld [vmem:[#allocation3] sm:$0xff]  ;;  %v4308_v51 = vld [vmem:[%s4558_s12 + $0x10] sm:$0xff] }
0x2b76   :  { %v1969_v38 = vpop.permute.xlu0 %1968 }
0x2b77   :  { %v1971_v35 = vmul.f32 %v1969_v38, %v1965_v41  ;;  %v4315_v38 = vld [vmem:[%s4558_s12 + $0x8] sm:$0xff]  ;;  %v4322_v41 = vld [vmem:[%s4558_s12] sm:$0xff] }
0x2b79   :  { %1973 = vrot.lane.b32.xlu2 %v1971_v35, %s3399_s6  ;;  %v4330_v35 = vld [vmem:[%s4557_s11 + $0x18] sm:$0xff] }
0x2bd3   :  { %v1974_v26 = vpop.permute.xlu2 %1973 }
0x2bd4   :  { %v1976_v27 = vadd.f32 %v1974_v26, %v1947_v29  ;;  %v849_v29 = vld [vmem:[%s4580_s7 + $0x6] sm:$0x3]  ;;  %v4336_v26 = vld [vmem:[%s4557_s11 + $0x10] sm:$0xff] }
0x2bd5   :  { %v2037_v63 = vmul.f32 %v3969_v43, %v849_v29 }
0x2bd6   :  { %3155 = vtanh.f32 %v1976_v27  ;;  %v4342_v27 = vld [vmem:[%s4557_s11 + $0x8] sm:$0xff] }
0x2bdc   :  { %v3156_v53 = vpop.eup %3155 }
0x2bdd   :  { %1980 = vrot.lane.b32.xlu1 %v3156_v53, %s3400_s30  ;;  %v4348_v53 = vld [vmem:[%s4557_s11] sm:$0xff] }
0x2c4f   :  { %v1981_v10 = vpop.permute.xlu1 %1980 }
0x2c50   :  { %v1983_v48 = vmul.f32 %v1981_v10, %v1978_v25 }
0x2c52   :  { %v4238_v36 = vadd.f32 %v1984_v30, %v1983_v48  ;;  %v4354_v48 = vld [vmem:[%s4556_s10] ss:$0 sm:$0xff] }
0x2c54   :  { %1987 = vrot.lane.b32.xlu0 %v4238_v36, %s3400_s30 }
0x2cc6   :  { %v4242_v52 = vpop.permute.xlu0 %1987 }
0x2cc7   :  { %2997 = vmatmul.msk.f32.vlgmr.msra.gmra.mxu3 %vm174_vm1, %v4242_v52  ;;  %3000 = vmatmul.msk.f32.vlgmr.msrb.gmra.mxu1 %vm174_vm1, %v4242_v52 }
0x2cc8   :  { %2226 = vmatpush.msra.mxu3 %v3898_v54  ;;  %2349 = vmatpush.msrb.mxu1 %v4249_v3 }
0x2cca   :  { %2227 = vmatpush.msra.mxu3 %v3905_v56  ;;  %2350 = vmatpush.msrb.mxu1 %v4253_v39 }
0x2ccc   :  { %2228 = vmatpush.msra.mxu3 %v3908_v57 }
0x2cce   :  { %2229 = vmatpush.msra.mxu3 %v3911_v58 }
0x2d44   :  { %v2085_v25 = vpop.f32.mrf.mxu1 }
0x2d4a   :  { %v2008_v7 = vpop.f32.mrf.mxu3 }
0x2d4b   :  { %v2009_v8 = vadd.f32 %v3958_v62, %v2008_v7 }
0x2d4d   :  { %v2011_v9 = vsel %vm800_vm4, %v2009_v8, -inf }
0x2d4e   :  { %2012 = vmax.xlane.f32.xlu0 %v2011_v9 }
0x2dc1   :  { %v2013_v54 = vpop.xlane.xlu0 %2012 }
0x2dc2   :  { %v2014_v61 = vsub.f32 %v2009_v8, %v2013_v54 }
0x2dc4   :  { %v2015_v13 = vmul.f32 1.442695, %v2014_v61 }
0x2dc6   :  { %3157 = vpow2.f32 %v2015_v13 }
0x2dcc   :  { %v3158_v12 = vpop.eup %3157 }
0x2dcd   :  { %v2017_v56 = vsel %vm800_vm4, %v3158_v12, 0.0 }
0x2dce   :  { %2018 = vadd.xlane.f32.xlu2 %v2017_v56 }
0x2e41   :  { %v2019_v4 = vpop.xlane.xlu2 %2018 }
0x2e42   :  { %3159 = vlog2.f32 %v2019_v4 }
0x2e48   :  { %v3160_v1 = vpop.eup %3159 }
0x2e49   :  { %v2021_v57 = vmul.f32 0.6931472, %v3160_v1 }
0x2e4b   :  { %v2022_v2 = vadd.f32 %v2021_v57, %v2013_v54 }
0x2e4d   :  { %v2023_v58 = vsub.f32 %v2009_v8, %v2022_v2 }
0x2e4f   :  { %v2026_v59 = vsel %vm800_vm4, %v2023_v58, -inf  ;;  %2025 = vst [vmem:[#allocation11 + $0x6] sm:$0x3] %v2023_v58 }
0x2e50   :  { %2027 = vmax.xlane.f32.xlu1 %v2026_v59  ;;  %v4371_v59 = vld [vmem:[%s4559_s13] ss:$0 sm:$0xff] }
0x2ec3   :  { %v2028_v62 = vpop.xlane.xlu1 %2027 }
0x2ec4   :  { %vm2029_vm7 = vcmp.ge.f32.partialorder %v2023_v58, %v2028_v62 }
0x2ec5   :  { %v2030_v28 = vsel %vm2029_vm7, %v3723_v32, 128.0 }
0x2ec6   :  { %v2031_v42 = vsel %vm800_vm4, %v2030_v28, inf }
0x2ec7   :  { %2032 = vmin.xlane.f32.xlu0 %v2031_v42 }
0x2f3a   :  { %v2033_v46 = vpop.xlane.xlu0 %2032 }
0x2f3b   :  { %vm2034_vm8 = vcmp.eq.f32.partialorder %v3723_v32, %v2033_v46 }
0x2f3c   :  { %v2998_v23 = vsel %vm2034_vm8, 1.0, %v3397_v11 }
0x2f3d   :  { %v2038_v22 = vmul.f32 %v2998_v23, %v3974_v14  ;;  %v4382_v23 = vld [vmem:[%s4562_s16] ss:$0 sm:$0xff] }
0x2f3f   :  { %v2039_v5 = vadd.f32 %v2038_v22, %v2037_v63 }
0x2f41   :  { %vm2042_vm9 = vcmp.gt.f32.partialorder %v2039_v5, 0.5  ;;  %2999 = vmatmul.msk.f32.vlgmr.msra.gmra.mxu0 %vm135_vm0, %v2039_v5 }
0x2f42   :  { %vm2043_vm12 = vmand %vm2040_vm15, %vm2042_vm9  ;;  %2290 = vmatpush.msra.mxu0 %v4274_v20 }
0x2f43   :  { %v4278_v47 = vsel %vm2043_vm12, 1.0, %v4140_v44 }
0x2f44   :  { %2291 = vmatpush.msra.mxu0 %v4280_v6  ;;  %vm2327_vm13 = vcmp.lt.f32.partialorder %v4278_v47, 0.5 }
0x2f45   :  { %v4287_v49 = vsel %vm2327_vm13, 5, %v4147_v45  ;;  %v4301_v45 = vld [vmem:[%s4558_s12 + $0x18] sm:$0xff] }
0x2f46   :  { %2292 = vmatpush.msra.mxu0 %v4289_v0 }
0x2f48   :  { %2293 = vmatpush.msra.mxu0 %v4292_v50 }
0x2fbe   :  { %v2065_v44 = vpop.f32.mrf.mxu0 }
0x2fbf   :  { %3001 = vmatmul.msk.f32.vlgmr.msrb.gmra.mxu2 %vm174_vm1, %v2065_v44  ;;  %3005 = vmatmul.msk.f32.vlgmr.msra.gmra.mxu1 %vm174_vm1, %v2065_v44 }
0x2fc0   :  { %2367 = vmatpush.msrb.mxu2 %v4156_v31  ;;  %2448 = vmatpush.msra.mxu1 %v4301_v45 }
0x2fc2   :  { %2368 = vmatpush.msrb.mxu2 %v4163_v33  ;;  %2449 = vmatpush.msra.mxu1 %v4308_v51 }
0x2fc4   :  { %2369 = vmatpush.msrb.mxu2 %v4170_v34  ;;  %2450 = vmatpush.msra.mxu1 %v4315_v38 }
0x2fc6   :  { %2370 = vmatpush.msrb.mxu2 %v4177_v16  ;;  %2451 = vmatpush.msra.mxu1 %v4322_v41 }
0x2fc7   :  { %3006 = vmatmul.msk.f32.vlgmr.msra.gmra.mxu2 %vm174_vm1, %v4242_v52 }
0x2fc8   :  { %2468 = vmatpush.msra.mxu2 %v4330_v35 }
0x2fca   :  { %2469 = vmatpush.msra.mxu2 %v4336_v26 }
0x2fcc   :  { %2470 = vmatpush.msra.mxu2 %v4342_v27 }
0x2fce   :  { %2471 = vmatpush.msra.mxu2 %v4348_v53 }
0x303c   :  { %v2186_v57 = vpop.f32.mrf.mxu1 }
0x3042   :  { %v2108_v10 = vpop.f32.mrf.mxu2 }
0x3043   :  { %v2109_v30 = vadd.f32 %v2108_v10, %v2085_v25 }
0x3045   :  { %v2111_v52 = vadd.f32 %v4354_v48, %v2109_v30 }
0x3047   :  { %v2112_v7 = vsel %vm933_vm10, %v2111_v52, -inf }
0x3048   :  { %2113 = vmax.xlane.f32.xlu2 %v2112_v7 }
0x304a   :  { %v2208_v42 = vpop.f32.mrf.mxu2 }
0x30bb   :  { %v2114_v8 = vpop.xlane.xlu2 %2113 }
0x30bc   :  { %v2115_v9 = vsub.f32 %v2111_v52, %v2114_v8 }
0x30be   :  { %v2116_v54 = vmul.f32 1.442695, %v2115_v9 }
0x30c0   :  { %3161 = vpow2.f32 %v2116_v54 }
0x30c6   :  { %v3162_v61 = vpop.eup %3161 }
0x30c7   :  { %v2118_v13 = vsel %vm933_vm10, %v3162_v61, 0.0 }
0x30c8   :  { %2119 = vadd.xlane.f32.xlu0 %v2118_v13 }
0x313b   :  { %v2120_v12 = vpop.xlane.xlu0 %2119 }
0x313c   :  { %3163 = vrcp.f32 %v2120_v12 }
0x3142   :  { %v3164_v56 = vpop.eup %3163 }
0x3143   :  { %v2122_v4 = vmul.f32 %v3164_v56, %v3162_v61 }
0x3145   :  { %3003 = vmatmul.msk.f32.vlgmr.msrb.gmra.mxu3 %vm951_vm11, %v2122_v4 }
0x3146   :  { %2390 = vmatpush.msrb.mxu3 %v4194_v19 }
0x3148   :  { %2391 = vmatpush.msrb.mxu3 %v4200_v55 }
0x314a   :  { %2392 = vmatpush.msrb.mxu3 %v4206_v24 }
0x314c   :  { %2393 = vmatpush.msrb.mxu3 %v4212_v60 }
0x31c8   :  { %v2143_v1 = vpop.f32.mrf.mxu3 }
0x31c9   :  { %3004 = vmatmul.msk.f32.vlgmr.msrb.gmra.mxu0 %vm174_vm1, %v2143_v1 }
0x31ca   :  { %3014 = vmatpush.msk.msrb.mxu0 %vm800_vm4, %v3841_v17 }
0x31cc   :  { %2428 = vmatpush.msrb.mxu0 %v3844_v18 }
0x3246   :  { %v2166_v2 = vpop.f32.mrf.mxu0 }
0x3247   :  { %v2187_v58 = vadd.f32 %v2186_v57, %v2166_v2 }
0x3249   :  { %v2189_v62 = vadd.f32 %v4371_v59, %v2187_v58 }
0x324b   :  { %v2190_v28 = vmax.f32 %v2189_v62, 0.0 }
0x324d   :  { %3007 = vmatmul.msk.f32.vlgmr.msra.gmra.mxu3 %vm174_vm1, %v2190_v28 }
0x324e   :  { %2490 = vmatpush.msra.mxu3 %v4221_v15 }
0x3250   :  { %2491 = vmatpush.msra.mxu3 %v4224_v21 }
0x3252   :  { %2492 = vmatpush.msra.mxu3 %v4227_v37 }
0x3254   :  { %2493 = vmatpush.msra.mxu3 %v4230_v40 }
0x32d0   :  { %v2231_v29 = vpop.f32.mrf.mxu3 }
0x32d1   :  { %v2232_v46 = vadd.f32 %v2231_v29, %v2208_v42 }
0x32d3   :  { %v2234_v63 = vadd.f32 %v4382_v23, %v2232_v46  ;;  %v4399_v46 = vld [vmem:[#allocation6 + $0x18] sm:$0xff] }
0x32d5   :  { %2255 = vrot.lane.b32.xlu2 %v2234_v63, %s3398_s29  ;;  %v3008_v22 = vmul.f32 -1.442695, %v2234_v63 }
0x32d7   :  { %3165 = vpow2.f32 %v3008_v22  ;;  %v4410_v22 = vld [vmem:[#allocation6] sm:$0xff] }
0x32dd   :  { %v3166_v5 = vpop.eup %3165 }
0x32de   :  { %v2238_v44 = vadd.f32 1.0, %v3166_v5 }
0x32e0   :  { %3167 = vrcp.f32 %v2238_v44  ;;  %v2250_v8 = vand.u32 2147483648, %v2238_v44  ;;  %vm2244_vm15 = vweird.f32 %v2238_v44  ;;  %v2248_v9 = vand.u32 2147483647, %v2238_v44 }
0x32e2   :  { %v2251_v61 = vor.u32 1.1754944e-38, %v2250_v8  ;;  %vm2249_vm3 = vcmp.eq.f32.partialorder %v2248_v9, 8.507059e+37 }
0x32e6   :  { %v3168_v25 = vpop.eup %3167 }
0x32e7   :  { %v2240_v10 = vmul.f32 %v3168_v25, %v2238_v44  ;;  %vm2245_vm14 = vweird.f32 %v3168_v25  ;;  %v4416_v44 = vld [vmem:[%s4564_s18] ss:$0 sm:$0xff] }
0x32e8   :  { %vm2246_vm2 = vmor %vm2244_vm15, %vm2245_vm14 }
0x32e9   :  { %v2241_v30 = vsub.f32 1.0, %v2240_v10 }
0x32eb   :  { %v2242_v52 = vmul.f32 %v3168_v25, %v2241_v30 }
0x32ed   :  { %v2243_v7 = vadd.f32 %v3168_v25, %v2242_v52 }
0x32ef   :  { %v2247_v54 = vsel %vm2246_vm2, %v3168_v25, %v2243_v7 }
0x32f0   :  { %v2252_v12 = vsel %vm2249_vm3, %v2251_v61, %v2247_v54 }
0x32f1   :  { %v2265_v2 = vsub.f32 1.0, %v2252_v12  ;;  %v2271_v62 = vmul.f32 %v2252_v12, %v4238_v36  ;;  %v4403_v36 = vld [vmem:[#allocation6 + $0x10] sm:$0xff] }
0x332f   :  { %v2256_v13 = vpop.permute.xlu2 %2255 }
0x3330   :  { %v2258_v56 = vmul.f32 %v2256_v13, %v2252_v12 }
0x3332   :  { %2260 = vrot.lane.b32.xlu1 %v2258_v56, %s3399_s6 }
0x33a4   :  { %v2261_v4 = vpop.permute.xlu1 %2260 }
0x33a5   :  { %v2263_v1 = vadd.f32 %v2261_v4, %v2234_v63  ;;  %v4407_v63 = vld [vmem:[#allocation6 + $0x8] sm:$0xff] }
0x33a7   :  { %3169 = vtanh.f32 %v2263_v1 }
0x33ad   :  { %v3170_v57 = vpop.eup %3169 }
0x33ae   :  { %2267 = vrot.lane.b32.xlu0 %v3170_v57, %s3400_s30  ;;  %v850_v57 = vld [vmem:[%s4580_s7 + $0x8] sm:$0x3] }
0x3420   :  { %v2268_v58 = vpop.permute.xlu0 %2267 }
0x3421   :  { %v2270_v28 = vmul.f32 %v2268_v58, %v2265_v2 }
0x3423   :  { %v4389_v42 = vadd.f32 %v2271_v62, %v2270_v28  ;;  %v2324_v62 = vmul.f32 %v3969_v43, %v850_v57 }
0x3425   :  { %2274 = vrot.lane.b32.xlu2 %v4389_v42, %s3400_s30 }
0x347f   :  { %v4393_v29 = vpop.permute.xlu2 %2274 }
0x3480   :  { %3009 = vmatmul.msk.f32.vlgmr.msra.gmra.mxu0 %vm174_vm1, %v4393_v29  ;;  %3012 = vmatmul.msk.f32.vlgmr.msrb.gmra.mxu2 %vm174_vm1, %v4393_v29 }
0x3481   :  { %2513 = vmatpush.msra.mxu0 %v4399_v46  ;;  %2636 = vmatpush.msrb.mxu2 %v4249_v3 }
0x3483   :  { %2514 = vmatpush.msra.mxu0 %v4403_v36  ;;  %2637 = vmatpush.msrb.mxu2 %v4253_v39 }
0x3485   :  { %2515 = vmatpush.msra.mxu0 %v4407_v63 }
0x3487   :  { %2516 = vmatpush.msra.mxu0 %v4410_v22 }
0x34fd   :  { %v2295_v5 = vpop.f32.mrf.mxu0 }
0x34fe   :  { %v2296_v3 = vadd.f32 %v4416_v44, %v2295_v5 }
0x3500   :  { %v2298_v25 = vsel %vm800_vm4, %v2296_v3, -inf }
0x3501   :  { %2299 = vmax.xlane.f32.xlu1 %v2298_v25 }
0x3574   :  { %v2300_v39 = vpop.xlane.xlu1 %2299 }
0x3575   :  { %v2301_v10 = vsub.f32 %v2296_v3, %v2300_v39 }
0x3577   :  { %v2302_v30 = vmul.f32 1.442695, %v2301_v10 }
0x3579   :  { %3171 = vpow2.f32 %v2302_v30 }
0x357f   :  { %v3172_v52 = vpop.eup %3171 }
0x3580   :  { %v2304_v7 = vsel %vm800_vm4, %v3172_v52, 0.0 }
0x3581   :  { %2305 = vadd.xlane.f32.xlu0 %v2304_v7 }
0x35f4   :  { %v2306_v8 = vpop.xlane.xlu0 %2305 }
0x35f5   :  { %3173 = vlog2.f32 %v2306_v8 }
0x35fb   :  { %v3174_v9 = vpop.eup %3173 }
0x35fc   :  { %v2308_v54 = vmul.f32 0.6931472, %v3174_v9 }
0x35fe   :  { %v2309_v61 = vadd.f32 %v2308_v54, %v2300_v39 }
0x3600   :  { %v2310_v13 = vsub.f32 %v2296_v3, %v2309_v61 }
0x3602   :  { %v2313_v12 = vsel %vm800_vm4, %v2310_v13, -inf  ;;  %2312 = vst [vmem:[#allocation11 + $0x8] sm:$0x3] %v2310_v13 }
0x3603   :  { %2314 = vmax.xlane.f32.xlu2 %v2313_v12 }
0x3676   :  { %v2315_v56 = vpop.xlane.xlu2 %2314 }
0x3677   :  { %vm2316_vm5 = vcmp.ge.f32.partialorder %v2310_v13, %v2315_v56 }
0x3678   :  { %v2317_v4 = vsel %vm2316_vm5, %v3723_v32, 128.0 }
0x3679   :  { %v2318_v1 = vsel %vm800_vm4, %v2317_v4, inf }
0x367a   :  { %2319 = vmin.xlane.f32.xlu1 %v2318_v1 }
0x36ed   :  { %v2320_v2 = vpop.xlane.xlu1 %2319 }
0x36ee   :  { %vm2321_vm6 = vcmp.eq.f32.partialorder %v3723_v32, %v2320_v2 }
0x36ef   :  { %v3010_v58 = vsel %vm2321_vm6, 1.0, %v3397_v11 }
0x36f0   :  { %v2325_v28 = vmul.f32 %v3010_v58, %v3974_v14 }
0x36f2   :  { %v2326_v5 = vadd.f32 %v2325_v28, %v2324_v62 }
0x36f4   :  { %vm2329_vm7 = vcmp.gt.f32.partialorder %v2326_v5, 0.5  ;;  %3011 = vmatmul.msk.f32.vlgmr.msrb.gmra.mxu1 %vm135_vm0, %v2326_v5 }
0x36f5   :  { %vm2330_vm8 = vmand %vm2327_vm13, %vm2329_vm7  ;;  %2577 = vmatpush.msrb.mxu1 %v4274_v20  ;;  %vm2889_vm7 = vcmask 0  }
0x36f6   :  { %v4436_v3 = vsel %vm2330_vm8, 1.0, %v4278_v47 }
0x36f7   :  { %2578 = vmatpush.msrb.mxu1 %v4280_v6  ;;  %vm2614_vm9 = vcmp.lt.f32.partialorder %v4436_v3, 0.5 }
0x36f8   :  { %v4443_v25 = vsel %vm2614_vm9, 6, %v4287_v49 }
0x36f9   :  { %2579 = vmatpush.msrb.mxu1 %v4289_v0 }
0x36fb   :  { %2580 = vmatpush.msrb.mxu1 %v4292_v50 }
0x3771   :  { %v2352_v39 = vpop.f32.mrf.mxu1 }
0x3772   :  { %3013 = vmatmul.msk.f32.vlgmr.msrb.gmra.mxu3 %vm174_vm1, %v2352_v39  ;;  %3017 = vmatmul.msk.f32.vlgmr.msra.gmra.mxu2 %vm174_vm1, %v2352_v39 }
0x3773   :  { %2654 = vmatpush.msrb.mxu3 %v4156_v31  ;;  %2735 = vmatpush.msra.mxu2 %v4301_v45  ;;  %v2372_v31 = vpop.f32.mrf.mxu2 }
0x3775   :  { %2655 = vmatpush.msrb.mxu3 %v4163_v33  ;;  %2736 = vmatpush.msra.mxu2 %v4308_v51 }
0x3777   :  { %2656 = vmatpush.msrb.mxu3 %v4170_v34  ;;  %2737 = vmatpush.msra.mxu2 %v4315_v38 }
0x3779   :  { %2657 = vmatpush.msrb.mxu3 %v4177_v16  ;;  %2738 = vmatpush.msra.mxu2 %v4322_v41 }
0x377a   :  { %3018 = vmatmul.msk.f32.vlgmr.msra.gmra.mxu3 %vm174_vm1, %v4393_v29 }
0x377b   :  { %2755 = vmatpush.msra.mxu3 %v4330_v35 }
0x377d   :  { %2756 = vmatpush.msra.mxu3 %v4336_v26 }
0x377f   :  { %2757 = vmatpush.msra.mxu3 %v4342_v27 }
0x3781   :  { %2758 = vmatpush.msra.mxu3 %v4348_v53 }
0x37f5   :  { %v2395_v33 = vpop.f32.mrf.mxu3  ;;  %v2473_v29 = vpop.f32.mrf.mxu2 }
0x37f6   :  { %v2396_v34 = vadd.f32 %v2395_v33, %v2372_v31 }
0x37f8   :  { %v2398_v47 = vadd.f32 %v4354_v48, %v2396_v34 }
0x37fa   :  { %v2399_v16 = vsel %vm933_vm10, %v2398_v47, -inf }
0x37fb   :  { %2400 = vmax.xlane.f32.xlu0 %v2399_v16 }
0x386e   :  { %v2401_v49 = vpop.xlane.xlu0 %2400 }
0x386f   :  { %v2402_v45 = vsub.f32 %v2398_v47, %v2401_v49 }
0x3871   :  { %v2403_v51 = vmul.f32 1.442695, %v2402_v45 }
0x3873   :  { %3175 = vpow2.f32 %v2403_v51 }
0x3879   :  { %v3176_v38 = vpop.eup %3175 }
0x387a   :  { %v2405_v41 = vsel %vm933_vm10, %v3176_v38, 0.0 }
0x387b   :  { %2406 = vadd.xlane.f32.xlu2 %v2405_v41 }
0x38ee   :  { %v2407_v35 = vpop.xlane.xlu2 %2406 }
0x38ef   :  { %3177 = vrcp.f32 %v2407_v35 }
0x38f5   :  { %v3178_v26 = vpop.eup %3177 }
0x38f6   :  { %v2409_v27 = vmul.f32 %v3178_v26, %v3176_v38 }
0x38f8   :  { %3015 = vmatmul.msk.f32.vlgmr.msrb.gmra.mxu0 %vm951_vm11, %v2409_v27 }
0x38f9   :  { %2677 = vmatpush.msrb.mxu0 %v4194_v19 }
0x38fb   :  { %2678 = vmatpush.msrb.mxu0 %v4200_v55  ;;  %v2495_v55 = vpop.f32.mrf.mxu3 }
0x38fd   :  { %2679 = vmatpush.msrb.mxu0 %v4206_v24 }
0x38ff   :  { %2680 = vmatpush.msrb.mxu0 %v4212_v60 }
0x3975   :  { %v2430_v53 = vpop.f32.mrf.mxu0 }
0x3976   :  { %3016 = vmatmul.msk.f32.vlgmr.msra.gmra.mxu1 %vm174_vm1, %v2430_v53 }
0x3977   :  { %3026 = vmatpush.msk.msra.mxu1 %vm800_vm4, %v3841_v17 }
0x3979   :  { %2715 = vmatpush.msra.mxu1 %v3844_v18 }
0x39f3   :  { %v2453_v10 = vpop.f32.mrf.mxu1 }
0x39f4   :  { %v2474_v30 = vadd.f32 %v2473_v29, %v2453_v10  ;;  %v851_v29 = vld [vmem:[%s4580_s7 + $0xa] sm:$0x3] }
0x39f6   :  { %v2476_v52 = vadd.f32 %v4371_v59, %v2474_v30 }
0x39f8   :  { %v2477_v19 = vmax.f32 %v2476_v52, 0.0  ;;  %v2611_v52 = vmul.f32 %v3969_v43, %v851_v29 }
0x39fa   :  { %3019 = vmatmul.msk.f32.vlgmr.msra.gmra.mxu0 %vm174_vm1, %v2477_v19 }
0x39fb   :  { %2777 = vmatpush.msra.mxu0 %v4221_v15 }
0x39fd   :  { %2778 = vmatpush.msra.mxu0 %v4224_v21 }
0x39ff   :  { %2779 = vmatpush.msra.mxu0 %v4227_v37 }
0x3a01   :  { %2780 = vmatpush.msra.mxu0 %v4230_v40 }
0x3a77   :  { %v2518_v17 = vpop.f32.mrf.mxu0 }
0x3a78   :  { %v2519_v24 = vadd.f32 %v2518_v17, %v2495_v55 }
0x3a7a   :  { %v2521_v18 = vadd.f32 %v4382_v23, %v2519_v24 }
0x3a7c   :  { %2542 = vrot.lane.b32.xlu1 %v2521_v18, %s3398_s29  ;;  %v3020_v60 = vmul.f32 -1.442695, %v2521_v18 }
0x3a7e   :  { %3179 = vpow2.f32 %v3020_v60 }
0x3a84   :  { %v3180_v7 = vpop.eup %3179 }
0x3a85   :  { %v2525_v8 = vadd.f32 1.0, %v3180_v7 }
0x3a87   :  { %3181 = vrcp.f32 %v2525_v8  ;;  %v2537_v37 = vand.u32 2147483648, %v2525_v8  ;;  %vm2531_vm13 = vweird.f32 %v2525_v8  ;;  %v2535_v40 = vand.u32 2147483647, %v2525_v8 }
0x3a89   :  { %v2538_v12 = vor.u32 1.1754944e-38, %v2537_v37  ;;  %vm2536_vm15 = vcmp.eq.f32.partialorder %v2535_v40, 8.507059e+37 }
0x3a8d   :  { %v3182_v9 = vpop.eup %3181 }
0x3a8e   :  { %v2527_v15 = vmul.f32 %v3182_v9, %v2525_v8  ;;  %vm2532_vm12 = vweird.f32 %v3182_v9 }
0x3a8f   :  { %vm2533_vm14 = vmor %vm2531_vm13, %vm2532_vm12 }
0x3a90   :  { %v2528_v54 = vsub.f32 1.0, %v2527_v15 }
0x3a92   :  { %v2529_v21 = vmul.f32 %v3182_v9, %v2528_v54 }
0x3a94   :  { %v2530_v61 = vadd.f32 %v3182_v9, %v2529_v21 }
0x3a96   :  { %v2534_v13 = vsel %vm2533_vm14, %v3182_v9, %v2530_v61 }
0x3a97   :  { %v2539_v4 = vsel %vm2536_vm15, %v2538_v12, %v2534_v13 }
0x3a98   :  { %v2552_v62 = vsub.f32 1.0, %v2539_v4  ;;  %v2558_v5 = vmul.f32 %v2539_v4, %v4389_v42 }
0x3aee   :  { %v2543_v56 = vpop.permute.xlu1 %2542 }
0x3aef   :  { %v2545_v1 = vmul.f32 %v2543_v56, %v2539_v4 }
0x3af1   :  { %2547 = vrot.lane.b32.xlu0 %v2545_v1, %s3399_s6 }
0x3b63   :  { %v2548_v57 = vpop.permute.xlu0 %2547 }
0x3b64   :  { %v2550_v2 = vadd.f32 %v2548_v57, %v2521_v18 }
0x3b66   :  { %3183 = vtanh.f32 %v2550_v2 }
0x3b6c   :  { %v3184_v58 = vpop.eup %3183 }
0x3b6d   :  { %2554 = vrot.lane.b32.xlu2 %v3184_v58, %s3400_s30 }
0x3bc7   :  { %v2555_v28 = vpop.permute.xlu2 %2554 }
0x3bc8   :  { %v2557_v39 = vmul.f32 %v2555_v28, %v2552_v62 }
0x3bca   :  { %v4486_v31 = vadd.f32 %v2558_v5, %v2557_v39 }
0x3bcc   :  { %2561 = vrot.lane.b32.xlu0 %v4486_v31, %s3400_s30 }
0x3c3e   :  { %v2562_v33 = vpop.permute.xlu0 %2561 }
0x3c3f   :  { %3021 = vmatmul.msk.f32.vlgmr.msrb.gmra.mxu1 %vm174_vm1, %v2562_v33  ;;  %3024 = vmatmul.msk.f32.vlgmr.msrb.gmra.mxu3 %vm174_vm1, %v2562_v33 }
0x3c40   :  { %2800 = vmatpush.msrb.mxu1 %v4399_v46 }
0x3c42   :  { %2801 = vmatpush.msrb.mxu1 %v4403_v36 }
0x3c44   :  { %2802 = vmatpush.msrb.mxu1 %v4407_v63 }
0x3c46   :  { %2803 = vmatpush.msrb.mxu1 %v4410_v22 }
0x3cbc   :  { %v2582_v42 = vpop.f32.mrf.mxu1 }
0x3cbd   :  { %v2583_v34 = vadd.f32 %v4416_v44, %v2582_v42 }
0x3cbf   :  { %v2585_v47 = vsel %vm800_vm4, %v2583_v34, -inf }
0x3cc0   :  { %2586 = vmax.xlane.f32.xlu1 %v2585_v47 }
0x3cc2   :  { %v2659_v43 = vpop.f32.mrf.mxu3 }
0x3d33   :  { %v2587_v16 = vpop.xlane.xlu1 %2586 }
0x3d34   :  { %v2588_v49 = vsub.f32 %v2583_v34, %v2587_v16 }
0x3d36   :  { %v2589_v45 = vmul.f32 1.442695, %v2588_v49 }
0x3d38   :  { %3185 = vpow2.f32 %v2589_v45 }
0x3d3e   :  { %v3186_v51 = vpop.eup %3185 }
0x3d3f   :  { %v2591_v38 = vsel %vm800_vm4, %v3186_v51, 0.0 }
0x3d40   :  { %2592 = vadd.xlane.f32.xlu2 %v2591_v38 }
0x3db3   :  { %v2593_v46 = vpop.xlane.xlu2 %2592 }
0x3db4   :  { %3187 = vlog2.f32 %v2593_v46 }
0x3dba   :  { %v3188_v36 = vpop.eup %3187 }
0x3dbb   :  { %v2595_v63 = vmul.f32 0.6931472, %v3188_v36 }
0x3dbd   :  { %v2596_v41 = vadd.f32 %v2595_v63, %v2587_v16 }
0x3dbf   :  { %v2597_v22 = vsub.f32 %v2583_v34, %v2596_v41 }
0x3dc1   :  { %v2600_v35 = vsel %vm800_vm4, %v2597_v22, -inf  ;;  %2599 = vst [vmem:[#allocation11 + $0xa] sm:$0x3] %v2597_v22 }
0x3dc2   :  { %2601 = vmax.xlane.f32.xlu0 %v2600_v35 }
0x3e35   :  { %v2602_v26 = vpop.xlane.xlu0 %2601 }
0x3e36   :  { %vm2603_vm2 = vcmp.ge.f32.partialorder %v2597_v22, %v2602_v26 }
0x3e37   :  { %v2604_v27 = vsel %vm2603_vm2, %v3723_v32, 128.0 }
0x3e38   :  { %v2605_v53 = vsel %vm800_vm4, %v2604_v27, inf }
0x3e39   :  { %2606 = vmin.xlane.f32.xlu1 %v2605_v53 }
0x3eac   :  { %v2607_v10 = vpop.xlane.xlu1 %2606 }
0x3ead   :  { %vm2608_vm3 = vcmp.eq.f32.partialorder %v3723_v32, %v2607_v10 }
0x3eae   :  { %v3022_v30 = vsel %vm2608_vm3, 1.0, %v3397_v11 }
0x3eaf   :  { %v2612_v19 = vmul.f32 %v3022_v30, %v3974_v14 }
0x3eb1   :  { %v2613_v55 = vadd.f32 %v2612_v19, %v2611_v52 }
0x3eb3   :  { %vm2616_vm5 = vcmp.gt.f32.partialorder %v2613_v55, 0.5  ;;  %3023 = vmatmul.msk.f32.vlgmr.msrb.gmra.mxu2 %vm135_vm0, %v2613_v55 }
0x3eb4   :  { %vm2617_vm6 = vmand %vm2614_vm9, %vm2616_vm5  ;;  %2864 = vmatpush.msrb.mxu2 %v4274_v20 }
0x3eb5   :  { %v2618_v17 = vsel %vm2617_vm6, 1.0, %v4436_v3 }
0x3eb6   :  { %2865 = vmatpush.msrb.mxu2 %v4280_v6  ;;  %vm2887_vm8 = vcmp.lt.f32.partialorder %v2618_v17, 0.5 }
0x3eb7   :  { %v2888_v11 = vsel %vm2887_vm8, 7, %v4443_v25 }
0x3eb8   :  { %2866 = vmatpush.msrb.mxu2 %v4289_v0  ;;  %2890 = vst.msk [vmem:[#allocation12] sm:$0x1] %vm2889_vm7, %v2888_v11 }
0x3eba   :  { %2867 = vmatpush.msrb.mxu2 %v4292_v50 }
0x3f36   :  { %v2639_v32 = vpop.f32.mrf.mxu2 }
0x3f37   :  { %3025 = vmatmul.msk.f32.vlgmr.msrb.gmra.mxu0 %vm174_vm1, %v2639_v32  ;;  %3029 = vmatmul.msk.f32.vlgmr.msra.gmra.mxu3 %vm174_vm1, %v2639_v32 }
0x3f3f   :  { %3030 = vmatmul.msk.f32.vlgmr.msra.gmra.mxu0 %vm174_vm1, %v2562_v33 }
0x3fb4   :  { %v2682_v14 = vpop.f32.mrf.mxu0 }
0x3fb5   :  { %v2683_v20 = vadd.f32 %v2682_v14, %v2659_v43 }
0x3fb7   :  { %v2685_v6 = vadd.f32 %v4354_v48, %v2683_v20 }
0x3fb9   :  { %v2686_v3 = vsel %vm933_vm10, %v2685_v6, -inf }
0x3fba   :  { %2687 = vmax.xlane.f32.xlu2 %v2686_v3  ;;  %v2760_v48 = vpop.f32.mrf.mxu3 }
0x3fbc   :  { %v2782_v37 = vpop.f32.mrf.mxu0 }
0x402d   :  { %v2688_v25 = vpop.xlane.xlu2 %2687 }
0x402e   :  { %v2689_v0 = vsub.f32 %v2685_v6, %v2688_v25 }
0x4030   :  { %v2690_v24 = vmul.f32 1.442695, %v2689_v0 }
0x4032   :  { %3189 = vpow2.f32 %v2690_v24 }
0x4038   :  { %v3190_v50 = vpop.eup %3189 }
0x4039   :  { %v2692_v18 = vsel %vm933_vm10, %v3190_v50, 0.0 }
0x403a   :  { %2693 = vadd.xlane.f32.xlu0 %v2692_v18 }
0x40ad   :  { %v2694_v60 = vpop.xlane.xlu0 %2693 }
0x40ae   :  { %3191 = vrcp.f32 %v2694_v60 }
0x40b4   :  { %v3192_v7 = vpop.eup %3191 }
0x40b5   :  { %v2696_v8 = vmul.f32 %v3192_v7, %v3190_v50 }
0x40b7   :  { %3027 = vmatmul.msk.f32.vlgmr.msra.gmra.mxu1 %vm951_vm11, %v2696_v8 }
0x4134   :  { %v2717_v9 = vpop.f32.mrf.mxu1 }
0x4135   :  { %3028 = vmatmul.msk.f32.vlgmr.msra.gmra.mxu2 %vm174_vm1, %v2717_v9 }
0x41b8   :  { %v2740_v15 = vpop.f32.mrf.mxu2 }
0x41b9   :  { %v2761_v54 = vadd.f32 %v2760_v48, %v2740_v15 }
0x41bb   :  { %v2763_v21 = vadd.f32 %v4371_v59, %v2761_v54 }
0x41bd   :  { %v2764_v61 = vmax.f32 %v2763_v21, 0.0 }
0x41bf   :  { %3031 = vmatmul.msk.f32.vlgmr.msrb.gmra.mxu1 %vm174_vm1, %v2764_v61 }
0x423c   :  { %v2805_v40 = vpop.f32.mrf.mxu1 }
0x423d   :  { %v2806_v13 = vadd.f32 %v2805_v40, %v2782_v37 }
0x423f   :  { %v2808_v12 = vadd.f32 %v4382_v23, %v2806_v13 }
0x4241   :  { %2829 = vrot.lane.b32.xlu1 %v2808_v12, %s3398_s29  ;;  %v3032_v56 = vmul.f32 -1.442695, %v2808_v12 }
0x4243   :  { %3193 = vpow2.f32 %v3032_v56 }
0x4249   :  { %v3194_v4 = vpop.eup %3193 }
0x424a   :  { %v2812_v1 = vadd.f32 1.0, %v3194_v4 }
0x424c   :  { %3195 = vrcp.f32 %v2812_v1  ;;  %v2824_v28 = vand.u32 2147483648, %v2812_v1  ;;  %vm2818_vm10 = vweird.f32 %v2812_v1  ;;  %v2822_v5 = vand.u32 2147483647, %v2812_v1 }
0x424e   :  { %v2825_v33 = vor.u32 1.1754944e-38, %v2824_v28  ;;  %vm2823_vm9 = vcmp.eq.f32.partialorder %v2822_v5, 8.507059e+37 }
0x4252   :  { %v3196_v57 = vpop.eup %3195 }
0x4253   :  { %v2814_v2 = vmul.f32 %v3196_v57, %v2812_v1  ;;  %vm2819_vm0 = vweird.f32 %v3196_v57 }
0x4254   :  { %vm2820_vm11 = vmor %vm2818_vm10, %vm2819_vm0 }
0x4255   :  { %v2815_v58 = vsub.f32 1.0, %v2814_v2 }
0x4257   :  { %v2816_v62 = vmul.f32 %v3196_v57, %v2815_v58 }
0x4259   :  { %v2817_v59 = vadd.f32 %v3196_v57, %v2816_v62 }
0x425b   :  { %v2821_v39 = vsel %vm2820_vm11, %v3196_v57, %v2817_v59 }
0x425c   :  { %v2826_v42 = vsel %vm2823_vm9, %v2825_v33, %v2821_v39 }
0x425d   :  { %v2839_v45 = vsub.f32 1.0, %v2826_v42  ;;  %v2845_v38 = vmul.f32 %v2826_v42, %v4486_v31 }
0x42b3   :  { %v2830_v23 = vpop.permute.xlu1 %2829 }
0x42b4   :  { %v2832_v34 = vmul.f32 %v2830_v23, %v2826_v42 }
0x42b6   :  { %2834 = vrot.lane.b32.xlu2 %v2832_v34, %s3399_s6  ;;  %s3403_s6 = smov [#allocation12]  }
0x42b7   :  { %s2909_s7 = sshll.u32 %s3403_s6, 4  ;;  %s2910_s7 = int_to_ptr.vmem [resolvable:$true] %s2909_s7 }
0x42b8   :  { %2914 = dma.vmem_to_hbm [thread:$0]  %s2910_s7, 16, %s2912_s0, [#allocation13]  }
0x4310   :  { %v2835_v47 = vpop.permute.xlu2 %2834 }
0x4311   :  { %v2837_v16 = vadd.f32 %v2835_v47, %v2808_v12 }
0x4313   :  { %3197 = vtanh.f32 %v2837_v16 }
0x4319   :  { %v3198_v49 = vpop.eup %3197 }
0x431a   :  { %2841 = vrot.lane.b32.xlu0 %v3198_v49, %s3400_s30 }
0x438c   :  { %v2842_v51 = vpop.permute.xlu0 %2841 }
0x438d   :  { %v2844_v46 = vmul.f32 %v2842_v51, %v2839_v45 }
0x438f   :  { %v2846_v36 = vadd.f32 %v2845_v38, %v2844_v46 }
0x4391   :  { %2848 = vrot.lane.b32.xlu0 %v2846_v36, %s3400_s30 }
0x4403   :  { %v2849_v63 = vpop.permute.xlu0 %2848 }
0x4404   :  { %3033 = vmatmul.msk.f32.vlgmr.msrb.gmra.mxu2 %vm174_vm1, %v2849_v63 }
0x4487   :  { %v2869_v41 = vpop.f32.mrf.mxu2 }
0x4488   :  { %v2870_v22 = vadd.f32 %v4416_v44, %v2869_v41 }
0x448a   :  { %v2872_v35 = vsel %vm800_vm4, %v2870_v22, -inf }
0x448b   :  { %2873 = vmax.xlane.f32.xlu1 %v2872_v35 }
0x44fe   :  { %v2874_v26 = vpop.xlane.xlu1 %2873 }
0x44ff   :  { %v2875_v27 = vsub.f32 %v2870_v22, %v2874_v26 }
0x4501   :  { %v2876_v53 = vmul.f32 1.442695, %v2875_v27 }
0x4503   :  { %3199 = vpow2.f32 %v2876_v53 }
0x4509   :  { %v3200_v29 = vpop.eup %3199 }
0x450a   :  { %v2878_v31 = vsel %vm800_vm4, %v3200_v29, 0.0 }
0x450b   :  { %2879 = vadd.xlane.f32.xlu2 %v2878_v31 }
0x457e   :  { %v2880_v44 = vpop.xlane.xlu2 %2879 }
0x457f   :  { %3201 = vlog2.f32 %v2880_v44 }
0x4585   :  { %v3202_v10 = vpop.eup %3201 }
0x4586   :  { %v2882_v30 = vmul.f32 0.6931472, %v3202_v10 }
0x4588   :  { %v2883_v52 = vadd.f32 %v2882_v30, %v2874_v26 }
0x458a   :  { %v2884_v19 = vsub.f32 %v2870_v22, %v2883_v52 }
0x458c   :  { %2886 = vst [vmem:[#allocation11 + $0xc] sm:$0x3] %v2884_v19 }
0x458d   :  { %2903 = dma.vmem_to_hbm [thread:$0]  %s2896_s22, 224, %s2898_s9, [#allocation5], %s3398_s29, %s3398_s29, %s3405_s14  }
0x458e   :  { %3387 = dma.done.wait [#allocation5], 224  }
0x458f   :  { %3388 = vsyncadd [#allocation5], 4294967072 }
0x4590   :  { %3389 = dma.done.wait [#allocation13], 16  }
0x4591   :  { %3390 = vsyncadd [#allocation13], 4294967280 }
0x4592   :  { %2923 = vsyncpa [#allocation4], 1 }
0x4593   :  { %2924 = vsyncpa [#allocation7], 1 }
0x4594   :  { %2925 = vsyncpa [#allocation10], 1 }
0x4595   :  { %2926 = vsyncpa [#allocation5], 1 }
0x4596   :  { %2927 = vsyncpa [#allocation13], 1 }

</bundles_post_ra>
